<compile_context>
chip_gen: v7x
topology: tpu7x:2x2x1
jax: 0.10.0
libtpu: 0.0.40
codegen_flags: <defaults>
</compile_context>

<pallas_src>
import functools
import math

import jax
import jax.numpy as jnp
from jax.experimental import pallas as pl
from jax.experimental.pallas import tpu as pltpu


# ----------------------------------------------------------------------------
# Config
# ----------------------------------------------------------------------------
class PFVAEConfig:
    c, h, w = 4, 16, 16
    latent_dim = 8
    hidden = 32
    patch = 4
    free_nats = 0.0
    kl_scale = 1.0


def _round_up(a, b):
    return (a + b - 1) // b * b


# ----------------------------------------------------------------------------
# im2col glue (pure JAX, outside the kernel): NCHW -> (P, N, C*k*k)
# ----------------------------------------------------------------------------
def patchify_3d(x, k):
    N, C, H, W = x.shape
    Hk, Wk = H // k, W // k
    x = x.reshape(N, C, Hk, k, Wk, k)
    x = x.transpose(2, 4, 0, 1, 3, 5)           # (Hk, Wk, N, C, k, k)
    return x.reshape(Hk * Wk, N, C * k * k)     # (P, N, ckk)


# ----------------------------------------------------------------------------
# Fused Pallas kernel: encoder -> sample/KL -> decoder -> partial NELBO sums
# ----------------------------------------------------------------------------
def _pfvae_fused_kernel(cols_ref, eps_ref, mask_ref,
                        ecw_ref, ecb_ref,                       # enc patchify conv
                        efw_mu_ref, efw_ls_ref,                 # enc FC (mu / log_std)
                        efb_mu_ref, efb_ls_ref,
                        dfw_ref, dfb_ref,                       # dec FC (per-patch)
                        ddw_m_ref, ddw_ls_ref,                  # dec head (mean / log_std)
                        ddb_m_ref, ddb_ls_ref,
                        out_ref,                                # (1, 8, 128) partials
                        *, p, latent, ckk, n_split):
    f32 = jnp.float32
    bf16 = jnp.bfloat16
    nb = eps_ref.shape[0]

    mask = mask_ref[...]                                        # (NB, 1) f32
    ecw = ecw_ref[...]                                          # (ckk, hid) bf16
    ecb = ecb_ref[...]                                          # (1, hid)   f32

    # ---- encoder: per-patch conv + FC, split partial accumulators ----------
    acc_mu = [jnp.zeros((nb, latent), f32) for _ in range(n_split)]
    acc_ls = [jnp.zeros((nb, latent), f32) for _ in range(n_split)]
    for pp in range(p):
        x_bf = cols_ref[pp].astype(bf16)                        # (NB, ckk) tile-aligned
        h1 = jnp.dot(x_bf, ecw, preferred_element_type=f32) + ecb
        h1 = jnp.maximum(h1, 0.0).astype(bf16)                  # (NB, hid)
        s = pp % n_split
        acc_mu[s] = acc_mu[s] + jnp.dot(h1, efw_mu_ref[pp], preferred_element_type=f32)
        acc_ls[s] = acc_ls[s] + jnp.dot(h1, efw_ls_ref[pp], preferred_element_type=f32)
    mu = sum(acc_mu) + efb_mu_ref[...]                          # (NB, L)
    log_std = sum(acc_ls) + efb_ls_ref[...]                     # (NB, L)
    std = jnp.exp(log_std)

    # ---- reparameterized sample + analytic KL( q || N(0, I) ) --------------
    z = mu + std * eps_ref[...]                                 # (NB, L)
    kl_rows = jnp.sum(0.5 * (mu * mu + std * std) - log_std - 0.5,
                      axis=1, keepdims=True)                    # (NB, 1)
    kl_partial = jnp.sum(kl_rows * mask)

    # ---- decoder FC + head + Gaussian NLL, per patch ------------------------
    # TODO(synk): ddw_m / ddw_ls are loop-invariant RHS; explicit MXU staging
    # (pltpu.matmul_push_rhs / matmul_acc_lhs) could avoid re-pushing them.
    z_bf = z.astype(bf16)
    ddw_m = ddw_m_ref[...]                                      # (hid, ckk) bf16
    ddw_ls = ddw_ls_ref[...]
    ddb_m = ddb_m_ref[...]                                      # (1, ckk) f32
    ddb_ls = ddb_ls_ref[...]
    half_log_2pi = 0.5 * math.log(2.0 * math.pi)

    nll_acc = [jnp.zeros((nb, ckk), f32) for _ in range(2)]
    for pp in range(p):
        h2 = jnp.dot(z_bf, dfw_ref[pp], preferred_element_type=f32) + dfb_ref[pp]
        h2 = jnp.maximum(h2, 0.0).astype(bf16)                  # (NB, hid)
        mean_p = jnp.dot(h2, ddw_m, preferred_element_type=f32) + ddb_m
        ls_p = jnp.dot(h2, ddw_ls, preferred_element_type=f32) + ddb_ls
        x_p = cols_ref[pp]                                      # (NB, ckk) f32
        d = (x_p - mean_p) * jnp.exp(-ls_p)
        nll_acc[pp % 2] = nll_acc[pp % 2] + (0.5 * d * d + ls_p + half_log_2pi)
    nll_total = nll_acc[0] + nll_acc[1]                         # (NB, ckk)
    rec_partial = jnp.sum(nll_total * mask)

    # ---- lane-dense partial output: row 0 = kl, row 1 = rec ----------------
    row_ids = jax.lax.broadcasted_iota(jnp.int32, (8, 128), 0)
    tile = jnp.where(row_ids == 0, kl_partial,
                     jnp.where(row_ids == 1, rec_partial, 0.0)).astype(f32)
    out_ref[...] = tile[None]


# ----------------------------------------------------------------------------
# Parameters (weights bf16 for the MXU path, biases f32)
# ----------------------------------------------------------------------------
def init_params(cfg, key):
    k = cfg.patch
    P = (cfg.h // k) * (cfg.w // k)
    ckk = cfg.c * k * k
    hid, L = cfg.hidden, cfg.latent_dim
    keys = jax.random.split(key, 6)
    bf = jnp.bfloat16

    def w_init(kk, shape, fan_in):
        return ((jax.random.normal(kk, shape, jnp.float32) / math.sqrt(fan_in)) * 0.5)

    return {
        # encoder patchify conv (kernel = stride = patch)
        "enc_conv_w": w_init(keys[0], (ckk, hid), ckk).astype(bf),
        "enc_conv_b": jnp.zeros((1, hid), jnp.float32),
        # encoder FC -> mu / log_std, per-patch 3D layout (P, hid, L)
        "enc_fc_w_mu": w_init(keys[1], (P, hid, L), P * hid).astype(bf),
        "enc_fc_w_ls": w_init(keys[2], (P, hid, L), P * hid).astype(bf),
        "enc_fc_b_mu": jnp.zeros((1, L), jnp.float32),
        "enc_fc_b_ls": jnp.zeros((1, L), jnp.float32),
        # decoder FC: latent -> per-patch hidden, 3D layout (P, L, hid)
        "dec_fc_w": w_init(keys[3], (P, L, hid), L).astype(bf),
        "dec_fc_b": jnp.zeros((P, 1, hid), jnp.float32),
        # decoder transposed conv head (kernel = stride = patch): mean / log_std
        "dec_deconv_w_m": w_init(keys[4], (hid, ckk), hid).astype(bf),
        "dec_deconv_w_ls": w_init(keys[5], (hid, ckk), hid).astype(bf),
        "dec_deconv_b_m": jnp.zeros((1, ckk), jnp.float32),
        "dec_deconv_b_ls": jnp.zeros((1, ckk), jnp.float32),
    }


_WEIGHT_ORDER = ("enc_conv_w", "enc_conv_b",
                 "enc_fc_w_mu", "enc_fc_w_ls", "enc_fc_b_mu", "enc_fc_b_ls",
                 "dec_fc_w", "dec_fc_b",
                 "dec_deconv_w_m", "dec_deconv_w_ls",
                 "dec_deconv_b_m", "dec_deconv_b_ls")


def _full_spec(shape):
    zeros = (0,) * len(shape)
    return pl.BlockSpec(shape, lambda i, _z=zeros: _z)


# ----------------------------------------------------------------------------
# Forward (single pallas_call, batch-parallel grid)
# ----------------------------------------------------------------------------
def pfvae_forward(params, x, eps, cfg, *, batch_block=128):
    N, C, H, W = x.shape
    k = cfg.patch
    P = (H // k) * (W // k)
    ckk = C * k * k
    hid, L = cfg.hidden, cfg.latent_dim

    nb = min(_round_up(batch_block, 8), _round_up(N, 8))        # rows per block
    npad = _round_up(N, nb)
    num_blocks = npad // nb

    cols = patchify_3d(x, k)                                    # (P, N, ckk) f32
    eps_p = eps
    if npad != N:
        cols = jnp.pad(cols, ((0, 0), (0, npad - N), (0, 0)))
        eps_p = jnp.pad(eps, ((0, npad - N), (0, 0)))
    mask = (jnp.arange(npad) < N).astype(jnp.float32).reshape(npad, 1)

    kernel = functools.partial(_pfvae_fused_kernel,
                               p=P, latent=L, ckk=ckk, n_split=min(4, P))

    # --- BlockSpecs (batch-blocked inputs + full-resident weights) ----------
    if num_blocks >= 4:
        cols_spec = pl.BlockSpec((P, nb, ckk), lambda i: (0, i, 0),
                                 pipeline_mode=pl.Buffered(3))
    else:
        cols_spec = pl.BlockSpec((P, nb, ckk), lambda i: (0, i, 0))
    in_specs = [
        cols_spec,
        pl.BlockSpec((nb, L), lambda i: (i, 0)),
        pl.BlockSpec((nb, 1), lambda i: (i, 0)),
    ] + [_full_spec(tuple(params[name].shape)) for name in _WEIGHT_ORDER]
    out_spec = pl.BlockSpec((1, 8, 128), lambda i: (i, 0, 0))

    # --- cost estimate (helps XLA schedule around the custom call) ----------
    flops = 2 * npad * P * (ckk * hid + 2 * hid * L + L * hid + 2 * hid * ckk)
    transcendentals = npad * (L + 2 * P * ckk)
    weight_bytes = sum(int(params[name].size) * params[name].dtype.itemsize
                       for name in _WEIGHT_ORDER)
    bytes_accessed = (int(cols.size) * 4 + int(eps_p.size) * 4 + int(mask.size) * 4
                      + weight_bytes + num_blocks * 8 * 128 * 4)
    cost = pl.CostEstimate(flops=int(flops),
                           transcendentals=int(transcendentals),
                           bytes_accessed=int(bytes_accessed))

    partials = pl.pallas_call(
        kernel,
        grid=(num_blocks,),
        in_specs=in_specs,
        out_specs=out_spec,
        out_shape=jax.ShapeDtypeStruct((num_blocks, 8, 128), jnp.float32),
        compiler_params=pltpu.CompilerParams(
            dimension_semantics=("parallel",),
            vmem_limit_bytes=32 * 1024 * 1024),
        cost_estimate=cost,
    )(cols, eps_p, mask, *[params[name] for name in _WEIGHT_ORDER])

    kl = jnp.sum(partials[:, 0, 0]) / N
    rec = jnp.sum(partials[:, 1, 0]) / N
    # TODO(synk): kl.detach() when kl < free_nats does not change the forward value.
    loss = kl * cfg.kl_scale + rec
    return loss, {"NELBO": loss, "KL divergence": kl, "reconstruction loss": rec}


# ----------------------------------------------------------------------------
# Pure-JAX reference (same bf16-matmul / f32-accumulate precision path)
# ----------------------------------------------------------------------------
def pfvae_reference(params, x, eps, cfg):
    N = x.shape[0]
    k = cfg.patch
    f32, bf = jnp.float32, jnp.bfloat16

    cols = patchify_3d(x, k)                                     # (P, N, ckk) f32
    h1 = jnp.maximum(
        jnp.einsum('pnc,ch->pnh', cols.astype(bf), params["enc_conv_w"],
                   preferred_element_type=f32) + params["enc_conv_b"], 0.0)
    h1b = h1.astype(bf)
    mu = jnp.einsum('pnh,phl->nl', h1b, params["enc_fc_w_mu"],
                    preferred_element_type=f32) + params["enc_fc_b_mu"]
    log_std = jnp.einsum('pnh,phl->nl', h1b, params["enc_fc_w_ls"],
                         preferred_element_type=f32) + params["enc_fc_b_ls"]
    std = jnp.exp(log_std)
    z = mu + std * eps
    kl = jnp.mean(jnp.sum(0.5 * (mu ** 2 + std ** 2) - log_std - 0.5, axis=1))

    zb = z.astype(bf)
    h2 = jnp.maximum(
        jnp.einsum('nl,plh->pnh', zb, params["dec_fc_w"],
                   preferred_element_type=f32) + params["dec_fc_b"], 0.0)
    h2b = h2.astype(bf)
    mean = jnp.einsum('pnh,hc->pnc', h2b, params["dec_deconv_w_m"],
                      preferred_element_type=f32) + params["dec_deconv_b_m"]
    ls2 = jnp.einsum('pnh,hc->pnc', h2b, params["dec_deconv_w_ls"],
                     preferred_element_type=f32) + params["dec_deconv_b_ls"]
    nll = (0.5 * ((cols - mean) * jnp.exp(-ls2)) ** 2
           + ls2 + 0.5 * math.log(2.0 * math.pi))
    rec = jnp.sum(nll) / N
    loss = kl * cfg.kl_scale + rec
    return loss, kl, rec


if __name__ == "__main__":
    cfg = PFVAEConfig()
    key = jax.random.PRNGKey(0)
    k_param, k_x, k_eps = jax.random.split(key, 3)

    params = init_params(cfg, k_param)
    x = jax.random.normal(k_x, (2, cfg.c, cfg.h, cfg.w), jnp.float32)
    eps = jax.random.normal(k_eps, (2, cfg.latent_dim), jnp.float32)

    loss, aux = pfvae_forward(params, x, eps, cfg)
    jax.block_until_ready(loss)

    ref_loss, ref_kl, ref_rec = pfvae_reference(params, x, eps, cfg)
    assert jnp.allclose(loss, ref_loss, rtol=2e-3, atol=1e-2), (loss, ref_loss)
    assert jnp.allclose(aux["KL divergence"], ref_kl, rtol=2e-3, atol=1e-2), \
        (aux["KL divergence"], ref_kl)
    assert jnp.allclose(aux["reconstruction loss"], ref_rec, rtol=2e-3, atol=1e-2), \
        (aux["reconstruction loss"], ref_rec)

    print("KERNEL_OK")
</pallas_src>

<mosaic_0001>
module attributes {stable_mosaic.version = 11 : i64} {
  func.func @_pfvae_fused_kernel(%arg0: i32, %arg1: memref<16x8x64xf32, #tpu.memory_space<vmem>>, %arg2: memref<8x8xf32, #tpu.memory_space<vmem>>, %arg3: memref<8x1xf32, #tpu.memory_space<vmem>>, %arg4: memref<64x32xbf16, #tpu.memory_space<vmem>>, %arg5: memref<1x32xf32, #tpu.memory_space<vmem>>, %arg6: memref<16x32x8xbf16, #tpu.memory_space<vmem>>, %arg7: memref<16x32x8xbf16, #tpu.memory_space<vmem>>, %arg8: memref<1x8xf32, #tpu.memory_space<vmem>>, %arg9: memref<1x8xf32, #tpu.memory_space<vmem>>, %arg10: memref<16x8x32xbf16, #tpu.memory_space<vmem>>, %arg11: memref<16x1x32xf32, #tpu.memory_space<vmem>>, %arg12: memref<32x64xbf16, #tpu.memory_space<vmem>>, %arg13: memref<32x64xbf16, #tpu.memory_space<vmem>>, %arg14: memref<1x64xf32, #tpu.memory_space<vmem>>, %arg15: memref<1x64xf32, #tpu.memory_space<vmem>>, %arg16: memref<1x8x128xf32, #tpu.memory_space<vmem>>) attributes {dimension_semantics = [#tpu.dimension_semantics<parallel>], iteration_bounds = array<i64: 1>, scalar_prefetch = 0 : i64, scratch_operands = 0 : i64, tpu.core_type = #tpu.core_type<tc>, window_params = [{transform_indices = @transform_0, window_bounds = array<i64: 16, 8, 64>}, {transform_indices = @transform_1, window_bounds = array<i64: 8, 8>}, {transform_indices = @transform_2, window_bounds = array<i64: 8, 1>}, {pipeline_mode = #tpu.pipeline_mode<synchronous>, transform_indices = @transform_3, window_bounds = array<i64: 64, 32>}, {pipeline_mode = #tpu.pipeline_mode<synchronous>, transform_indices = @transform_4, window_bounds = array<i64: 1, 32>}, {pipeline_mode = #tpu.pipeline_mode<synchronous>, transform_indices = @transform_5, window_bounds = array<i64: 16, 32, 8>}, {pipeline_mode = #tpu.pipeline_mode<synchronous>, transform_indices = @transform_6, window_bounds = array<i64: 16, 32, 8>}, {pipeline_mode = #tpu.pipeline_mode<synchronous>, transform_indices = @transform_7, window_bounds = array<i64: 1, 8>}, {pipeline_mode = #tpu.pipeline_mode<synchronous>, transform_indices = @transform_8, window_bounds = array<i64: 1, 8>}, {pipeline_mode = #tpu.pipeline_mode<synchronous>, transform_indices = @transform_9, window_bounds = array<i64: 16, 8, 32>}, {pipeline_mode = #tpu.pipeline_mode<synchronous>, transform_indices = @transform_10, window_bounds = array<i64: 16, 1, 32>}, {pipeline_mode = #tpu.pipeline_mode<synchronous>, transform_indices = @transform_11, window_bounds = array<i64: 32, 64>}, {pipeline_mode = #tpu.pipeline_mode<synchronous>, transform_indices = @transform_12, window_bounds = array<i64: 32, 64>}, {pipeline_mode = #tpu.pipeline_mode<synchronous>, transform_indices = @transform_13, window_bounds = array<i64: 1, 64>}, {pipeline_mode = #tpu.pipeline_mode<synchronous>, transform_indices = @transform_14, window_bounds = array<i64: 1, 64>}, {transform_indices = @transform_15, window_bounds = array<i64: 1, 8, 128>}]} {
    %c0 = arith.constant 0 : index
    %c0_0 = arith.constant 0 : index
    %0 = vector.load %arg3[%c0, %c0_0] : memref<8x1xf32, #tpu.memory_space<vmem>>, vector<8x1xf32>
    %c0_1 = arith.constant 0 : index
    %c0_2 = arith.constant 0 : index
    %1 = vector.load %arg4[%c0_1, %c0_2] : memref<64x32xbf16, #tpu.memory_space<vmem>>, vector<64x32xbf16>
    %c0_3 = arith.constant 0 : index
    %c0_4 = arith.constant 0 : index
    %2 = vector.load %arg5[%c0_3, %c0_4] : memref<1x32xf32, #tpu.memory_space<vmem>>, vector<1x32xf32>
    %cst = arith.constant 0.000000e+00 : f32
    %3 = vector.broadcast %cst : f32 to vector<8x8xf32>
    %cst_5 = arith.constant 0.000000e+00 : f32
    %4 = vector.broadcast %cst_5 : f32 to vector<8x8xf32>
    %cst_6 = arith.constant 0.000000e+00 : f32
    %5 = vector.broadcast %cst_6 : f32 to vector<8x8xf32>
    %cst_7 = arith.constant 0.000000e+00 : f32
    %6 = vector.broadcast %cst_7 : f32 to vector<8x8xf32>
    %cst_8 = arith.constant 0.000000e+00 : f32
    %7 = vector.broadcast %cst_8 : f32 to vector<8x8xf32>
    %cst_9 = arith.constant 0.000000e+00 : f32
    %8 = vector.broadcast %cst_9 : f32 to vector<8x8xf32>
    %cst_10 = arith.constant 0.000000e+00 : f32
    %9 = vector.broadcast %cst_10 : f32 to vector<8x8xf32>
    %cst_11 = arith.constant 0.000000e+00 : f32
    %10 = vector.broadcast %cst_11 : f32 to vector<8x8xf32>
    %c0_12 = arith.constant 0 : index
    %c0_13 = arith.constant 0 : index
    %c0_14 = arith.constant 0 : index
    %11 = vector.load %arg1[%c0_12, %c0_13, %c0_14] : memref<16x8x64xf32, #tpu.memory_space<vmem>>, vector<1x8x64xf32>
    %12 = vector.shape_cast %11 : vector<1x8x64xf32> to vector<8x64xf32>
    %13 = arith.truncf %12 : vector<8x64xf32> to vector<8x64xbf16>
    %cst_15 = arith.constant dense<0.000000e+00> : vector<8x32xf32>
    %14 = tpu.matmul %13, %1, %cst_15 {dimension_numbers = #tpu.dot_dimension_numbers<[1], [0], [0], [1], [0, 0, 1, 1], [], []>} : vector<8x64xbf16>, vector<64x32xbf16>, vector<8x32xf32> -> vector<8x32xf32>
    %15 = vector.broadcast %2 : vector<1x32xf32> to vector<8x32xf32>
    %16 = arith.addf %14, %15 : vector<8x32xf32>
    %cst_16 = arith.constant 0.000000e+00 : f32
    %17 = vector.broadcast %cst_16 : f32 to vector<8x32xf32>
    %18 = arith.maximumf %16, %17 : vector<8x32xf32>
    %19 = arith.truncf %18 : vector<8x32xf32> to vector<8x32xbf16>
    %c0_17 = arith.constant 0 : index
    %c0_18 = arith.constant 0 : index
    %c0_19 = arith.constant 0 : index
    %20 = vector.load %arg6[%c0_17, %c0_18, %c0_19] : memref<16x32x8xbf16, #tpu.memory_space<vmem>>, vector<1x32x8xbf16>
    %21 = vector.shape_cast %20 : vector<1x32x8xbf16> to vector<32x8xbf16>
    %cst_20 = arith.constant dense<0.000000e+00> : vector<8x8xf32>
    %22 = tpu.matmul %19, %21, %cst_20 {dimension_numbers = #tpu.dot_dimension_numbers<[1], [0], [0], [1], [0, 0, 1, 1], [], []>} : vector<8x32xbf16>, vector<32x8xbf16>, vector<8x8xf32> -> vector<8x8xf32>
    %23 = arith.addf %3, %22 : vector<8x8xf32>
    %c0_21 = arith.constant 0 : index
    %c0_22 = arith.constant 0 : index
    %c0_23 = arith.constant 0 : index
    %24 = vector.load %arg7[%c0_21, %c0_22, %c0_23] : memref<16x32x8xbf16, #tpu.memory_space<vmem>>, vector<1x32x8xbf16>
    %25 = vector.shape_cast %24 : vector<1x32x8xbf16> to vector<32x8xbf16>
    %cst_24 = arith.constant dense<0.000000e+00> : vector<8x8xf32>
    %26 = tpu.matmul %19, %25, %cst_24 {dimension_numbers = #tpu.dot_dimension_numbers<[1], [0], [0], [1], [0, 0, 1, 1], [], []>} : vector<8x32xbf16>, vector<32x8xbf16>, vector<8x8xf32> -> vector<8x8xf32>
    %27 = arith.addf %7, %26 : vector<8x8xf32>
    %c1 = arith.constant 1 : index
    %c0_25 = arith.constant 0 : index
    %c0_26 = arith.constant 0 : index
    %28 = vector.load %arg1[%c1, %c0_25, %c0_26] : memref<16x8x64xf32, #tpu.memory_space<vmem>>, vector<1x8x64xf32>
    %29 = vector.shape_cast %28 : vector<1x8x64xf32> to vector<8x64xf32>
    %30 = arith.truncf %29 : vector<8x64xf32> to vector<8x64xbf16>
    %cst_27 = arith.constant dense<0.000000e+00> : vector<8x32xf32>
    %31 = tpu.matmul %30, %1, %cst_27 {dimension_numbers = #tpu.dot_dimension_numbers<[1], [0], [0], [1], [0, 0, 1, 1], [], []>} : vector<8x64xbf16>, vector<64x32xbf16>, vector<8x32xf32> -> vector<8x32xf32>
    %32 = vector.broadcast %2 : vector<1x32xf32> to vector<8x32xf32>
    %33 = arith.addf %31, %32 : vector<8x32xf32>
    %cst_28 = arith.constant 0.000000e+00 : f32
    %34 = vector.broadcast %cst_28 : f32 to vector<8x32xf32>
    %35 = arith.maximumf %33, %34 : vector<8x32xf32>
    %36 = arith.truncf %35 : vector<8x32xf32> to vector<8x32xbf16>
    %c1_29 = arith.constant 1 : index
    %c0_30 = arith.constant 0 : index
    %c0_31 = arith.constant 0 : index
    %37 = vector.load %arg6[%c1_29, %c0_30, %c0_31] : memref<16x32x8xbf16, #tpu.memory_space<vmem>>, vector<1x32x8xbf16>
    %38 = vector.shape_cast %37 : vector<1x32x8xbf16> to vector<32x8xbf16>
    %cst_32 = arith.constant dense<0.000000e+00> : vector<8x8xf32>
    %39 = tpu.matmul %36, %38, %cst_32 {dimension_numbers = #tpu.dot_dimension_numbers<[1], [0], [0], [1], [0, 0, 1, 1], [], []>} : vector<8x32xbf16>, vector<32x8xbf16>, vector<8x8xf32> -> vector<8x8xf32>
    %40 = arith.addf %4, %39 : vector<8x8xf32>
    %c1_33 = arith.constant 1 : index
    %c0_34 = arith.constant 0 : index
    %c0_35 = arith.constant 0 : index
    %41 = vector.load %arg7[%c1_33, %c0_34, %c0_35] : memref<16x32x8xbf16, #tpu.memory_space<vmem>>, vector<1x32x8xbf16>
    %42 = vector.shape_cast %41 : vector<1x32x8xbf16> to vector<32x8xbf16>
    %cst_36 = arith.constant dense<0.000000e+00> : vector<8x8xf32>
    %43 = tpu.matmul %36, %42, %cst_36 {dimension_numbers = #tpu.dot_dimension_numbers<[1], [0], [0], [1], [0, 0, 1, 1], [], []>} : vector<8x32xbf16>, vector<32x8xbf16>, vector<8x8xf32> -> vector<8x8xf32>
    %44 = arith.addf %8, %43 : vector<8x8xf32>
    %c2 = arith.constant 2 : index
    %c0_37 = arith.constant 0 : index
    %c0_38 = arith.constant 0 : index
    %45 = vector.load %arg1[%c2, %c0_37, %c0_38] : memref<16x8x64xf32, #tpu.memory_space<vmem>>, vector<1x8x64xf32>
    %46 = vector.shape_cast %45 : vector<1x8x64xf32> to vector<8x64xf32>
    %47 = arith.truncf %46 : vector<8x64xf32> to vector<8x64xbf16>
    %cst_39 = arith.constant dense<0.000000e+00> : vector<8x32xf32>
    %48 = tpu.matmul %47, %1, %cst_39 {dimension_numbers = #tpu.dot_dimension_numbers<[1], [0], [0], [1], [0, 0, 1, 1], [], []>} : vector<8x64xbf16>, vector<64x32xbf16>, vector<8x32xf32> -> vector<8x32xf32>
    %49 = vector.broadcast %2 : vector<1x32xf32> to vector<8x32xf32>
    %50 = arith.addf %48, %49 : vector<8x32xf32>
    %cst_40 = arith.constant 0.000000e+00 : f32
    %51 = vector.broadcast %cst_40 : f32 to vector<8x32xf32>
    %52 = arith.maximumf %50, %51 : vector<8x32xf32>
    %53 = arith.truncf %52 : vector<8x32xf32> to vector<8x32xbf16>
    %c2_41 = arith.constant 2 : index
    %c0_42 = arith.constant 0 : index
    %c0_43 = arith.constant 0 : index
    %54 = vector.load %arg6[%c2_41, %c0_42, %c0_43] : memref<16x32x8xbf16, #tpu.memory_space<vmem>>, vector<1x32x8xbf16>
    %55 = vector.shape_cast %54 : vector<1x32x8xbf16> to vector<32x8xbf16>
    %cst_44 = arith.constant dense<0.000000e+00> : vector<8x8xf32>
    %56 = tpu.matmul %53, %55, %cst_44 {dimension_numbers = #tpu.dot_dimension_numbers<[1], [0], [0], [1], [0, 0, 1, 1], [], []>} : vector<8x32xbf16>, vector<32x8xbf16>, vector<8x8xf32> -> vector<8x8xf32>
    %57 = arith.addf %5, %56 : vector<8x8xf32>
    %c2_45 = arith.constant 2 : index
    %c0_46 = arith.constant 0 : index
    %c0_47 = arith.constant 0 : index
    %58 = vector.load %arg7[%c2_45, %c0_46, %c0_47] : memref<16x32x8xbf16, #tpu.memory_space<vmem>>, vector<1x32x8xbf16>
    %59 = vector.shape_cast %58 : vector<1x32x8xbf16> to vector<32x8xbf16>
    %cst_48 = arith.constant dense<0.000000e+00> : vector<8x8xf32>
    %60 = tpu.matmul %53, %59, %cst_48 {dimension_numbers = #tpu.dot_dimension_numbers<[1], [0], [0], [1], [0, 0, 1, 1], [], []>} : vector<8x32xbf16>, vector<32x8xbf16>, vector<8x8xf32> -> vector<8x8xf32>
    %61 = arith.addf %9, %60 : vector<8x8xf32>
    %c3 = arith.constant 3 : index
    %c0_49 = arith.constant 0 : index
    %c0_50 = arith.constant 0 : index
    %62 = vector.load %arg1[%c3, %c0_49, %c0_50] : memref<16x8x64xf32, #tpu.memory_space<vmem>>, vector<1x8x64xf32>
    %63 = vector.shape_cast %62 : vector<1x8x64xf32> to vector<8x64xf32>
    %64 = arith.truncf %63 : vector<8x64xf32> to vector<8x64xbf16>
    %cst_51 = arith.constant dense<0.000000e+00> : vector<8x32xf32>
    %65 = tpu.matmul %64, %1, %cst_51 {dimension_numbers = #tpu.dot_dimension_numbers<[1], [0], [0], [1], [0, 0, 1, 1], [], []>} : vector<8x64xbf16>, vector<64x32xbf16>, vector<8x32xf32> -> vector<8x32xf32>
    %66 = vector.broadcast %2 : vector<1x32xf32> to vector<8x32xf32>
    %67 = arith.addf %65, %66 : vector<8x32xf32>
    %cst_52 = arith.constant 0.000000e+00 : f32
    %68 = vector.broadcast %cst_52 : f32 to vector<8x32xf32>
    %69 = arith.maximumf %67, %68 : vector<8x32xf32>
    %70 = arith.truncf %69 : vector<8x32xf32> to vector<8x32xbf16>
    %c3_53 = arith.constant 3 : index
    %c0_54 = arith.constant 0 : index
    %c0_55 = arith.constant 0 : index
    %71 = vector.load %arg6[%c3_53, %c0_54, %c0_55] : memref<16x32x8xbf16, #tpu.memory_space<vmem>>, vector<1x32x8xbf16>
    %72 = vector.shape_cast %71 : vector<1x32x8xbf16> to vector<32x8xbf16>
    %cst_56 = arith.constant dense<0.000000e+00> : vector<8x8xf32>
    %73 = tpu.matmul %70, %72, %cst_56 {dimension_numbers = #tpu.dot_dimension_numbers<[1], [0], [0], [1], [0, 0, 1, 1], [], []>} : vector<8x32xbf16>, vector<32x8xbf16>, vector<8x8xf32> -> vector<8x8xf32>
    %74 = arith.addf %6, %73 : vector<8x8xf32>
    %c3_57 = arith.constant 3 : index
    %c0_58 = arith.constant 0 : index
    %c0_59 = arith.constant 0 : index
    %75 = vector.load %arg7[%c3_57, %c0_58, %c0_59] : memref<16x32x8xbf16, #tpu.memory_space<vmem>>, vector<1x32x8xbf16>
    %76 = vector.shape_cast %75 : vector<1x32x8xbf16> to vector<32x8xbf16>
    %cst_60 = arith.constant dense<0.000000e+00> : vector<8x8xf32>
    %77 = tpu.matmul %70, %76, %cst_60 {dimension_numbers = #tpu.dot_dimension_numbers<[1], [0], [0], [1], [0, 0, 1, 1], [], []>} : vector<8x32xbf16>, vector<32x8xbf16>, vector<8x8xf32> -> vector<8x8xf32>
    %78 = arith.addf %10, %77 : vector<8x8xf32>
    %c4 = arith.constant 4 : index
    %c0_61 = arith.constant 0 : index
    %c0_62 = arith.constant 0 : index
    %79 = vector.load %arg1[%c4, %c0_61, %c0_62] : memref<16x8x64xf32, #tpu.memory_space<vmem>>, vector<1x8x64xf32>
    %80 = vector.shape_cast %79 : vector<1x8x64xf32> to vector<8x64xf32>
    %81 = arith.truncf %80 : vector<8x64xf32> to vector<8x64xbf16>
    %cst_63 = arith.constant dense<0.000000e+00> : vector<8x32xf32>
    %82 = tpu.matmul %81, %1, %cst_63 {dimension_numbers = #tpu.dot_dimension_numbers<[1], [0], [0], [1], [0, 0, 1, 1], [], []>} : vector<8x64xbf16>, vector<64x32xbf16>, vector<8x32xf32> -> vector<8x32xf32>
    %83 = vector.broadcast %2 : vector<1x32xf32> to vector<8x32xf32>
    %84 = arith.addf %82, %83 : vector<8x32xf32>
    %cst_64 = arith.constant 0.000000e+00 : f32
    %85 = vector.broadcast %cst_64 : f32 to vector<8x32xf32>
    %86 = arith.maximumf %84, %85 : vector<8x32xf32>
    %87 = arith.truncf %86 : vector<8x32xf32> to vector<8x32xbf16>
    %c4_65 = arith.constant 4 : index
    %c0_66 = arith.constant 0 : index
    %c0_67 = arith.constant 0 : index
    %88 = vector.load %arg6[%c4_65, %c0_66, %c0_67] : memref<16x32x8xbf16, #tpu.memory_space<vmem>>, vector<1x32x8xbf16>
    %89 = vector.shape_cast %88 : vector<1x32x8xbf16> to vector<32x8xbf16>
    %cst_68 = arith.constant dense<0.000000e+00> : vector<8x8xf32>
    %90 = tpu.matmul %87, %89, %cst_68 {dimension_numbers = #tpu.dot_dimension_numbers<[1], [0], [0], [1], [0, 0, 1, 1], [], []>} : vector<8x32xbf16>, vector<32x8xbf16>, vector<8x8xf32> -> vector<8x8xf32>
    %91 = arith.addf %23, %90 : vector<8x8xf32>
    %c4_69 = arith.constant 4 : index
    %c0_70 = arith.constant 0 : index
    %c0_71 = arith.constant 0 : index
    %92 = vector.load %arg7[%c4_69, %c0_70, %c0_71] : memref<16x32x8xbf16, #tpu.memory_space<vmem>>, vector<1x32x8xbf16>
    %93 = vector.shape_cast %92 : vector<1x32x8xbf16> to vector<32x8xbf16>
    %cst_72 = arith.constant dense<0.000000e+00> : vector<8x8xf32>
    %94 = tpu.matmul %87, %93, %cst_72 {dimension_numbers = #tpu.dot_dimension_numbers<[1], [0], [0], [1], [0, 0, 1, 1], [], []>} : vector<8x32xbf16>, vector<32x8xbf16>, vector<8x8xf32> -> vector<8x8xf32>
    %95 = arith.addf %27, %94 : vector<8x8xf32>
    %c5 = arith.constant 5 : index
    %c0_73 = arith.constant 0 : index
    %c0_74 = arith.constant 0 : index
    %96 = vector.load %arg1[%c5, %c0_73, %c0_74] : memref<16x8x64xf32, #tpu.memory_space<vmem>>, vector<1x8x64xf32>
    %97 = vector.shape_cast %96 : vector<1x8x64xf32> to vector<8x64xf32>
    %98 = arith.truncf %97 : vector<8x64xf32> to vector<8x64xbf16>
    %cst_75 = arith.constant dense<0.000000e+00> : vector<8x32xf32>
    %99 = tpu.matmul %98, %1, %cst_75 {dimension_numbers = #tpu.dot_dimension_numbers<[1], [0], [0], [1], [0, 0, 1, 1], [], []>} : vector<8x64xbf16>, vector<64x32xbf16>, vector<8x32xf32> -> vector<8x32xf32>
    %100 = vector.broadcast %2 : vector<1x32xf32> to vector<8x32xf32>
    %101 = arith.addf %99, %100 : vector<8x32xf32>
    %cst_76 = arith.constant 0.000000e+00 : f32
    %102 = vector.broadcast %cst_76 : f32 to vector<8x32xf32>
    %103 = arith.maximumf %101, %102 : vector<8x32xf32>
    %104 = arith.truncf %103 : vector<8x32xf32> to vector<8x32xbf16>
    %c5_77 = arith.constant 5 : index
    %c0_78 = arith.constant 0 : index
    %c0_79 = arith.constant 0 : index
    %105 = vector.load %arg6[%c5_77, %c0_78, %c0_79] : memref<16x32x8xbf16, #tpu.memory_space<vmem>>, vector<1x32x8xbf16>
    %106 = vector.shape_cast %105 : vector<1x32x8xbf16> to vector<32x8xbf16>
    %cst_80 = arith.constant dense<0.000000e+00> : vector<8x8xf32>
    %107 = tpu.matmul %104, %106, %cst_80 {dimension_numbers = #tpu.dot_dimension_numbers<[1], [0], [0], [1], [0, 0, 1, 1], [], []>} : vector<8x32xbf16>, vector<32x8xbf16>, vector<8x8xf32> -> vector<8x8xf32>
    %108 = arith.addf %40, %107 : vector<8x8xf32>
    %c5_81 = arith.constant 5 : index
    %c0_82 = arith.constant 0 : index
    %c0_83 = arith.constant 0 : index
    %109 = vector.load %arg7[%c5_81, %c0_82, %c0_83] : memref<16x32x8xbf16, #tpu.memory_space<vmem>>, vector<1x32x8xbf16>
    %110 = vector.shape_cast %109 : vector<1x32x8xbf16> to vector<32x8xbf16>
    %cst_84 = arith.constant dense<0.000000e+00> : vector<8x8xf32>
    %111 = tpu.matmul %104, %110, %cst_84 {dimension_numbers = #tpu.dot_dimension_numbers<[1], [0], [0], [1], [0, 0, 1, 1], [], []>} : vector<8x32xbf16>, vector<32x8xbf16>, vector<8x8xf32> -> vector<8x8xf32>
    %112 = arith.addf %44, %111 : vector<8x8xf32>
    %c6 = arith.constant 6 : index
    %c0_85 = arith.constant 0 : index
    %c0_86 = arith.constant 0 : index
    %113 = vector.load %arg1[%c6, %c0_85, %c0_86] : memref<16x8x64xf32, #tpu.memory_space<vmem>>, vector<1x8x64xf32>
    %114 = vector.shape_cast %113 : vector<1x8x64xf32> to vector<8x64xf32>
    %115 = arith.truncf %114 : vector<8x64xf32> to vector<8x64xbf16>
    %cst_87 = arith.constant dense<0.000000e+00> : vector<8x32xf32>
    %116 = tpu.matmul %115, %1, %cst_87 {dimension_numbers = #tpu.dot_dimension_numbers<[1], [0], [0], [1], [0, 0, 1, 1], [], []>} : vector<8x64xbf16>, vector<64x32xbf16>, vector<8x32xf32> -> vector<8x32xf32>
    %117 = vector.broadcast %2 : vector<1x32xf32> to vector<8x32xf32>
    %118 = arith.addf %116, %117 : vector<8x32xf32>
    %cst_88 = arith.constant 0.000000e+00 : f32
    %119 = vector.broadcast %cst_88 : f32 to vector<8x32xf32>
    %120 = arith.maximumf %118, %119 : vector<8x32xf32>
    %121 = arith.truncf %120 : vector<8x32xf32> to vector<8x32xbf16>
    %c6_89 = arith.constant 6 : index
    %c0_90 = arith.constant 0 : index
    %c0_91 = arith.constant 0 : index
    %122 = vector.load %arg6[%c6_89, %c0_90, %c0_91] : memref<16x32x8xbf16, #tpu.memory_space<vmem>>, vector<1x32x8xbf16>
    %123 = vector.shape_cast %122 : vector<1x32x8xbf16> to vector<32x8xbf16>
    %cst_92 = arith.constant dense<0.000000e+00> : vector<8x8xf32>
    %124 = tpu.matmul %121, %123, %cst_92 {dimension_numbers = #tpu.dot_dimension_numbers<[1], [0], [0], [1], [0, 0, 1, 1], [], []>} : vector<8x32xbf16>, vector<32x8xbf16>, vector<8x8xf32> -> vector<8x8xf32>
    %125 = arith.addf %57, %124 : vector<8x8xf32>
    %c6_93 = arith.constant 6 : index
    %c0_94 = arith.constant 0 : index
    %c0_95 = arith.constant 0 : index
    %126 = vector.load %arg7[%c6_93, %c0_94, %c0_95] : memref<16x32x8xbf16, #tpu.memory_space<vmem>>, vector<1x32x8xbf16>
    %127 = vector.shape_cast %126 : vector<1x32x8xbf16> to vector<32x8xbf16>
    %cst_96 = arith.constant dense<0.000000e+00> : vector<8x8xf32>
    %128 = tpu.matmul %121, %127, %cst_96 {dimension_numbers = #tpu.dot_dimension_numbers<[1], [0], [0], [1], [0, 0, 1, 1], [], []>} : vector<8x32xbf16>, vector<32x8xbf16>, vector<8x8xf32> -> vector<8x8xf32>
    %129 = arith.addf %61, %128 : vector<8x8xf32>
    %c7 = arith.constant 7 : index
    %c0_97 = arith.constant 0 : index
    %c0_98 = arith.constant 0 : index
    %130 = vector.load %arg1[%c7, %c0_97, %c0_98] : memref<16x8x64xf32, #tpu.memory_space<vmem>>, vector<1x8x64xf32>
    %131 = vector.shape_cast %130 : vector<1x8x64xf32> to vector<8x64xf32>
    %132 = arith.truncf %131 : vector<8x64xf32> to vector<8x64xbf16>
    %cst_99 = arith.constant dense<0.000000e+00> : vector<8x32xf32>
    %133 = tpu.matmul %132, %1, %cst_99 {dimension_numbers = #tpu.dot_dimension_numbers<[1], [0], [0], [1], [0, 0, 1, 1], [], []>} : vector<8x64xbf16>, vector<64x32xbf16>, vector<8x32xf32> -> vector<8x32xf32>
    %134 = vector.broadcast %2 : vector<1x32xf32> to vector<8x32xf32>
    %135 = arith.addf %133, %134 : vector<8x32xf32>
    %cst_100 = arith.constant 0.000000e+00 : f32
    %136 = vector.broadcast %cst_100 : f32 to vector<8x32xf32>
    %137 = arith.maximumf %135, %136 : vector<8x32xf32>
    %138 = arith.truncf %137 : vector<8x32xf32> to vector<8x32xbf16>
    %c7_101 = arith.constant 7 : index
    %c0_102 = arith.constant 0 : index
    %c0_103 = arith.constant 0 : index
    %139 = vector.load %arg6[%c7_101, %c0_102, %c0_103] : memref<16x32x8xbf16, #tpu.memory_space<vmem>>, vector<1x32x8xbf16>
    %140 = vector.shape_cast %139 : vector<1x32x8xbf16> to vector<32x8xbf16>
    %cst_104 = arith.constant dense<0.000000e+00> : vector<8x8xf32>
    %141 = tpu.matmul %138, %140, %cst_104 {dimension_numbers = #tpu.dot_dimension_numbers<[1], [0], [0], [1], [0, 0, 1, 1], [], []>} : vector<8x32xbf16>, vector<32x8xbf16>, vector<8x8xf32> -> vector<8x8xf32>
    %142 = arith.addf %74, %141 : vector<8x8xf32>
    %c7_105 = arith.constant 7 : index
    %c0_106 = arith.constant 0 : index
    %c0_107 = arith.constant 0 : index
    %143 = vector.load %arg7[%c7_105, %c0_106, %c0_107] : memref<16x32x8xbf16, #tpu.memory_space<vmem>>, vector<1x32x8xbf16>
    %144 = vector.shape_cast %143 : vector<1x32x8xbf16> to vector<32x8xbf16>
    %cst_108 = arith.constant dense<0.000000e+00> : vector<8x8xf32>
    %145 = tpu.matmul %138, %144, %cst_108 {dimension_numbers = #tpu.dot_dimension_numbers<[1], [0], [0], [1], [0, 0, 1, 1], [], []>} : vector<8x32xbf16>, vector<32x8xbf16>, vector<8x8xf32> -> vector<8x8xf32>
    %146 = arith.addf %78, %145 : vector<8x8xf32>
    %c8 = arith.constant 8 : index
    %c0_109 = arith.constant 0 : index
    %c0_110 = arith.constant 0 : index
    %147 = vector.load %arg1[%c8, %c0_109, %c0_110] : memref<16x8x64xf32, #tpu.memory_space<vmem>>, vector<1x8x64xf32>
    %148 = vector.shape_cast %147 : vector<1x8x64xf32> to vector<8x64xf32>
    %149 = arith.truncf %148 : vector<8x64xf32> to vector<8x64xbf16>
    %cst_111 = arith.constant dense<0.000000e+00> : vector<8x32xf32>
    %150 = tpu.matmul %149, %1, %cst_111 {dimension_numbers = #tpu.dot_dimension_numbers<[1], [0], [0], [1], [0, 0, 1, 1], [], []>} : vector<8x64xbf16>, vector<64x32xbf16>, vector<8x32xf32> -> vector<8x32xf32>
    %151 = vector.broadcast %2 : vector<1x32xf32> to vector<8x32xf32>
    %152 = arith.addf %150, %151 : vector<8x32xf32>
    %cst_112 = arith.constant 0.000000e+00 : f32
    %153 = vector.broadcast %cst_112 : f32 to vector<8x32xf32>
    %154 = arith.maximumf %152, %153 : vector<8x32xf32>
    %155 = arith.truncf %154 : vector<8x32xf32> to vector<8x32xbf16>
    %c8_113 = arith.constant 8 : index
    %c0_114 = arith.constant 0 : index
    %c0_115 = arith.constant 0 : index
    %156 = vector.load %arg6[%c8_113, %c0_114, %c0_115] : memref<16x32x8xbf16, #tpu.memory_space<vmem>>, vector<1x32x8xbf16>
    %157 = vector.shape_cast %156 : vector<1x32x8xbf16> to vector<32x8xbf16>
    %cst_116 = arith.constant dense<0.000000e+00> : vector<8x8xf32>
    %158 = tpu.matmul %155, %157, %cst_116 {dimension_numbers = #tpu.dot_dimension_numbers<[1], [0], [0], [1], [0, 0, 1, 1], [], []>} : vector<8x32xbf16>, vector<32x8xbf16>, vector<8x8xf32> -> vector<8x8xf32>
    %159 = arith.addf %91, %158 : vector<8x8xf32>
    %c8_117 = arith.constant 8 : index
    %c0_118 = arith.constant 0 : index
    %c0_119 = arith.constant 0 : index
    %160 = vector.load %arg7[%c8_117, %c0_118, %c0_119] : memref<16x32x8xbf16, #tpu.memory_space<vmem>>, vector<1x32x8xbf16>
    %161 = vector.shape_cast %160 : vector<1x32x8xbf16> to vector<32x8xbf16>
    %cst_120 = arith.constant dense<0.000000e+00> : vector<8x8xf32>
    %162 = tpu.matmul %155, %161, %cst_120 {dimension_numbers = #tpu.dot_dimension_numbers<[1], [0], [0], [1], [0, 0, 1, 1], [], []>} : vector<8x32xbf16>, vector<32x8xbf16>, vector<8x8xf32> -> vector<8x8xf32>
    %163 = arith.addf %95, %162 : vector<8x8xf32>
    %c9 = arith.constant 9 : index
    %c0_121 = arith.constant 0 : index
    %c0_122 = arith.constant 0 : index
    %164 = vector.load %arg1[%c9, %c0_121, %c0_122] : memref<16x8x64xf32, #tpu.memory_space<vmem>>, vector<1x8x64xf32>
    %165 = vector.shape_cast %164 : vector<1x8x64xf32> to vector<8x64xf32>
    %166 = arith.truncf %165 : vector<8x64xf32> to vector<8x64xbf16>
    %cst_123 = arith.constant dense<0.000000e+00> : vector<8x32xf32>
    %167 = tpu.matmul %166, %1, %cst_123 {dimension_numbers = #tpu.dot_dimension_numbers<[1], [0], [0], [1], [0, 0, 1, 1], [], []>} : vector<8x64xbf16>, vector<64x32xbf16>, vector<8x32xf32> -> vector<8x32xf32>
    %168 = vector.broadcast %2 : vector<1x32xf32> to vector<8x32xf32>
    %169 = arith.addf %167, %168 : vector<8x32xf32>
    %cst_124 = arith.constant 0.000000e+00 : f32
    %170 = vector.broadcast %cst_124 : f32 to vector<8x32xf32>
    %171 = arith.maximumf %169, %170 : vector<8x32xf32>
    %172 = arith.truncf %171 : vector<8x32xf32> to vector<8x32xbf16>
    %c9_125 = arith.constant 9 : index
    %c0_126 = arith.constant 0 : index
    %c0_127 = arith.constant 0 : index
    %173 = vector.load %arg6[%c9_125, %c0_126, %c0_127] : memref<16x32x8xbf16, #tpu.memory_space<vmem>>, vector<1x32x8xbf16>
    %174 = vector.shape_cast %173 : vector<1x32x8xbf16> to vector<32x8xbf16>
    %cst_128 = arith.constant dense<0.000000e+00> : vector<8x8xf32>
    %175 = tpu.matmul %172, %174, %cst_128 {dimension_numbers = #tpu.dot_dimension_numbers<[1], [0], [0], [1], [0, 0, 1, 1], [], []>} : vector<8x32xbf16>, vector<32x8xbf16>, vector<8x8xf32> -> vector<8x8xf32>
    %176 = arith.addf %108, %175 : vector<8x8xf32>
    %c9_129 = arith.constant 9 : index
    %c0_130 = arith.constant 0 : index
    %c0_131 = arith.constant 0 : index
    %177 = vector.load %arg7[%c9_129, %c0_130, %c0_131] : memref<16x32x8xbf16, #tpu.memory_space<vmem>>, vector<1x32x8xbf16>
    %178 = vector.shape_cast %177 : vector<1x32x8xbf16> to vector<32x8xbf16>
    %cst_132 = arith.constant dense<0.000000e+00> : vector<8x8xf32>
    %179 = tpu.matmul %172, %178, %cst_132 {dimension_numbers = #tpu.dot_dimension_numbers<[1], [0], [0], [1], [0, 0, 1, 1], [], []>} : vector<8x32xbf16>, vector<32x8xbf16>, vector<8x8xf32> -> vector<8x8xf32>
    %180 = arith.addf %112, %179 : vector<8x8xf32>
    %c10 = arith.constant 10 : index
    %c0_133 = arith.constant 0 : index
    %c0_134 = arith.constant 0 : index
    %181 = vector.load %arg1[%c10, %c0_133, %c0_134] : memref<16x8x64xf32, #tpu.memory_space<vmem>>, vector<1x8x64xf32>
    %182 = vector.shape_cast %181 : vector<1x8x64xf32> to vector<8x64xf32>
    %183 = arith.truncf %182 : vector<8x64xf32> to vector<8x64xbf16>
    %cst_135 = arith.constant dense<0.000000e+00> : vector<8x32xf32>
    %184 = tpu.matmul %183, %1, %cst_135 {dimension_numbers = #tpu.dot_dimension_numbers<[1], [0], [0], [1], [0, 0, 1, 1], [], []>} : vector<8x64xbf16>, vector<64x32xbf16>, vector<8x32xf32> -> vector<8x32xf32>
    %185 = vector.broadcast %2 : vector<1x32xf32> to vector<8x32xf32>
    %186 = arith.addf %184, %185 : vector<8x32xf32>
    %cst_136 = arith.constant 0.000000e+00 : f32
    %187 = vector.broadcast %cst_136 : f32 to vector<8x32xf32>
    %188 = arith.maximumf %186, %187 : vector<8x32xf32>
    %189 = arith.truncf %188 : vector<8x32xf32> to vector<8x32xbf16>
    %c10_137 = arith.constant 10 : index
    %c0_138 = arith.constant 0 : index
    %c0_139 = arith.constant 0 : index
    %190 = vector.load %arg6[%c10_137, %c0_138, %c0_139] : memref<16x32x8xbf16, #tpu.memory_space<vmem>>, vector<1x32x8xbf16>
    %191 = vector.shape_cast %190 : vector<1x32x8xbf16> to vector<32x8xbf16>
    %cst_140 = arith.constant dense<0.000000e+00> : vector<8x8xf32>
    %192 = tpu.matmul %189, %191, %cst_140 {dimension_numbers = #tpu.dot_dimension_numbers<[1], [0], [0], [1], [0, 0, 1, 1], [], []>} : vector<8x32xbf16>, vector<32x8xbf16>, vector<8x8xf32> -> vector<8x8xf32>
    %193 = arith.addf %125, %192 : vector<8x8xf32>
    %c10_141 = arith.constant 10 : index
    %c0_142 = arith.constant 0 : index
    %c0_143 = arith.constant 0 : index
    %194 = vector.load %arg7[%c10_141, %c0_142, %c0_143] : memref<16x32x8xbf16, #tpu.memory_space<vmem>>, vector<1x32x8xbf16>
    %195 = vector.shape_cast %194 : vector<1x32x8xbf16> to vector<32x8xbf16>
    %cst_144 = arith.constant dense<0.000000e+00> : vector<8x8xf32>
    %196 = tpu.matmul %189, %195, %cst_144 {dimension_numbers = #tpu.dot_dimension_numbers<[1], [0], [0], [1], [0, 0, 1, 1], [], []>} : vector<8x32xbf16>, vector<32x8xbf16>, vector<8x8xf32> -> vector<8x8xf32>
    %197 = arith.addf %129, %196 : vector<8x8xf32>
    %c11 = arith.constant 11 : index
    %c0_145 = arith.constant 0 : index
    %c0_146 = arith.constant 0 : index
    %198 = vector.load %arg1[%c11, %c0_145, %c0_146] : memref<16x8x64xf32, #tpu.memory_space<vmem>>, vector<1x8x64xf32>
    %199 = vector.shape_cast %198 : vector<1x8x64xf32> to vector<8x64xf32>
    %200 = arith.truncf %199 : vector<8x64xf32> to vector<8x64xbf16>
    %cst_147 = arith.constant dense<0.000000e+00> : vector<8x32xf32>
    %201 = tpu.matmul %200, %1, %cst_147 {dimension_numbers = #tpu.dot_dimension_numbers<[1], [0], [0], [1], [0, 0, 1, 1], [], []>} : vector<8x64xbf16>, vector<64x32xbf16>, vector<8x32xf32> -> vector<8x32xf32>
    %202 = vector.broadcast %2 : vector<1x32xf32> to vector<8x32xf32>
    %203 = arith.addf %201, %202 : vector<8x32xf32>
    %cst_148 = arith.constant 0.000000e+00 : f32
    %204 = vector.broadcast %cst_148 : f32 to vector<8x32xf32>
    %205 = arith.maximumf %203, %204 : vector<8x32xf32>
    %206 = arith.truncf %205 : vector<8x32xf32> to vector<8x32xbf16>
    %c11_149 = arith.constant 11 : index
    %c0_150 = arith.constant 0 : index
    %c0_151 = arith.constant 0 : index
    %207 = vector.load %arg6[%c11_149, %c0_150, %c0_151] : memref<16x32x8xbf16, #tpu.memory_space<vmem>>, vector<1x32x8xbf16>
    %208 = vector.shape_cast %207 : vector<1x32x8xbf16> to vector<32x8xbf16>
    %cst_152 = arith.constant dense<0.000000e+00> : vector<8x8xf32>
    %209 = tpu.matmul %206, %208, %cst_152 {dimension_numbers = #tpu.dot_dimension_numbers<[1], [0], [0], [1], [0, 0, 1, 1], [], []>} : vector<8x32xbf16>, vector<32x8xbf16>, vector<8x8xf32> -> vector<8x8xf32>
    %210 = arith.addf %142, %209 : vector<8x8xf32>
    %c11_153 = arith.constant 11 : index
    %c0_154 = arith.constant 0 : index
    %c0_155 = arith.constant 0 : index
    %211 = vector.load %arg7[%c11_153, %c0_154, %c0_155] : memref<16x32x8xbf16, #tpu.memory_space<vmem>>, vector<1x32x8xbf16>
    %212 = vector.shape_cast %211 : vector<1x32x8xbf16> to vector<32x8xbf16>
    %cst_156 = arith.constant dense<0.000000e+00> : vector<8x8xf32>
    %213 = tpu.matmul %206, %212, %cst_156 {dimension_numbers = #tpu.dot_dimension_numbers<[1], [0], [0], [1], [0, 0, 1, 1], [], []>} : vector<8x32xbf16>, vector<32x8xbf16>, vector<8x8xf32> -> vector<8x8xf32>
    %214 = arith.addf %146, %213 : vector<8x8xf32>
    %c12 = arith.constant 12 : index
    %c0_157 = arith.constant 0 : index
    %c0_158 = arith.constant 0 : index
    %215 = vector.load %arg1[%c12, %c0_157, %c0_158] : memref<16x8x64xf32, #tpu.memory_space<vmem>>, vector<1x8x64xf32>
    %216 = vector.shape_cast %215 : vector<1x8x64xf32> to vector<8x64xf32>
    %217 = arith.truncf %216 : vector<8x64xf32> to vector<8x64xbf16>
    %cst_159 = arith.constant dense<0.000000e+00> : vector<8x32xf32>
    %218 = tpu.matmul %217, %1, %cst_159 {dimension_numbers = #tpu.dot_dimension_numbers<[1], [0], [0], [1], [0, 0, 1, 1], [], []>} : vector<8x64xbf16>, vector<64x32xbf16>, vector<8x32xf32> -> vector<8x32xf32>
    %219 = vector.broadcast %2 : vector<1x32xf32> to vector<8x32xf32>
    %220 = arith.addf %218, %219 : vector<8x32xf32>
    %cst_160 = arith.constant 0.000000e+00 : f32
    %221 = vector.broadcast %cst_160 : f32 to vector<8x32xf32>
    %222 = arith.maximumf %220, %221 : vector<8x32xf32>
    %223 = arith.truncf %222 : vector<8x32xf32> to vector<8x32xbf16>
    %c12_161 = arith.constant 12 : index
    %c0_162 = arith.constant 0 : index
    %c0_163 = arith.constant 0 : index
    %224 = vector.load %arg6[%c12_161, %c0_162, %c0_163] : memref<16x32x8xbf16, #tpu.memory_space<vmem>>, vector<1x32x8xbf16>
    %225 = vector.shape_cast %224 : vector<1x32x8xbf16> to vector<32x8xbf16>
    %cst_164 = arith.constant dense<0.000000e+00> : vector<8x8xf32>
    %226 = tpu.matmul %223, %225, %cst_164 {dimension_numbers = #tpu.dot_dimension_numbers<[1], [0], [0], [1], [0, 0, 1, 1], [], []>} : vector<8x32xbf16>, vector<32x8xbf16>, vector<8x8xf32> -> vector<8x8xf32>
    %227 = arith.addf %159, %226 : vector<8x8xf32>
    %c12_165 = arith.constant 12 : index
    %c0_166 = arith.constant 0 : index
    %c0_167 = arith.constant 0 : index
    %228 = vector.load %arg7[%c12_165, %c0_166, %c0_167] : memref<16x32x8xbf16, #tpu.memory_space<vmem>>, vector<1x32x8xbf16>
    %229 = vector.shape_cast %228 : vector<1x32x8xbf16> to vector<32x8xbf16>
    %cst_168 = arith.constant dense<0.000000e+00> : vector<8x8xf32>
    %230 = tpu.matmul %223, %229, %cst_168 {dimension_numbers = #tpu.dot_dimension_numbers<[1], [0], [0], [1], [0, 0, 1, 1], [], []>} : vector<8x32xbf16>, vector<32x8xbf16>, vector<8x8xf32> -> vector<8x8xf32>
    %231 = arith.addf %163, %230 : vector<8x8xf32>
    %c13 = arith.constant 13 : index
    %c0_169 = arith.constant 0 : index
    %c0_170 = arith.constant 0 : index
    %232 = vector.load %arg1[%c13, %c0_169, %c0_170] : memref<16x8x64xf32, #tpu.memory_space<vmem>>, vector<1x8x64xf32>
    %233 = vector.shape_cast %232 : vector<1x8x64xf32> to vector<8x64xf32>
    %234 = arith.truncf %233 : vector<8x64xf32> to vector<8x64xbf16>
    %cst_171 = arith.constant dense<0.000000e+00> : vector<8x32xf32>
    %235 = tpu.matmul %234, %1, %cst_171 {dimension_numbers = #tpu.dot_dimension_numbers<[1], [0], [0], [1], [0, 0, 1, 1], [], []>} : vector<8x64xbf16>, vector<64x32xbf16>, vector<8x32xf32> -> vector<8x32xf32>
    %236 = vector.broadcast %2 : vector<1x32xf32> to vector<8x32xf32>
    %237 = arith.addf %235, %236 : vector<8x32xf32>
    %cst_172 = arith.constant 0.000000e+00 : f32
    %238 = vector.broadcast %cst_172 : f32 to vector<8x32xf32>
    %239 = arith.maximumf %237, %238 : vector<8x32xf32>
    %240 = arith.truncf %239 : vector<8x32xf32> to vector<8x32xbf16>
    %c13_173 = arith.constant 13 : index
    %c0_174 = arith.constant 0 : index
    %c0_175 = arith.constant 0 : index
    %241 = vector.load %arg6[%c13_173, %c0_174, %c0_175] : memref<16x32x8xbf16, #tpu.memory_space<vmem>>, vector<1x32x8xbf16>
    %242 = vector.shape_cast %241 : vector<1x32x8xbf16> to vector<32x8xbf16>
    %cst_176 = arith.constant dense<0.000000e+00> : vector<8x8xf32>
    %243 = tpu.matmul %240, %242, %cst_176 {dimension_numbers = #tpu.dot_dimension_numbers<[1], [0], [0], [1], [0, 0, 1, 1], [], []>} : vector<8x32xbf16>, vector<32x8xbf16>, vector<8x8xf32> -> vector<8x8xf32>
    %244 = arith.addf %176, %243 : vector<8x8xf32>
    %c13_177 = arith.constant 13 : index
    %c0_178 = arith.constant 0 : index
    %c0_179 = arith.constant 0 : index
    %245 = vector.load %arg7[%c13_177, %c0_178, %c0_179] : memref<16x32x8xbf16, #tpu.memory_space<vmem>>, vector<1x32x8xbf16>
    %246 = vector.shape_cast %245 : vector<1x32x8xbf16> to vector<32x8xbf16>
    %cst_180 = arith.constant dense<0.000000e+00> : vector<8x8xf32>
    %247 = tpu.matmul %240, %246, %cst_180 {dimension_numbers = #tpu.dot_dimension_numbers<[1], [0], [0], [1], [0, 0, 1, 1], [], []>} : vector<8x32xbf16>, vector<32x8xbf16>, vector<8x8xf32> -> vector<8x8xf32>
    %248 = arith.addf %180, %247 : vector<8x8xf32>
    %c14 = arith.constant 14 : index
    %c0_181 = arith.constant 0 : index
    %c0_182 = arith.constant 0 : index
    %249 = vector.load %arg1[%c14, %c0_181, %c0_182] : memref<16x8x64xf32, #tpu.memory_space<vmem>>, vector<1x8x64xf32>
    %250 = vector.shape_cast %249 : vector<1x8x64xf32> to vector<8x64xf32>
    %251 = arith.truncf %250 : vector<8x64xf32> to vector<8x64xbf16>
    %cst_183 = arith.constant dense<0.000000e+00> : vector<8x32xf32>
    %252 = tpu.matmul %251, %1, %cst_183 {dimension_numbers = #tpu.dot_dimension_numbers<[1], [0], [0], [1], [0, 0, 1, 1], [], []>} : vector<8x64xbf16>, vector<64x32xbf16>, vector<8x32xf32> -> vector<8x32xf32>
    %253 = vector.broadcast %2 : vector<1x32xf32> to vector<8x32xf32>
    %254 = arith.addf %252, %253 : vector<8x32xf32>
    %cst_184 = arith.constant 0.000000e+00 : f32
    %255 = vector.broadcast %cst_184 : f32 to vector<8x32xf32>
    %256 = arith.maximumf %254, %255 : vector<8x32xf32>
    %257 = arith.truncf %256 : vector<8x32xf32> to vector<8x32xbf16>
    %c14_185 = arith.constant 14 : index
    %c0_186 = arith.constant 0 : index
    %c0_187 = arith.constant 0 : index
    %258 = vector.load %arg6[%c14_185, %c0_186, %c0_187] : memref<16x32x8xbf16, #tpu.memory_space<vmem>>, vector<1x32x8xbf16>
    %259 = vector.shape_cast %258 : vector<1x32x8xbf16> to vector<32x8xbf16>
    %cst_188 = arith.constant dense<0.000000e+00> : vector<8x8xf32>
    %260 = tpu.matmul %257, %259, %cst_188 {dimension_numbers = #tpu.dot_dimension_numbers<[1], [0], [0], [1], [0, 0, 1, 1], [], []>} : vector<8x32xbf16>, vector<32x8xbf16>, vector<8x8xf32> -> vector<8x8xf32>
    %261 = arith.addf %193, %260 : vector<8x8xf32>
    %c14_189 = arith.constant 14 : index
    %c0_190 = arith.constant 0 : index
    %c0_191 = arith.constant 0 : index
    %262 = vector.load %arg7[%c14_189, %c0_190, %c0_191] : memref<16x32x8xbf16, #tpu.memory_space<vmem>>, vector<1x32x8xbf16>
    %263 = vector.shape_cast %262 : vector<1x32x8xbf16> to vector<32x8xbf16>
    %cst_192 = arith.constant dense<0.000000e+00> : vector<8x8xf32>
    %264 = tpu.matmul %257, %263, %cst_192 {dimension_numbers = #tpu.dot_dimension_numbers<[1], [0], [0], [1], [0, 0, 1, 1], [], []>} : vector<8x32xbf16>, vector<32x8xbf16>, vector<8x8xf32> -> vector<8x8xf32>
    %265 = arith.addf %197, %264 : vector<8x8xf32>
    %c15 = arith.constant 15 : index
    %c0_193 = arith.constant 0 : index
    %c0_194 = arith.constant 0 : index
    %266 = vector.load %arg1[%c15, %c0_193, %c0_194] : memref<16x8x64xf32, #tpu.memory_space<vmem>>, vector<1x8x64xf32>
    %267 = vector.shape_cast %266 : vector<1x8x64xf32> to vector<8x64xf32>
    %268 = arith.truncf %267 : vector<8x64xf32> to vector<8x64xbf16>
    %cst_195 = arith.constant dense<0.000000e+00> : vector<8x32xf32>
    %269 = tpu.matmul %268, %1, %cst_195 {dimension_numbers = #tpu.dot_dimension_numbers<[1], [0], [0], [1], [0, 0, 1, 1], [], []>} : vector<8x64xbf16>, vector<64x32xbf16>, vector<8x32xf32> -> vector<8x32xf32>
    %270 = vector.broadcast %2 : vector<1x32xf32> to vector<8x32xf32>
    %271 = arith.addf %269, %270 : vector<8x32xf32>
    %cst_196 = arith.constant 0.000000e+00 : f32
    %272 = vector.broadcast %cst_196 : f32 to vector<8x32xf32>
    %273 = arith.maximumf %271, %272 : vector<8x32xf32>
    %274 = arith.truncf %273 : vector<8x32xf32> to vector<8x32xbf16>
    %c15_197 = arith.constant 15 : index
    %c0_198 = arith.constant 0 : index
    %c0_199 = arith.constant 0 : index
    %275 = vector.load %arg6[%c15_197, %c0_198, %c0_199] : memref<16x32x8xbf16, #tpu.memory_space<vmem>>, vector<1x32x8xbf16>
    %276 = vector.shape_cast %275 : vector<1x32x8xbf16> to vector<32x8xbf16>
    %cst_200 = arith.constant dense<0.000000e+00> : vector<8x8xf32>
    %277 = tpu.matmul %274, %276, %cst_200 {dimension_numbers = #tpu.dot_dimension_numbers<[1], [0], [0], [1], [0, 0, 1, 1], [], []>} : vector<8x32xbf16>, vector<32x8xbf16>, vector<8x8xf32> -> vector<8x8xf32>
    %278 = arith.addf %210, %277 : vector<8x8xf32>
    %c15_201 = arith.constant 15 : index
    %c0_202 = arith.constant 0 : index
    %c0_203 = arith.constant 0 : index
    %279 = vector.load %arg7[%c15_201, %c0_202, %c0_203] : memref<16x32x8xbf16, #tpu.memory_space<vmem>>, vector<1x32x8xbf16>
    %280 = vector.shape_cast %279 : vector<1x32x8xbf16> to vector<32x8xbf16>
    %cst_204 = arith.constant dense<0.000000e+00> : vector<8x8xf32>
    %281 = tpu.matmul %274, %280, %cst_204 {dimension_numbers = #tpu.dot_dimension_numbers<[1], [0], [0], [1], [0, 0, 1, 1], [], []>} : vector<8x32xbf16>, vector<32x8xbf16>, vector<8x8xf32> -> vector<8x8xf32>
    %282 = arith.addf %214, %281 : vector<8x8xf32>
    %cst_205 = arith.constant 0.000000e+00 : f32
    %283 = vector.broadcast %cst_205 : f32 to vector<8x8xf32>
    %284 = arith.addf %283, %227 : vector<8x8xf32>
    %285 = arith.addf %284, %244 : vector<8x8xf32>
    %286 = arith.addf %285, %261 : vector<8x8xf32>
    %287 = arith.addf %286, %278 : vector<8x8xf32>
    %c0_206 = arith.constant 0 : index
    %c0_207 = arith.constant 0 : index
    %288 = vector.load %arg8[%c0_206, %c0_207] : memref<1x8xf32, #tpu.memory_space<vmem>>, vector<1x8xf32>
    %289 = vector.broadcast %288 : vector<1x8xf32> to vector<8x8xf32>
    %290 = arith.addf %287, %289 : vector<8x8xf32>
    %cst_208 = arith.constant 0.000000e+00 : f32
    %291 = vector.broadcast %cst_208 : f32 to vector<8x8xf32>
    %292 = arith.addf %291, %231 : vector<8x8xf32>
    %293 = arith.addf %292, %248 : vector<8x8xf32>
    %294 = arith.addf %293, %265 : vector<8x8xf32>
    %295 = arith.addf %294, %282 : vector<8x8xf32>
    %c0_209 = arith.constant 0 : index
    %c0_210 = arith.constant 0 : index
    %296 = vector.load %arg9[%c0_209, %c0_210] : memref<1x8xf32, #tpu.memory_space<vmem>>, vector<1x8xf32>
    %297 = vector.broadcast %296 : vector<1x8xf32> to vector<8x8xf32>
    %298 = arith.addf %295, %297 : vector<8x8xf32>
    %299 = math.exp %298 : vector<8x8xf32>
    %c0_211 = arith.constant 0 : index
    %c0_212 = arith.constant 0 : index
    %300 = vector.load %arg2[%c0_211, %c0_212] : memref<8x8xf32, #tpu.memory_space<vmem>>, vector<8x8xf32>
    %301 = arith.mulf %299, %300 : vector<8x8xf32>
    %302 = arith.addf %290, %301 : vector<8x8xf32>
    %303 = arith.mulf %290, %290 : vector<8x8xf32>
    %304 = arith.mulf %299, %299 : vector<8x8xf32>
    %305 = arith.addf %303, %304 : vector<8x8xf32>
    %cst_213 = arith.constant 5.000000e-01 : f32
    %306 = vector.broadcast %cst_213 : f32 to vector<8x8xf32>
    %307 = arith.mulf %306, %305 : vector<8x8xf32>
    %308 = arith.subf %307, %298 : vector<8x8xf32>
    %cst_214 = arith.constant 5.000000e-01 : f32
    %309 = vector.broadcast %cst_214 : f32 to vector<8x8xf32>
    %310 = arith.subf %308, %309 : vector<8x8xf32>
    %cst_215 = arith.constant dense<0.000000e+00> : vector<8xf32>
    %311 = vector.multi_reduction <add>, %310, %cst_215 [1] : vector<8x8xf32> to vector<8xf32>
    %312 = vector.shape_cast %311 : vector<8xf32> to vector<8x1xf32>
    %313 = arith.mulf %312, %0 : vector<8x1xf32>
    %314 = vector.shape_cast %313 : vector<8x1xf32> to vector<1x8x1xf32>
    %cst_216 = arith.constant dense<0.000000e+00> : vector<1xf32>
    %315 = vector.multi_reduction <add>, %314, %cst_216 [1, 2] : vector<1x8x1xf32> to vector<1xf32>
    %316 = vector.shape_cast %315 : vector<1xf32> to vector<1x1x1xf32>
    %317 = vector.extract %316[0, 0, 0] : f32 from vector<1x1x1xf32>
    %318 = arith.truncf %302 : vector<8x8xf32> to vector<8x8xbf16>
    %c0_217 = arith.constant 0 : index
    %c0_218 = arith.constant 0 : index
    %319 = vector.load %arg12[%c0_217, %c0_218] : memref<32x64xbf16, #tpu.memory_space<vmem>>, vector<32x64xbf16>
    %c0_219 = arith.constant 0 : index
    %c0_220 = arith.constant 0 : index
    %320 = vector.load %arg13[%c0_219, %c0_220] : memref<32x64xbf16, #tpu.memory_space<vmem>>, vector<32x64xbf16>
    %c0_221 = arith.constant 0 : index
    %c0_222 = arith.constant 0 : index
    %321 = vector.load %arg14[%c0_221, %c0_222] : memref<1x64xf32, #tpu.memory_space<vmem>>, vector<1x64xf32>
    %c0_223 = arith.constant 0 : index
    %c0_224 = arith.constant 0 : index
    %322 = vector.load %arg15[%c0_223, %c0_224] : memref<1x64xf32, #tpu.memory_space<vmem>>, vector<1x64xf32>
    %cst_225 = arith.constant 0.000000e+00 : f32
    %323 = vector.broadcast %cst_225 : f32 to vector<8x64xf32>
    %cst_226 = arith.constant 0.000000e+00 : f32
    %324 = vector.broadcast %cst_226 : f32 to vector<8x64xf32>
    %c0_227 = arith.constant 0 : index
    %c0_228 = arith.constant 0 : index
    %c0_229 = arith.constant 0 : index
    %325 = vector.load %arg10[%c0_227, %c0_228, %c0_229] : memref<16x8x32xbf16, #tpu.memory_space<vmem>>, vector<1x8x32xbf16>
    %326 = vector.shape_cast %325 : vector<1x8x32xbf16> to vector<8x32xbf16>
    %cst_230 = arith.constant dense<0.000000e+00> : vector<8x32xf32>
    %327 = tpu.matmul %318, %326, %cst_230 {dimension_numbers = #tpu.dot_dimension_numbers<[1], [0], [0], [1], [0, 0, 1, 1], [], []>} : vector<8x8xbf16>, vector<8x32xbf16>, vector<8x32xf32> -> vector<8x32xf32>
    %c0_231 = arith.constant 0 : index
    %c0_232 = arith.constant 0 : index
    %c0_233 = arith.constant 0 : index
    %328 = vector.load %arg11[%c0_231, %c0_232, %c0_233] : memref<16x1x32xf32, #tpu.memory_space<vmem>>, vector<1x1x32xf32>
    %329 = vector.shape_cast %328 : vector<1x1x32xf32> to vector<1x32xf32>
    %330 = vector.broadcast %329 : vector<1x32xf32> to vector<8x32xf32>
    %331 = arith.addf %327, %330 : vector<8x32xf32>
    %cst_234 = arith.constant 0.000000e+00 : f32
    %332 = vector.broadcast %cst_234 : f32 to vector<8x32xf32>
    %333 = arith.maximumf %331, %332 : vector<8x32xf32>
    %334 = arith.truncf %333 : vector<8x32xf32> to vector<8x32xbf16>
    %cst_235 = arith.constant dense<0.000000e+00> : vector<8x64xf32>
    %335 = tpu.matmul %334, %319, %cst_235 {dimension_numbers = #tpu.dot_dimension_numbers<[1], [0], [0], [1], [0, 0, 1, 1], [], []>} : vector<8x32xbf16>, vector<32x64xbf16>, vector<8x64xf32> -> vector<8x64xf32>
    %336 = vector.broadcast %321 : vector<1x64xf32> to vector<8x64xf32>
    %337 = arith.addf %335, %336 : vector<8x64xf32>
    %cst_236 = arith.constant dense<0.000000e+00> : vector<8x64xf32>
    %338 = tpu.matmul %334, %320, %cst_236 {dimension_numbers = #tpu.dot_dimension_numbers<[1], [0], [0], [1], [0, 0, 1, 1], [], []>} : vector<8x32xbf16>, vector<32x64xbf16>, vector<8x64xf32> -> vector<8x64xf32>
    %339 = vector.broadcast %322 : vector<1x64xf32> to vector<8x64xf32>
    %340 = arith.addf %338, %339 : vector<8x64xf32>
    %c0_237 = arith.constant 0 : index
    %c0_238 = arith.constant 0 : index
    %c0_239 = arith.constant 0 : index
    %341 = vector.load %arg1[%c0_237, %c0_238, %c0_239] : memref<16x8x64xf32, #tpu.memory_space<vmem>>, vector<1x8x64xf32>
    %342 = vector.shape_cast %341 : vector<1x8x64xf32> to vector<8x64xf32>
    %343 = arith.subf %342, %337 : vector<8x64xf32>
    %cst_240 = arith.constant 0.000000e+00 : f32
    %344 = vector.broadcast %cst_240 : f32 to vector<8x64xf32>
    %345 = arith.subf %344, %340 : vector<8x64xf32>
    %346 = math.exp %345 : vector<8x64xf32>
    %347 = arith.mulf %343, %346 : vector<8x64xf32>
    %cst_241 = arith.constant 5.000000e-01 : f32
    %348 = vector.broadcast %cst_241 : f32 to vector<8x64xf32>
    %349 = arith.mulf %348, %347 : vector<8x64xf32>
    %350 = arith.mulf %349, %347 : vector<8x64xf32>
    %351 = arith.addf %350, %340 : vector<8x64xf32>
    %cst_242 = arith.constant 0.918938517 : f32
    %352 = vector.broadcast %cst_242 : f32 to vector<8x64xf32>
    %353 = arith.addf %351, %352 : vector<8x64xf32>
    %354 = arith.addf %323, %353 : vector<8x64xf32>
    %c1_243 = arith.constant 1 : index
    %c0_244 = arith.constant 0 : index
    %c0_245 = arith.constant 0 : index
    %355 = vector.load %arg10[%c1_243, %c0_244, %c0_245] : memref<16x8x32xbf16, #tpu.memory_space<vmem>>, vector<1x8x32xbf16>
    %356 = vector.shape_cast %355 : vector<1x8x32xbf16> to vector<8x32xbf16>
    %cst_246 = arith.constant dense<0.000000e+00> : vector<8x32xf32>
    %357 = tpu.matmul %318, %356, %cst_246 {dimension_numbers = #tpu.dot_dimension_numbers<[1], [0], [0], [1], [0, 0, 1, 1], [], []>} : vector<8x8xbf16>, vector<8x32xbf16>, vector<8x32xf32> -> vector<8x32xf32>
    %c1_247 = arith.constant 1 : index
    %c0_248 = arith.constant 0 : index
    %c0_249 = arith.constant 0 : index
    %358 = vector.load %arg11[%c1_247, %c0_248, %c0_249] : memref<16x1x32xf32, #tpu.memory_space<vmem>>, vector<1x1x32xf32>
    %359 = vector.shape_cast %358 : vector<1x1x32xf32> to vector<1x32xf32>
    %360 = vector.broadcast %359 : vector<1x32xf32> to vector<8x32xf32>
    %361 = arith.addf %357, %360 : vector<8x32xf32>
    %cst_250 = arith.constant 0.000000e+00 : f32
    %362 = vector.broadcast %cst_250 : f32 to vector<8x32xf32>
    %363 = arith.maximumf %361, %362 : vector<8x32xf32>
    %364 = arith.truncf %363 : vector<8x32xf32> to vector<8x32xbf16>
    %cst_251 = arith.constant dense<0.000000e+00> : vector<8x64xf32>
    %365 = tpu.matmul %364, %319, %cst_251 {dimension_numbers = #tpu.dot_dimension_numbers<[1], [0], [0], [1], [0, 0, 1, 1], [], []>} : vector<8x32xbf16>, vector<32x64xbf16>, vector<8x64xf32> -> vector<8x64xf32>
    %366 = vector.broadcast %321 : vector<1x64xf32> to vector<8x64xf32>
    %367 = arith.addf %365, %366 : vector<8x64xf32>
    %cst_252 = arith.constant dense<0.000000e+00> : vector<8x64xf32>
    %368 = tpu.matmul %364, %320, %cst_252 {dimension_numbers = #tpu.dot_dimension_numbers<[1], [0], [0], [1], [0, 0, 1, 1], [], []>} : vector<8x32xbf16>, vector<32x64xbf16>, vector<8x64xf32> -> vector<8x64xf32>
    %369 = vector.broadcast %322 : vector<1x64xf32> to vector<8x64xf32>
    %370 = arith.addf %368, %369 : vector<8x64xf32>
    %c1_253 = arith.constant 1 : index
    %c0_254 = arith.constant 0 : index
    %c0_255 = arith.constant 0 : index
    %371 = vector.load %arg1[%c1_253, %c0_254, %c0_255] : memref<16x8x64xf32, #tpu.memory_space<vmem>>, vector<1x8x64xf32>
    %372 = vector.shape_cast %371 : vector<1x8x64xf32> to vector<8x64xf32>
    %373 = arith.subf %372, %367 : vector<8x64xf32>
    %cst_256 = arith.constant 0.000000e+00 : f32
    %374 = vector.broadcast %cst_256 : f32 to vector<8x64xf32>
    %375 = arith.subf %374, %370 : vector<8x64xf32>
    %376 = math.exp %375 : vector<8x64xf32>
    %377 = arith.mulf %373, %376 : vector<8x64xf32>
    %cst_257 = arith.constant 5.000000e-01 : f32
    %378 = vector.broadcast %cst_257 : f32 to vector<8x64xf32>
    %379 = arith.mulf %378, %377 : vector<8x64xf32>
    %380 = arith.mulf %379, %377 : vector<8x64xf32>
    %381 = arith.addf %380, %370 : vector<8x64xf32>
    %cst_258 = arith.constant 0.918938517 : f32
    %382 = vector.broadcast %cst_258 : f32 to vector<8x64xf32>
    %383 = arith.addf %381, %382 : vector<8x64xf32>
    %384 = arith.addf %324, %383 : vector<8x64xf32>
    %c2_259 = arith.constant 2 : index
    %c0_260 = arith.constant 0 : index
    %c0_261 = arith.constant 0 : index
    %385 = vector.load %arg10[%c2_259, %c0_260, %c0_261] : memref<16x8x32xbf16, #tpu.memory_space<vmem>>, vector<1x8x32xbf16>
    %386 = vector.shape_cast %385 : vector<1x8x32xbf16> to vector<8x32xbf16>
    %cst_262 = arith.constant dense<0.000000e+00> : vector<8x32xf32>
    %387 = tpu.matmul %318, %386, %cst_262 {dimension_numbers = #tpu.dot_dimension_numbers<[1], [0], [0], [1], [0, 0, 1, 1], [], []>} : vector<8x8xbf16>, vector<8x32xbf16>, vector<8x32xf32> -> vector<8x32xf32>
    %c2_263 = arith.constant 2 : index
    %c0_264 = arith.constant 0 : index
    %c0_265 = arith.constant 0 : index
    %388 = vector.load %arg11[%c2_263, %c0_264, %c0_265] : memref<16x1x32xf32, #tpu.memory_space<vmem>>, vector<1x1x32xf32>
    %389 = vector.shape_cast %388 : vector<1x1x32xf32> to vector<1x32xf32>
    %390 = vector.broadcast %389 : vector<1x32xf32> to vector<8x32xf32>
    %391 = arith.addf %387, %390 : vector<8x32xf32>
    %cst_266 = arith.constant 0.000000e+00 : f32
    %392 = vector.broadcast %cst_266 : f32 to vector<8x32xf32>
    %393 = arith.maximumf %391, %392 : vector<8x32xf32>
    %394 = arith.truncf %393 : vector<8x32xf32> to vector<8x32xbf16>
    %cst_267 = arith.constant dense<0.000000e+00> : vector<8x64xf32>
    %395 = tpu.matmul %394, %319, %cst_267 {dimension_numbers = #tpu.dot_dimension_numbers<[1], [0], [0], [1], [0, 0, 1, 1], [], []>} : vector<8x32xbf16>, vector<32x64xbf16>, vector<8x64xf32> -> vector<8x64xf32>
    %396 = vector.broadcast %321 : vector<1x64xf32> to vector<8x64xf32>
    %397 = arith.addf %395, %396 : vector<8x64xf32>
    %cst_268 = arith.constant dense<0.000000e+00> : vector<8x64xf32>
    %398 = tpu.matmul %394, %320, %cst_268 {dimension_numbers = #tpu.dot_dimension_numbers<[1], [0], [0], [1], [0, 0, 1, 1], [], []>} : vector<8x32xbf16>, vector<32x64xbf16>, vector<8x64xf32> -> vector<8x64xf32>
    %399 = vector.broadcast %322 : vector<1x64xf32> to vector<8x64xf32>
    %400 = arith.addf %398, %399 : vector<8x64xf32>
    %c2_269 = arith.constant 2 : index
    %c0_270 = arith.constant 0 : index
    %c0_271 = arith.constant 0 : index
    %401 = vector.load %arg1[%c2_269, %c0_270, %c0_271] : memref<16x8x64xf32, #tpu.memory_space<vmem>>, vector<1x8x64xf32>
    %402 = vector.shape_cast %401 : vector<1x8x64xf32> to vector<8x64xf32>
    %403 = arith.subf %402, %397 : vector<8x64xf32>
    %cst_272 = arith.constant 0.000000e+00 : f32
    %404 = vector.broadcast %cst_272 : f32 to vector<8x64xf32>
    %405 = arith.subf %404, %400 : vector<8x64xf32>
    %406 = math.exp %405 : vector<8x64xf32>
    %407 = arith.mulf %403, %406 : vector<8x64xf32>
    %cst_273 = arith.constant 5.000000e-01 : f32
    %408 = vector.broadcast %cst_273 : f32 to vector<8x64xf32>
    %409 = arith.mulf %408, %407 : vector<8x64xf32>
    %410 = arith.mulf %409, %407 : vector<8x64xf32>
    %411 = arith.addf %410, %400 : vector<8x64xf32>
    %cst_274 = arith.constant 0.918938517 : f32
    %412 = vector.broadcast %cst_274 : f32 to vector<8x64xf32>
    %413 = arith.addf %411, %412 : vector<8x64xf32>
    %414 = arith.addf %354, %413 : vector<8x64xf32>
    %c3_275 = arith.constant 3 : index
    %c0_276 = arith.constant 0 : index
    %c0_277 = arith.constant 0 : index
    %415 = vector.load %arg10[%c3_275, %c0_276, %c0_277] : memref<16x8x32xbf16, #tpu.memory_space<vmem>>, vector<1x8x32xbf16>
    %416 = vector.shape_cast %415 : vector<1x8x32xbf16> to vector<8x32xbf16>
    %cst_278 = arith.constant dense<0.000000e+00> : vector<8x32xf32>
    %417 = tpu.matmul %318, %416, %cst_278 {dimension_numbers = #tpu.dot_dimension_numbers<[1], [0], [0], [1], [0, 0, 1, 1], [], []>} : vector<8x8xbf16>, vector<8x32xbf16>, vector<8x32xf32> -> vector<8x32xf32>
    %c3_279 = arith.constant 3 : index
    %c0_280 = arith.constant 0 : index
    %c0_281 = arith.constant 0 : index
    %418 = vector.load %arg11[%c3_279, %c0_280, %c0_281] : memref<16x1x32xf32, #tpu.memory_space<vmem>>, vector<1x1x32xf32>
    %419 = vector.shape_cast %418 : vector<1x1x32xf32> to vector<1x32xf32>
    %420 = vector.broadcast %419 : vector<1x32xf32> to vector<8x32xf32>
    %421 = arith.addf %417, %420 : vector<8x32xf32>
    %cst_282 = arith.constant 0.000000e+00 : f32
    %422 = vector.broadcast %cst_282 : f32 to vector<8x32xf32>
    %423 = arith.maximumf %421, %422 : vector<8x32xf32>
    %424 = arith.truncf %423 : vector<8x32xf32> to vector<8x32xbf16>
    %cst_283 = arith.constant dense<0.000000e+00> : vector<8x64xf32>
    %425 = tpu.matmul %424, %319, %cst_283 {dimension_numbers = #tpu.dot_dimension_numbers<[1], [0], [0], [1], [0, 0, 1, 1], [], []>} : vector<8x32xbf16>, vector<32x64xbf16>, vector<8x64xf32> -> vector<8x64xf32>
    %426 = vector.broadcast %321 : vector<1x64xf32> to vector<8x64xf32>
    %427 = arith.addf %425, %426 : vector<8x64xf32>
    %cst_284 = arith.constant dense<0.000000e+00> : vector<8x64xf32>
    %428 = tpu.matmul %424, %320, %cst_284 {dimension_numbers = #tpu.dot_dimension_numbers<[1], [0], [0], [1], [0, 0, 1, 1], [], []>} : vector<8x32xbf16>, vector<32x64xbf16>, vector<8x64xf32> -> vector<8x64xf32>
    %429 = vector.broadcast %322 : vector<1x64xf32> to vector<8x64xf32>
    %430 = arith.addf %428, %429 : vector<8x64xf32>
    %c3_285 = arith.constant 3 : index
    %c0_286 = arith.constant 0 : index
    %c0_287 = arith.constant 0 : index
    %431 = vector.load %arg1[%c3_285, %c0_286, %c0_287] : memref<16x8x64xf32, #tpu.memory_space<vmem>>, vector<1x8x64xf32>
    %432 = vector.shape_cast %431 : vector<1x8x64xf32> to vector<8x64xf32>
    %433 = arith.subf %432, %427 : vector<8x64xf32>
    %cst_288 = arith.constant 0.000000e+00 : f32
    %434 = vector.broadcast %cst_288 : f32 to vector<8x64xf32>
    %435 = arith.subf %434, %430 : vector<8x64xf32>
    %436 = math.exp %435 : vector<8x64xf32>
    %437 = arith.mulf %433, %436 : vector<8x64xf32>
    %cst_289 = arith.constant 5.000000e-01 : f32
    %438 = vector.broadcast %cst_289 : f32 to vector<8x64xf32>
    %439 = arith.mulf %438, %437 : vector<8x64xf32>
    %440 = arith.mulf %439, %437 : vector<8x64xf32>
    %441 = arith.addf %440, %430 : vector<8x64xf32>
    %cst_290 = arith.constant 0.918938517 : f32
    %442 = vector.broadcast %cst_290 : f32 to vector<8x64xf32>
    %443 = arith.addf %441, %442 : vector<8x64xf32>
    %444 = arith.addf %384, %443 : vector<8x64xf32>
    %c4_291 = arith.constant 4 : index
    %c0_292 = arith.constant 0 : index
    %c0_293 = arith.constant 0 : index
    %445 = vector.load %arg10[%c4_291, %c0_292, %c0_293] : memref<16x8x32xbf16, #tpu.memory_space<vmem>>, vector<1x8x32xbf16>
    %446 = vector.shape_cast %445 : vector<1x8x32xbf16> to vector<8x32xbf16>
    %cst_294 = arith.constant dense<0.000000e+00> : vector<8x32xf32>
    %447 = tpu.matmul %318, %446, %cst_294 {dimension_numbers = #tpu.dot_dimension_numbers<[1], [0], [0], [1], [0, 0, 1, 1], [], []>} : vector<8x8xbf16>, vector<8x32xbf16>, vector<8x32xf32> -> vector<8x32xf32>
    %c4_295 = arith.constant 4 : index
    %c0_296 = arith.constant 0 : index
    %c0_297 = arith.constant 0 : index
    %448 = vector.load %arg11[%c4_295, %c0_296, %c0_297] : memref<16x1x32xf32, #tpu.memory_space<vmem>>, vector<1x1x32xf32>
    %449 = vector.shape_cast %448 : vector<1x1x32xf32> to vector<1x32xf32>
    %450 = vector.broadcast %449 : vector<1x32xf32> to vector<8x32xf32>
    %451 = arith.addf %447, %450 : vector<8x32xf32>
    %cst_298 = arith.constant 0.000000e+00 : f32
    %452 = vector.broadcast %cst_298 : f32 to vector<8x32xf32>
    %453 = arith.maximumf %451, %452 : vector<8x32xf32>
    %454 = arith.truncf %453 : vector<8x32xf32> to vector<8x32xbf16>
    %cst_299 = arith.constant dense<0.000000e+00> : vector<8x64xf32>
    %455 = tpu.matmul %454, %319, %cst_299 {dimension_numbers = #tpu.dot_dimension_numbers<[1], [0], [0], [1], [0, 0, 1, 1], [], []>} : vector<8x32xbf16>, vector<32x64xbf16>, vector<8x64xf32> -> vector<8x64xf32>
    %456 = vector.broadcast %321 : vector<1x64xf32> to vector<8x64xf32>
    %457 = arith.addf %455, %456 : vector<8x64xf32>
    %cst_300 = arith.constant dense<0.000000e+00> : vector<8x64xf32>
    %458 = tpu.matmul %454, %320, %cst_300 {dimension_numbers = #tpu.dot_dimension_numbers<[1], [0], [0], [1], [0, 0, 1, 1], [], []>} : vector<8x32xbf16>, vector<32x64xbf16>, vector<8x64xf32> -> vector<8x64xf32>
    %459 = vector.broadcast %322 : vector<1x64xf32> to vector<8x64xf32>
    %460 = arith.addf %458, %459 : vector<8x64xf32>
    %c4_301 = arith.constant 4 : index
    %c0_302 = arith.constant 0 : index
    %c0_303 = arith.constant 0 : index
    %461 = vector.load %arg1[%c4_301, %c0_302, %c0_303] : memref<16x8x64xf32, #tpu.memory_space<vmem>>, vector<1x8x64xf32>
    %462 = vector.shape_cast %461 : vector<1x8x64xf32> to vector<8x64xf32>
    %463 = arith.subf %462, %457 : vector<8x64xf32>
    %cst_304 = arith.constant 0.000000e+00 : f32
    %464 = vector.broadcast %cst_304 : f32 to vector<8x64xf32>
    %465 = arith.subf %464, %460 : vector<8x64xf32>
    %466 = math.exp %465 : vector<8x64xf32>
    %467 = arith.mulf %463, %466 : vector<8x64xf32>
    %cst_305 = arith.constant 5.000000e-01 : f32
    %468 = vector.broadcast %cst_305 : f32 to vector<8x64xf32>
    %469 = arith.mulf %468, %467 : vector<8x64xf32>
    %470 = arith.mulf %469, %467 : vector<8x64xf32>
    %471 = arith.addf %470, %460 : vector<8x64xf32>
    %cst_306 = arith.constant 0.918938517 : f32
    %472 = vector.broadcast %cst_306 : f32 to vector<8x64xf32>
    %473 = arith.addf %471, %472 : vector<8x64xf32>
    %474 = arith.addf %414, %473 : vector<8x64xf32>
    %c5_307 = arith.constant 5 : index
    %c0_308 = arith.constant 0 : index
    %c0_309 = arith.constant 0 : index
    %475 = vector.load %arg10[%c5_307, %c0_308, %c0_309] : memref<16x8x32xbf16, #tpu.memory_space<vmem>>, vector<1x8x32xbf16>
    %476 = vector.shape_cast %475 : vector<1x8x32xbf16> to vector<8x32xbf16>
    %cst_310 = arith.constant dense<0.000000e+00> : vector<8x32xf32>
    %477 = tpu.matmul %318, %476, %cst_310 {dimension_numbers = #tpu.dot_dimension_numbers<[1], [0], [0], [1], [0, 0, 1, 1], [], []>} : vector<8x8xbf16>, vector<8x32xbf16>, vector<8x32xf32> -> vector<8x32xf32>
    %c5_311 = arith.constant 5 : index
    %c0_312 = arith.constant 0 : index
    %c0_313 = arith.constant 0 : index
    %478 = vector.load %arg11[%c5_311, %c0_312, %c0_313] : memref<16x1x32xf32, #tpu.memory_space<vmem>>, vector<1x1x32xf32>
    %479 = vector.shape_cast %478 : vector<1x1x32xf32> to vector<1x32xf32>
    %480 = vector.broadcast %479 : vector<1x32xf32> to vector<8x32xf32>
    %481 = arith.addf %477, %480 : vector<8x32xf32>
    %cst_314 = arith.constant 0.000000e+00 : f32
    %482 = vector.broadcast %cst_314 : f32 to vector<8x32xf32>
    %483 = arith.maximumf %481, %482 : vector<8x32xf32>
    %484 = arith.truncf %483 : vector<8x32xf32> to vector<8x32xbf16>
    %cst_315 = arith.constant dense<0.000000e+00> : vector<8x64xf32>
    %485 = tpu.matmul %484, %319, %cst_315 {dimension_numbers = #tpu.dot_dimension_numbers<[1], [0], [0], [1], [0, 0, 1, 1], [], []>} : vector<8x32xbf16>, vector<32x64xbf16>, vector<8x64xf32> -> vector<8x64xf32>
    %486 = vector.broadcast %321 : vector<1x64xf32> to vector<8x64xf32>
    %487 = arith.addf %485, %486 : vector<8x64xf32>
    %cst_316 = arith.constant dense<0.000000e+00> : vector<8x64xf32>
    %488 = tpu.matmul %484, %320, %cst_316 {dimension_numbers = #tpu.dot_dimension_numbers<[1], [0], [0], [1], [0, 0, 1, 1], [], []>} : vector<8x32xbf16>, vector<32x64xbf16>, vector<8x64xf32> -> vector<8x64xf32>
    %489 = vector.broadcast %322 : vector<1x64xf32> to vector<8x64xf32>
    %490 = arith.addf %488, %489 : vector<8x64xf32>
    %c5_317 = arith.constant 5 : index
    %c0_318 = arith.constant 0 : index
    %c0_319 = arith.constant 0 : index
    %491 = vector.load %arg1[%c5_317, %c0_318, %c0_319] : memref<16x8x64xf32, #tpu.memory_space<vmem>>, vector<1x8x64xf32>
    %492 = vector.shape_cast %491 : vector<1x8x64xf32> to vector<8x64xf32>
    %493 = arith.subf %492, %487 : vector<8x64xf32>
    %cst_320 = arith.constant 0.000000e+00 : f32
    %494 = vector.broadcast %cst_320 : f32 to vector<8x64xf32>
    %495 = arith.subf %494, %490 : vector<8x64xf32>
    %496 = math.exp %495 : vector<8x64xf32>
    %497 = arith.mulf %493, %496 : vector<8x64xf32>
    %cst_321 = arith.constant 5.000000e-01 : f32
    %498 = vector.broadcast %cst_321 : f32 to vector<8x64xf32>
    %499 = arith.mulf %498, %497 : vector<8x64xf32>
    %500 = arith.mulf %499, %497 : vector<8x64xf32>
    %501 = arith.addf %500, %490 : vector<8x64xf32>
    %cst_322 = arith.constant 0.918938517 : f32
    %502 = vector.broadcast %cst_322 : f32 to vector<8x64xf32>
    %503 = arith.addf %501, %502 : vector<8x64xf32>
    %504 = arith.addf %444, %503 : vector<8x64xf32>
    %c6_323 = arith.constant 6 : index
    %c0_324 = arith.constant 0 : index
    %c0_325 = arith.constant 0 : index
    %505 = vector.load %arg10[%c6_323, %c0_324, %c0_325] : memref<16x8x32xbf16, #tpu.memory_space<vmem>>, vector<1x8x32xbf16>
    %506 = vector.shape_cast %505 : vector<1x8x32xbf16> to vector<8x32xbf16>
    %cst_326 = arith.constant dense<0.000000e+00> : vector<8x32xf32>
    %507 = tpu.matmul %318, %506, %cst_326 {dimension_numbers = #tpu.dot_dimension_numbers<[1], [0], [0], [1], [0, 0, 1, 1], [], []>} : vector<8x8xbf16>, vector<8x32xbf16>, vector<8x32xf32> -> vector<8x32xf32>
    %c6_327 = arith.constant 6 : index
    %c0_328 = arith.constant 0 : index
    %c0_329 = arith.constant 0 : index
    %508 = vector.load %arg11[%c6_327, %c0_328, %c0_329] : memref<16x1x32xf32, #tpu.memory_space<vmem>>, vector<1x1x32xf32>
    %509 = vector.shape_cast %508 : vector<1x1x32xf32> to vector<1x32xf32>
    %510 = vector.broadcast %509 : vector<1x32xf32> to vector<8x32xf32>
    %511 = arith.addf %507, %510 : vector<8x32xf32>
    %cst_330 = arith.constant 0.000000e+00 : f32
    %512 = vector.broadcast %cst_330 : f32 to vector<8x32xf32>
    %513 = arith.maximumf %511, %512 : vector<8x32xf32>
    %514 = arith.truncf %513 : vector<8x32xf32> to vector<8x32xbf16>
    %cst_331 = arith.constant dense<0.000000e+00> : vector<8x64xf32>
    %515 = tpu.matmul %514, %319, %cst_331 {dimension_numbers = #tpu.dot_dimension_numbers<[1], [0], [0], [1], [0, 0, 1, 1], [], []>} : vector<8x32xbf16>, vector<32x64xbf16>, vector<8x64xf32> -> vector<8x64xf32>
    %516 = vector.broadcast %321 : vector<1x64xf32> to vector<8x64xf32>
    %517 = arith.addf %515, %516 : vector<8x64xf32>
    %cst_332 = arith.constant dense<0.000000e+00> : vector<8x64xf32>
    %518 = tpu.matmul %514, %320, %cst_332 {dimension_numbers = #tpu.dot_dimension_numbers<[1], [0], [0], [1], [0, 0, 1, 1], [], []>} : vector<8x32xbf16>, vector<32x64xbf16>, vector<8x64xf32> -> vector<8x64xf32>
    %519 = vector.broadcast %322 : vector<1x64xf32> to vector<8x64xf32>
    %520 = arith.addf %518, %519 : vector<8x64xf32>
    %c6_333 = arith.constant 6 : index
    %c0_334 = arith.constant 0 : index
    %c0_335 = arith.constant 0 : index
    %521 = vector.load %arg1[%c6_333, %c0_334, %c0_335] : memref<16x8x64xf32, #tpu.memory_space<vmem>>, vector<1x8x64xf32>
    %522 = vector.shape_cast %521 : vector<1x8x64xf32> to vector<8x64xf32>
    %523 = arith.subf %522, %517 : vector<8x64xf32>
    %cst_336 = arith.constant 0.000000e+00 : f32
    %524 = vector.broadcast %cst_336 : f32 to vector<8x64xf32>
    %525 = arith.subf %524, %520 : vector<8x64xf32>
    %526 = math.exp %525 : vector<8x64xf32>
    %527 = arith.mulf %523, %526 : vector<8x64xf32>
    %cst_337 = arith.constant 5.000000e-01 : f32
    %528 = vector.broadcast %cst_337 : f32 to vector<8x64xf32>
    %529 = arith.mulf %528, %527 : vector<8x64xf32>
    %530 = arith.mulf %529, %527 : vector<8x64xf32>
    %531 = arith.addf %530, %520 : vector<8x64xf32>
    %cst_338 = arith.constant 0.918938517 : f32
    %532 = vector.broadcast %cst_338 : f32 to vector<8x64xf32>
    %533 = arith.addf %531, %532 : vector<8x64xf32>
    %534 = arith.addf %474, %533 : vector<8x64xf32>
    %c7_339 = arith.constant 7 : index
    %c0_340 = arith.constant 0 : index
    %c0_341 = arith.constant 0 : index
    %535 = vector.load %arg10[%c7_339, %c0_340, %c0_341] : memref<16x8x32xbf16, #tpu.memory_space<vmem>>, vector<1x8x32xbf16>
    %536 = vector.shape_cast %535 : vector<1x8x32xbf16> to vector<8x32xbf16>
    %cst_342 = arith.constant dense<0.000000e+00> : vector<8x32xf32>
    %537 = tpu.matmul %318, %536, %cst_342 {dimension_numbers = #tpu.dot_dimension_numbers<[1], [0], [0], [1], [0, 0, 1, 1], [], []>} : vector<8x8xbf16>, vector<8x32xbf16>, vector<8x32xf32> -> vector<8x32xf32>
    %c7_343 = arith.constant 7 : index
    %c0_344 = arith.constant 0 : index
    %c0_345 = arith.constant 0 : index
    %538 = vector.load %arg11[%c7_343, %c0_344, %c0_345] : memref<16x1x32xf32, #tpu.memory_space<vmem>>, vector<1x1x32xf32>
    %539 = vector.shape_cast %538 : vector<1x1x32xf32> to vector<1x32xf32>
    %540 = vector.broadcast %539 : vector<1x32xf32> to vector<8x32xf32>
    %541 = arith.addf %537, %540 : vector<8x32xf32>
    %cst_346 = arith.constant 0.000000e+00 : f32
    %542 = vector.broadcast %cst_346 : f32 to vector<8x32xf32>
    %543 = arith.maximumf %541, %542 : vector<8x32xf32>
    %544 = arith.truncf %543 : vector<8x32xf32> to vector<8x32xbf16>
    %cst_347 = arith.constant dense<0.000000e+00> : vector<8x64xf32>
    %545 = tpu.matmul %544, %319, %cst_347 {dimension_numbers = #tpu.dot_dimension_numbers<[1], [0], [0], [1], [0, 0, 1, 1], [], []>} : vector<8x32xbf16>, vector<32x64xbf16>, vector<8x64xf32> -> vector<8x64xf32>
    %546 = vector.broadcast %321 : vector<1x64xf32> to vector<8x64xf32>
    %547 = arith.addf %545, %546 : vector<8x64xf32>
    %cst_348 = arith.constant dense<0.000000e+00> : vector<8x64xf32>
    %548 = tpu.matmul %544, %320, %cst_348 {dimension_numbers = #tpu.dot_dimension_numbers<[1], [0], [0], [1], [0, 0, 1, 1], [], []>} : vector<8x32xbf16>, vector<32x64xbf16>, vector<8x64xf32> -> vector<8x64xf32>
    %549 = vector.broadcast %322 : vector<1x64xf32> to vector<8x64xf32>
    %550 = arith.addf %548, %549 : vector<8x64xf32>
    %c7_349 = arith.constant 7 : index
    %c0_350 = arith.constant 0 : index
    %c0_351 = arith.constant 0 : index
    %551 = vector.load %arg1[%c7_349, %c0_350, %c0_351] : memref<16x8x64xf32, #tpu.memory_space<vmem>>, vector<1x8x64xf32>
    %552 = vector.shape_cast %551 : vector<1x8x64xf32> to vector<8x64xf32>
    %553 = arith.subf %552, %547 : vector<8x64xf32>
    %cst_352 = arith.constant 0.000000e+00 : f32
    %554 = vector.broadcast %cst_352 : f32 to vector<8x64xf32>
    %555 = arith.subf %554, %550 : vector<8x64xf32>
    %556 = math.exp %555 : vector<8x64xf32>
    %557 = arith.mulf %553, %556 : vector<8x64xf32>
    %cst_353 = arith.constant 5.000000e-01 : f32
    %558 = vector.broadcast %cst_353 : f32 to vector<8x64xf32>
    %559 = arith.mulf %558, %557 : vector<8x64xf32>
    %560 = arith.mulf %559, %557 : vector<8x64xf32>
    %561 = arith.addf %560, %550 : vector<8x64xf32>
    %cst_354 = arith.constant 0.918938517 : f32
    %562 = vector.broadcast %cst_354 : f32 to vector<8x64xf32>
    %563 = arith.addf %561, %562 : vector<8x64xf32>
    %564 = arith.addf %504, %563 : vector<8x64xf32>
    %c8_355 = arith.constant 8 : index
    %c0_356 = arith.constant 0 : index
    %c0_357 = arith.constant 0 : index
    %565 = vector.load %arg10[%c8_355, %c0_356, %c0_357] : memref<16x8x32xbf16, #tpu.memory_space<vmem>>, vector<1x8x32xbf16>
    %566 = vector.shape_cast %565 : vector<1x8x32xbf16> to vector<8x32xbf16>
    %cst_358 = arith.constant dense<0.000000e+00> : vector<8x32xf32>
    %567 = tpu.matmul %318, %566, %cst_358 {dimension_numbers = #tpu.dot_dimension_numbers<[1], [0], [0], [1], [0, 0, 1, 1], [], []>} : vector<8x8xbf16>, vector<8x32xbf16>, vector<8x32xf32> -> vector<8x32xf32>
    %c8_359 = arith.constant 8 : index
    %c0_360 = arith.constant 0 : index
    %c0_361 = arith.constant 0 : index
    %568 = vector.load %arg11[%c8_359, %c0_360, %c0_361] : memref<16x1x32xf32, #tpu.memory_space<vmem>>, vector<1x1x32xf32>
    %569 = vector.shape_cast %568 : vector<1x1x32xf32> to vector<1x32xf32>
    %570 = vector.broadcast %569 : vector<1x32xf32> to vector<8x32xf32>
    %571 = arith.addf %567, %570 : vector<8x32xf32>
    %cst_362 = arith.constant 0.000000e+00 : f32
    %572 = vector.broadcast %cst_362 : f32 to vector<8x32xf32>
    %573 = arith.maximumf %571, %572 : vector<8x32xf32>
    %574 = arith.truncf %573 : vector<8x32xf32> to vector<8x32xbf16>
    %cst_363 = arith.constant dense<0.000000e+00> : vector<8x64xf32>
    %575 = tpu.matmul %574, %319, %cst_363 {dimension_numbers = #tpu.dot_dimension_numbers<[1], [0], [0], [1], [0, 0, 1, 1], [], []>} : vector<8x32xbf16>, vector<32x64xbf16>, vector<8x64xf32> -> vector<8x64xf32>
    %576 = vector.broadcast %321 : vector<1x64xf32> to vector<8x64xf32>
    %577 = arith.addf %575, %576 : vector<8x64xf32>
    %cst_364 = arith.constant dense<0.000000e+00> : vector<8x64xf32>
    %578 = tpu.matmul %574, %320, %cst_364 {dimension_numbers = #tpu.dot_dimension_numbers<[1], [0], [0], [1], [0, 0, 1, 1], [], []>} : vector<8x32xbf16>, vector<32x64xbf16>, vector<8x64xf32> -> vector<8x64xf32>
    %579 = vector.broadcast %322 : vector<1x64xf32> to vector<8x64xf32>
    %580 = arith.addf %578, %579 : vector<8x64xf32>
    %c8_365 = arith.constant 8 : index
    %c0_366 = arith.constant 0 : index
    %c0_367 = arith.constant 0 : index
    %581 = vector.load %arg1[%c8_365, %c0_366, %c0_367] : memref<16x8x64xf32, #tpu.memory_space<vmem>>, vector<1x8x64xf32>
    %582 = vector.shape_cast %581 : vector<1x8x64xf32> to vector<8x64xf32>
    %583 = arith.subf %582, %577 : vector<8x64xf32>
    %cst_368 = arith.constant 0.000000e+00 : f32
    %584 = vector.broadcast %cst_368 : f32 to vector<8x64xf32>
    %585 = arith.subf %584, %580 : vector<8x64xf32>
    %586 = math.exp %585 : vector<8x64xf32>
    %587 = arith.mulf %583, %586 : vector<8x64xf32>
    %cst_369 = arith.constant 5.000000e-01 : f32
    %588 = vector.broadcast %cst_369 : f32 to vector<8x64xf32>
    %589 = arith.mulf %588, %587 : vector<8x64xf32>
    %590 = arith.mulf %589, %587 : vector<8x64xf32>
    %591 = arith.addf %590, %580 : vector<8x64xf32>
    %cst_370 = arith.constant 0.918938517 : f32
    %592 = vector.broadcast %cst_370 : f32 to vector<8x64xf32>
    %593 = arith.addf %591, %592 : vector<8x64xf32>
    %594 = arith.addf %534, %593 : vector<8x64xf32>
    %c9_371 = arith.constant 9 : index
    %c0_372 = arith.constant 0 : index
    %c0_373 = arith.constant 0 : index
    %595 = vector.load %arg10[%c9_371, %c0_372, %c0_373] : memref<16x8x32xbf16, #tpu.memory_space<vmem>>, vector<1x8x32xbf16>
    %596 = vector.shape_cast %595 : vector<1x8x32xbf16> to vector<8x32xbf16>
    %cst_374 = arith.constant dense<0.000000e+00> : vector<8x32xf32>
    %597 = tpu.matmul %318, %596, %cst_374 {dimension_numbers = #tpu.dot_dimension_numbers<[1], [0], [0], [1], [0, 0, 1, 1], [], []>} : vector<8x8xbf16>, vector<8x32xbf16>, vector<8x32xf32> -> vector<8x32xf32>
    %c9_375 = arith.constant 9 : index
    %c0_376 = arith.constant 0 : index
    %c0_377 = arith.constant 0 : index
    %598 = vector.load %arg11[%c9_375, %c0_376, %c0_377] : memref<16x1x32xf32, #tpu.memory_space<vmem>>, vector<1x1x32xf32>
    %599 = vector.shape_cast %598 : vector<1x1x32xf32> to vector<1x32xf32>
    %600 = vector.broadcast %599 : vector<1x32xf32> to vector<8x32xf32>
    %601 = arith.addf %597, %600 : vector<8x32xf32>
    %cst_378 = arith.constant 0.000000e+00 : f32
    %602 = vector.broadcast %cst_378 : f32 to vector<8x32xf32>
    %603 = arith.maximumf %601, %602 : vector<8x32xf32>
    %604 = arith.truncf %603 : vector<8x32xf32> to vector<8x32xbf16>
    %cst_379 = arith.constant dense<0.000000e+00> : vector<8x64xf32>
    %605 = tpu.matmul %604, %319, %cst_379 {dimension_numbers = #tpu.dot_dimension_numbers<[1], [0], [0], [1], [0, 0, 1, 1], [], []>} : vector<8x32xbf16>, vector<32x64xbf16>, vector<8x64xf32> -> vector<8x64xf32>
    %606 = vector.broadcast %321 : vector<1x64xf32> to vector<8x64xf32>
    %607 = arith.addf %605, %606 : vector<8x64xf32>
    %cst_380 = arith.constant dense<0.000000e+00> : vector<8x64xf32>
    %608 = tpu.matmul %604, %320, %cst_380 {dimension_numbers = #tpu.dot_dimension_numbers<[1], [0], [0], [1], [0, 0, 1, 1], [], []>} : vector<8x32xbf16>, vector<32x64xbf16>, vector<8x64xf32> -> vector<8x64xf32>
    %609 = vector.broadcast %322 : vector<1x64xf32> to vector<8x64xf32>
    %610 = arith.addf %608, %609 : vector<8x64xf32>
    %c9_381 = arith.constant 9 : index
    %c0_382 = arith.constant 0 : index
    %c0_383 = arith.constant 0 : index
    %611 = vector.load %arg1[%c9_381, %c0_382, %c0_383] : memref<16x8x64xf32, #tpu.memory_space<vmem>>, vector<1x8x64xf32>
    %612 = vector.shape_cast %611 : vector<1x8x64xf32> to vector<8x64xf32>
    %613 = arith.subf %612, %607 : vector<8x64xf32>
    %cst_384 = arith.constant 0.000000e+00 : f32
    %614 = vector.broadcast %cst_384 : f32 to vector<8x64xf32>
    %615 = arith.subf %614, %610 : vector<8x64xf32>
    %616 = math.exp %615 : vector<8x64xf32>
    %617 = arith.mulf %613, %616 : vector<8x64xf32>
    %cst_385 = arith.constant 5.000000e-01 : f32
    %618 = vector.broadcast %cst_385 : f32 to vector<8x64xf32>
    %619 = arith.mulf %618, %617 : vector<8x64xf32>
    %620 = arith.mulf %619, %617 : vector<8x64xf32>
    %621 = arith.addf %620, %610 : vector<8x64xf32>
    %cst_386 = arith.constant 0.918938517 : f32
    %622 = vector.broadcast %cst_386 : f32 to vector<8x64xf32>
    %623 = arith.addf %621, %622 : vector<8x64xf32>
    %624 = arith.addf %564, %623 : vector<8x64xf32>
    %c10_387 = arith.constant 10 : index
    %c0_388 = arith.constant 0 : index
    %c0_389 = arith.constant 0 : index
    %625 = vector.load %arg10[%c10_387, %c0_388, %c0_389] : memref<16x8x32xbf16, #tpu.memory_space<vmem>>, vector<1x8x32xbf16>
    %626 = vector.shape_cast %625 : vector<1x8x32xbf16> to vector<8x32xbf16>
    %cst_390 = arith.constant dense<0.000000e+00> : vector<8x32xf32>
    %627 = tpu.matmul %318, %626, %cst_390 {dimension_numbers = #tpu.dot_dimension_numbers<[1], [0], [0], [1], [0, 0, 1, 1], [], []>} : vector<8x8xbf16>, vector<8x32xbf16>, vector<8x32xf32> -> vector<8x32xf32>
    %c10_391 = arith.constant 10 : index
    %c0_392 = arith.constant 0 : index
    %c0_393 = arith.constant 0 : index
    %628 = vector.load %arg11[%c10_391, %c0_392, %c0_393] : memref<16x1x32xf32, #tpu.memory_space<vmem>>, vector<1x1x32xf32>
    %629 = vector.shape_cast %628 : vector<1x1x32xf32> to vector<1x32xf32>
    %630 = vector.broadcast %629 : vector<1x32xf32> to vector<8x32xf32>
    %631 = arith.addf %627, %630 : vector<8x32xf32>
    %cst_394 = arith.constant 0.000000e+00 : f32
    %632 = vector.broadcast %cst_394 : f32 to vector<8x32xf32>
    %633 = arith.maximumf %631, %632 : vector<8x32xf32>
    %634 = arith.truncf %633 : vector<8x32xf32> to vector<8x32xbf16>
    %cst_395 = arith.constant dense<0.000000e+00> : vector<8x64xf32>
    %635 = tpu.matmul %634, %319, %cst_395 {dimension_numbers = #tpu.dot_dimension_numbers<[1], [0], [0], [1], [0, 0, 1, 1], [], []>} : vector<8x32xbf16>, vector<32x64xbf16>, vector<8x64xf32> -> vector<8x64xf32>
    %636 = vector.broadcast %321 : vector<1x64xf32> to vector<8x64xf32>
    %637 = arith.addf %635, %636 : vector<8x64xf32>
    %cst_396 = arith.constant dense<0.000000e+00> : vector<8x64xf32>
    %638 = tpu.matmul %634, %320, %cst_396 {dimension_numbers = #tpu.dot_dimension_numbers<[1], [0], [0], [1], [0, 0, 1, 1], [], []>} : vector<8x32xbf16>, vector<32x64xbf16>, vector<8x64xf32> -> vector<8x64xf32>
    %639 = vector.broadcast %322 : vector<1x64xf32> to vector<8x64xf32>
    %640 = arith.addf %638, %639 : vector<8x64xf32>
    %c10_397 = arith.constant 10 : index
    %c0_398 = arith.constant 0 : index
    %c0_399 = arith.constant 0 : index
    %641 = vector.load %arg1[%c10_397, %c0_398, %c0_399] : memref<16x8x64xf32, #tpu.memory_space<vmem>>, vector<1x8x64xf32>
    %642 = vector.shape_cast %641 : vector<1x8x64xf32> to vector<8x64xf32>
    %643 = arith.subf %642, %637 : vector<8x64xf32>
    %cst_400 = arith.constant 0.000000e+00 : f32
    %644 = vector.broadcast %cst_400 : f32 to vector<8x64xf32>
    %645 = arith.subf %644, %640 : vector<8x64xf32>
    %646 = math.exp %645 : vector<8x64xf32>
    %647 = arith.mulf %643, %646 : vector<8x64xf32>
    %cst_401 = arith.constant 5.000000e-01 : f32
    %648 = vector.broadcast %cst_401 : f32 to vector<8x64xf32>
    %649 = arith.mulf %648, %647 : vector<8x64xf32>
    %650 = arith.mulf %649, %647 : vector<8x64xf32>
    %651 = arith.addf %650, %640 : vector<8x64xf32>
    %cst_402 = arith.constant 0.918938517 : f32
    %652 = vector.broadcast %cst_402 : f32 to vector<8x64xf32>
    %653 = arith.addf %651, %652 : vector<8x64xf32>
    %654 = arith.addf %594, %653 : vector<8x64xf32>
    %c11_403 = arith.constant 11 : index
    %c0_404 = arith.constant 0 : index
    %c0_405 = arith.constant 0 : index
    %655 = vector.load %arg10[%c11_403, %c0_404, %c0_405] : memref<16x8x32xbf16, #tpu.memory_space<vmem>>, vector<1x8x32xbf16>
    %656 = vector.shape_cast %655 : vector<1x8x32xbf16> to vector<8x32xbf16>
    %cst_406 = arith.constant dense<0.000000e+00> : vector<8x32xf32>
    %657 = tpu.matmul %318, %656, %cst_406 {dimension_numbers = #tpu.dot_dimension_numbers<[1], [0], [0], [1], [0, 0, 1, 1], [], []>} : vector<8x8xbf16>, vector<8x32xbf16>, vector<8x32xf32> -> vector<8x32xf32>
    %c11_407 = arith.constant 11 : index
    %c0_408 = arith.constant 0 : index
    %c0_409 = arith.constant 0 : index
    %658 = vector.load %arg11[%c11_407, %c0_408, %c0_409] : memref<16x1x32xf32, #tpu.memory_space<vmem>>, vector<1x1x32xf32>
    %659 = vector.shape_cast %658 : vector<1x1x32xf32> to vector<1x32xf32>
    %660 = vector.broadcast %659 : vector<1x32xf32> to vector<8x32xf32>
    %661 = arith.addf %657, %660 : vector<8x32xf32>
    %cst_410 = arith.constant 0.000000e+00 : f32
    %662 = vector.broadcast %cst_410 : f32 to vector<8x32xf32>
    %663 = arith.maximumf %661, %662 : vector<8x32xf32>
    %664 = arith.truncf %663 : vector<8x32xf32> to vector<8x32xbf16>
    %cst_411 = arith.constant dense<0.000000e+00> : vector<8x64xf32>
    %665 = tpu.matmul %664, %319, %cst_411 {dimension_numbers = #tpu.dot_dimension_numbers<[1], [0], [0], [1], [0, 0, 1, 1], [], []>} : vector<8x32xbf16>, vector<32x64xbf16>, vector<8x64xf32> -> vector<8x64xf32>
    %666 = vector.broadcast %321 : vector<1x64xf32> to vector<8x64xf32>
    %667 = arith.addf %665, %666 : vector<8x64xf32>
    %cst_412 = arith.constant dense<0.000000e+00> : vector<8x64xf32>
    %668 = tpu.matmul %664, %320, %cst_412 {dimension_numbers = #tpu.dot_dimension_numbers<[1], [0], [0], [1], [0, 0, 1, 1], [], []>} : vector<8x32xbf16>, vector<32x64xbf16>, vector<8x64xf32> -> vector<8x64xf32>
    %669 = vector.broadcast %322 : vector<1x64xf32> to vector<8x64xf32>
    %670 = arith.addf %668, %669 : vector<8x64xf32>
    %c11_413 = arith.constant 11 : index
    %c0_414 = arith.constant 0 : index
    %c0_415 = arith.constant 0 : index
    %671 = vector.load %arg1[%c11_413, %c0_414, %c0_415] : memref<16x8x64xf32, #tpu.memory_space<vmem>>, vector<1x8x64xf32>
    %672 = vector.shape_cast %671 : vector<1x8x64xf32> to vector<8x64xf32>
    %673 = arith.subf %672, %667 : vector<8x64xf32>
    %cst_416 = arith.constant 0.000000e+00 : f32
    %674 = vector.broadcast %cst_416 : f32 to vector<8x64xf32>
    %675 = arith.subf %674, %670 : vector<8x64xf32>
    %676 = math.exp %675 : vector<8x64xf32>
    %677 = arith.mulf %673, %676 : vector<8x64xf32>
    %cst_417 = arith.constant 5.000000e-01 : f32
    %678 = vector.broadcast %cst_417 : f32 to vector<8x64xf32>
    %679 = arith.mulf %678, %677 : vector<8x64xf32>
    %680 = arith.mulf %679, %677 : vector<8x64xf32>
    %681 = arith.addf %680, %670 : vector<8x64xf32>
    %cst_418 = arith.constant 0.918938517 : f32
    %682 = vector.broadcast %cst_418 : f32 to vector<8x64xf32>
    %683 = arith.addf %681, %682 : vector<8x64xf32>
    %684 = arith.addf %624, %683 : vector<8x64xf32>
    %c12_419 = arith.constant 12 : index
    %c0_420 = arith.constant 0 : index
    %c0_421 = arith.constant 0 : index
    %685 = vector.load %arg10[%c12_419, %c0_420, %c0_421] : memref<16x8x32xbf16, #tpu.memory_space<vmem>>, vector<1x8x32xbf16>
    %686 = vector.shape_cast %685 : vector<1x8x32xbf16> to vector<8x32xbf16>
    %cst_422 = arith.constant dense<0.000000e+00> : vector<8x32xf32>
    %687 = tpu.matmul %318, %686, %cst_422 {dimension_numbers = #tpu.dot_dimension_numbers<[1], [0], [0], [1], [0, 0, 1, 1], [], []>} : vector<8x8xbf16>, vector<8x32xbf16>, vector<8x32xf32> -> vector<8x32xf32>
    %c12_423 = arith.constant 12 : index
    %c0_424 = arith.constant 0 : index
    %c0_425 = arith.constant 0 : index
    %688 = vector.load %arg11[%c12_423, %c0_424, %c0_425] : memref<16x1x32xf32, #tpu.memory_space<vmem>>, vector<1x1x32xf32>
    %689 = vector.shape_cast %688 : vector<1x1x32xf32> to vector<1x32xf32>
    %690 = vector.broadcast %689 : vector<1x32xf32> to vector<8x32xf32>
    %691 = arith.addf %687, %690 : vector<8x32xf32>
    %cst_426 = arith.constant 0.000000e+00 : f32
    %692 = vector.broadcast %cst_426 : f32 to vector<8x32xf32>
    %693 = arith.maximumf %691, %692 : vector<8x32xf32>
    %694 = arith.truncf %693 : vector<8x32xf32> to vector<8x32xbf16>
    %cst_427 = arith.constant dense<0.000000e+00> : vector<8x64xf32>
    %695 = tpu.matmul %694, %319, %cst_427 {dimension_numbers = #tpu.dot_dimension_numbers<[1], [0], [0], [1], [0, 0, 1, 1], [], []>} : vector<8x32xbf16>, vector<32x64xbf16>, vector<8x64xf32> -> vector<8x64xf32>
    %696 = vector.broadcast %321 : vector<1x64xf32> to vector<8x64xf32>
    %697 = arith.addf %695, %696 : vector<8x64xf32>
    %cst_428 = arith.constant dense<0.000000e+00> : vector<8x64xf32>
    %698 = tpu.matmul %694, %320, %cst_428 {dimension_numbers = #tpu.dot_dimension_numbers<[1], [0], [0], [1], [0, 0, 1, 1], [], []>} : vector<8x32xbf16>, vector<32x64xbf16>, vector<8x64xf32> -> vector<8x64xf32>
    %699 = vector.broadcast %322 : vector<1x64xf32> to vector<8x64xf32>
    %700 = arith.addf %698, %699 : vector<8x64xf32>
    %c12_429 = arith.constant 12 : index
    %c0_430 = arith.constant 0 : index
    %c0_431 = arith.constant 0 : index
    %701 = vector.load %arg1[%c12_429, %c0_430, %c0_431] : memref<16x8x64xf32, #tpu.memory_space<vmem>>, vector<1x8x64xf32>
    %702 = vector.shape_cast %701 : vector<1x8x64xf32> to vector<8x64xf32>
    %703 = arith.subf %702, %697 : vector<8x64xf32>
    %cst_432 = arith.constant 0.000000e+00 : f32
    %704 = vector.broadcast %cst_432 : f32 to vector<8x64xf32>
    %705 = arith.subf %704, %700 : vector<8x64xf32>
    %706 = math.exp %705 : vector<8x64xf32>
    %707 = arith.mulf %703, %706 : vector<8x64xf32>
    %cst_433 = arith.constant 5.000000e-01 : f32
    %708 = vector.broadcast %cst_433 : f32 to vector<8x64xf32>
    %709 = arith.mulf %708, %707 : vector<8x64xf32>
    %710 = arith.mulf %709, %707 : vector<8x64xf32>
    %711 = arith.addf %710, %700 : vector<8x64xf32>
    %cst_434 = arith.constant 0.918938517 : f32
    %712 = vector.broadcast %cst_434 : f32 to vector<8x64xf32>
    %713 = arith.addf %711, %712 : vector<8x64xf32>
    %714 = arith.addf %654, %713 : vector<8x64xf32>
    %c13_435 = arith.constant 13 : index
    %c0_436 = arith.constant 0 : index
    %c0_437 = arith.constant 0 : index
    %715 = vector.load %arg10[%c13_435, %c0_436, %c0_437] : memref<16x8x32xbf16, #tpu.memory_space<vmem>>, vector<1x8x32xbf16>
    %716 = vector.shape_cast %715 : vector<1x8x32xbf16> to vector<8x32xbf16>
    %cst_438 = arith.constant dense<0.000000e+00> : vector<8x32xf32>
    %717 = tpu.matmul %318, %716, %cst_438 {dimension_numbers = #tpu.dot_dimension_numbers<[1], [0], [0], [1], [0, 0, 1, 1], [], []>} : vector<8x8xbf16>, vector<8x32xbf16>, vector<8x32xf32> -> vector<8x32xf32>
    %c13_439 = arith.constant 13 : index
    %c0_440 = arith.constant 0 : index
    %c0_441 = arith.constant 0 : index
    %718 = vector.load %arg11[%c13_439, %c0_440, %c0_441] : memref<16x1x32xf32, #tpu.memory_space<vmem>>, vector<1x1x32xf32>
    %719 = vector.shape_cast %718 : vector<1x1x32xf32> to vector<1x32xf32>
    %720 = vector.broadcast %719 : vector<1x32xf32> to vector<8x32xf32>
    %721 = arith.addf %717, %720 : vector<8x32xf32>
    %cst_442 = arith.constant 0.000000e+00 : f32
    %722 = vector.broadcast %cst_442 : f32 to vector<8x32xf32>
    %723 = arith.maximumf %721, %722 : vector<8x32xf32>
    %724 = arith.truncf %723 : vector<8x32xf32> to vector<8x32xbf16>
    %cst_443 = arith.constant dense<0.000000e+00> : vector<8x64xf32>
    %725 = tpu.matmul %724, %319, %cst_443 {dimension_numbers = #tpu.dot_dimension_numbers<[1], [0], [0], [1], [0, 0, 1, 1], [], []>} : vector<8x32xbf16>, vector<32x64xbf16>, vector<8x64xf32> -> vector<8x64xf32>
    %726 = vector.broadcast %321 : vector<1x64xf32> to vector<8x64xf32>
    %727 = arith.addf %725, %726 : vector<8x64xf32>
    %cst_444 = arith.constant dense<0.000000e+00> : vector<8x64xf32>
    %728 = tpu.matmul %724, %320, %cst_444 {dimension_numbers = #tpu.dot_dimension_numbers<[1], [0], [0], [1], [0, 0, 1, 1], [], []>} : vector<8x32xbf16>, vector<32x64xbf16>, vector<8x64xf32> -> vector<8x64xf32>
    %729 = vector.broadcast %322 : vector<1x64xf32> to vector<8x64xf32>
    %730 = arith.addf %728, %729 : vector<8x64xf32>
    %c13_445 = arith.constant 13 : index
    %c0_446 = arith.constant 0 : index
    %c0_447 = arith.constant 0 : index
    %731 = vector.load %arg1[%c13_445, %c0_446, %c0_447] : memref<16x8x64xf32, #tpu.memory_space<vmem>>, vector<1x8x64xf32>
    %732 = vector.shape_cast %731 : vector<1x8x64xf32> to vector<8x64xf32>
    %733 = arith.subf %732, %727 : vector<8x64xf32>
    %cst_448 = arith.constant 0.000000e+00 : f32
    %734 = vector.broadcast %cst_448 : f32 to vector<8x64xf32>
    %735 = arith.subf %734, %730 : vector<8x64xf32>
    %736 = math.exp %735 : vector<8x64xf32>
    %737 = arith.mulf %733, %736 : vector<8x64xf32>
    %cst_449 = arith.constant 5.000000e-01 : f32
    %738 = vector.broadcast %cst_449 : f32 to vector<8x64xf32>
    %739 = arith.mulf %738, %737 : vector<8x64xf32>
    %740 = arith.mulf %739, %737 : vector<8x64xf32>
    %741 = arith.addf %740, %730 : vector<8x64xf32>
    %cst_450 = arith.constant 0.918938517 : f32
    %742 = vector.broadcast %cst_450 : f32 to vector<8x64xf32>
    %743 = arith.addf %741, %742 : vector<8x64xf32>
    %744 = arith.addf %684, %743 : vector<8x64xf32>
    %c14_451 = arith.constant 14 : index
    %c0_452 = arith.constant 0 : index
    %c0_453 = arith.constant 0 : index
    %745 = vector.load %arg10[%c14_451, %c0_452, %c0_453] : memref<16x8x32xbf16, #tpu.memory_space<vmem>>, vector<1x8x32xbf16>
    %746 = vector.shape_cast %745 : vector<1x8x32xbf16> to vector<8x32xbf16>
    %cst_454 = arith.constant dense<0.000000e+00> : vector<8x32xf32>
    %747 = tpu.matmul %318, %746, %cst_454 {dimension_numbers = #tpu.dot_dimension_numbers<[1], [0], [0], [1], [0, 0, 1, 1], [], []>} : vector<8x8xbf16>, vector<8x32xbf16>, vector<8x32xf32> -> vector<8x32xf32>
    %c14_455 = arith.constant 14 : index
    %c0_456 = arith.constant 0 : index
    %c0_457 = arith.constant 0 : index
    %748 = vector.load %arg11[%c14_455, %c0_456, %c0_457] : memref<16x1x32xf32, #tpu.memory_space<vmem>>, vector<1x1x32xf32>
    %749 = vector.shape_cast %748 : vector<1x1x32xf32> to vector<1x32xf32>
    %750 = vector.broadcast %749 : vector<1x32xf32> to vector<8x32xf32>
    %751 = arith.addf %747, %750 : vector<8x32xf32>
    %cst_458 = arith.constant 0.000000e+00 : f32
    %752 = vector.broadcast %cst_458 : f32 to vector<8x32xf32>
    %753 = arith.maximumf %751, %752 : vector<8x32xf32>
    %754 = arith.truncf %753 : vector<8x32xf32> to vector<8x32xbf16>
    %cst_459 = arith.constant dense<0.000000e+00> : vector<8x64xf32>
    %755 = tpu.matmul %754, %319, %cst_459 {dimension_numbers = #tpu.dot_dimension_numbers<[1], [0], [0], [1], [0, 0, 1, 1], [], []>} : vector<8x32xbf16>, vector<32x64xbf16>, vector<8x64xf32> -> vector<8x64xf32>
    %756 = vector.broadcast %321 : vector<1x64xf32> to vector<8x64xf32>
    %757 = arith.addf %755, %756 : vector<8x64xf32>
    %cst_460 = arith.constant dense<0.000000e+00> : vector<8x64xf32>
    %758 = tpu.matmul %754, %320, %cst_460 {dimension_numbers = #tpu.dot_dimension_numbers<[1], [0], [0], [1], [0, 0, 1, 1], [], []>} : vector<8x32xbf16>, vector<32x64xbf16>, vector<8x64xf32> -> vector<8x64xf32>
    %759 = vector.broadcast %322 : vector<1x64xf32> to vector<8x64xf32>
    %760 = arith.addf %758, %759 : vector<8x64xf32>
    %c14_461 = arith.constant 14 : index
    %c0_462 = arith.constant 0 : index
    %c0_463 = arith.constant 0 : index
    %761 = vector.load %arg1[%c14_461, %c0_462, %c0_463] : memref<16x8x64xf32, #tpu.memory_space<vmem>>, vector<1x8x64xf32>
    %762 = vector.shape_cast %761 : vector<1x8x64xf32> to vector<8x64xf32>
    %763 = arith.subf %762, %757 : vector<8x64xf32>
    %cst_464 = arith.constant 0.000000e+00 : f32
    %764 = vector.broadcast %cst_464 : f32 to vector<8x64xf32>
    %765 = arith.subf %764, %760 : vector<8x64xf32>
    %766 = math.exp %765 : vector<8x64xf32>
    %767 = arith.mulf %763, %766 : vector<8x64xf32>
    %cst_465 = arith.constant 5.000000e-01 : f32
    %768 = vector.broadcast %cst_465 : f32 to vector<8x64xf32>
    %769 = arith.mulf %768, %767 : vector<8x64xf32>
    %770 = arith.mulf %769, %767 : vector<8x64xf32>
    %771 = arith.addf %770, %760 : vector<8x64xf32>
    %cst_466 = arith.constant 0.918938517 : f32
    %772 = vector.broadcast %cst_466 : f32 to vector<8x64xf32>
    %773 = arith.addf %771, %772 : vector<8x64xf32>
    %774 = arith.addf %714, %773 : vector<8x64xf32>
    %c15_467 = arith.constant 15 : index
    %c0_468 = arith.constant 0 : index
    %c0_469 = arith.constant 0 : index
    %775 = vector.load %arg10[%c15_467, %c0_468, %c0_469] : memref<16x8x32xbf16, #tpu.memory_space<vmem>>, vector<1x8x32xbf16>
    %776 = vector.shape_cast %775 : vector<1x8x32xbf16> to vector<8x32xbf16>
    %cst_470 = arith.constant dense<0.000000e+00> : vector<8x32xf32>
    %777 = tpu.matmul %318, %776, %cst_470 {dimension_numbers = #tpu.dot_dimension_numbers<[1], [0], [0], [1], [0, 0, 1, 1], [], []>} : vector<8x8xbf16>, vector<8x32xbf16>, vector<8x32xf32> -> vector<8x32xf32>
    %c15_471 = arith.constant 15 : index
    %c0_472 = arith.constant 0 : index
    %c0_473 = arith.constant 0 : index
    %778 = vector.load %arg11[%c15_471, %c0_472, %c0_473] : memref<16x1x32xf32, #tpu.memory_space<vmem>>, vector<1x1x32xf32>
    %779 = vector.shape_cast %778 : vector<1x1x32xf32> to vector<1x32xf32>
    %780 = vector.broadcast %779 : vector<1x32xf32> to vector<8x32xf32>
    %781 = arith.addf %777, %780 : vector<8x32xf32>
    %cst_474 = arith.constant 0.000000e+00 : f32
    %782 = vector.broadcast %cst_474 : f32 to vector<8x32xf32>
    %783 = arith.maximumf %781, %782 : vector<8x32xf32>
    %784 = arith.truncf %783 : vector<8x32xf32> to vector<8x32xbf16>
    %cst_475 = arith.constant dense<0.000000e+00> : vector<8x64xf32>
    %785 = tpu.matmul %784, %319, %cst_475 {dimension_numbers = #tpu.dot_dimension_numbers<[1], [0], [0], [1], [0, 0, 1, 1], [], []>} : vector<8x32xbf16>, vector<32x64xbf16>, vector<8x64xf32> -> vector<8x64xf32>
    %786 = vector.broadcast %321 : vector<1x64xf32> to vector<8x64xf32>
    %787 = arith.addf %785, %786 : vector<8x64xf32>
    %cst_476 = arith.constant dense<0.000000e+00> : vector<8x64xf32>
    %788 = tpu.matmul %784, %320, %cst_476 {dimension_numbers = #tpu.dot_dimension_numbers<[1], [0], [0], [1], [0, 0, 1, 1], [], []>} : vector<8x32xbf16>, vector<32x64xbf16>, vector<8x64xf32> -> vector<8x64xf32>
    %789 = vector.broadcast %322 : vector<1x64xf32> to vector<8x64xf32>
    %790 = arith.addf %788, %789 : vector<8x64xf32>
    %c15_477 = arith.constant 15 : index
    %c0_478 = arith.constant 0 : index
    %c0_479 = arith.constant 0 : index
    %791 = vector.load %arg1[%c15_477, %c0_478, %c0_479] : memref<16x8x64xf32, #tpu.memory_space<vmem>>, vector<1x8x64xf32>
    %792 = vector.shape_cast %791 : vector<1x8x64xf32> to vector<8x64xf32>
    %793 = arith.subf %792, %787 : vector<8x64xf32>
    %cst_480 = arith.constant 0.000000e+00 : f32
    %794 = vector.broadcast %cst_480 : f32 to vector<8x64xf32>
    %795 = arith.subf %794, %790 : vector<8x64xf32>
    %796 = math.exp %795 : vector<8x64xf32>
    %797 = arith.mulf %793, %796 : vector<8x64xf32>
    %cst_481 = arith.constant 5.000000e-01 : f32
    %798 = vector.broadcast %cst_481 : f32 to vector<8x64xf32>
    %799 = arith.mulf %798, %797 : vector<8x64xf32>
    %800 = arith.mulf %799, %797 : vector<8x64xf32>
    %801 = arith.addf %800, %790 : vector<8x64xf32>
    %cst_482 = arith.constant 0.918938517 : f32
    %802 = vector.broadcast %cst_482 : f32 to vector<8x64xf32>
    %803 = arith.addf %801, %802 : vector<8x64xf32>
    %804 = arith.addf %744, %803 : vector<8x64xf32>
    %805 = arith.addf %774, %804 : vector<8x64xf32>
    %806 = vector.broadcast %0 : vector<8x1xf32> to vector<8x64xf32>
    %807 = arith.mulf %805, %806 : vector<8x64xf32>
    %808 = vector.shape_cast %807 : vector<8x64xf32> to vector<1x8x64xf32>
    %cst_483 = arith.constant dense<0.000000e+00> : vector<1xf32>
    %809 = vector.multi_reduction <add>, %808, %cst_483 [1, 2] : vector<1x8x64xf32> to vector<1xf32>
    %810 = vector.shape_cast %809 : vector<1xf32> to vector<1x1x1xf32>
    %811 = vector.extract %810[0, 0, 0] : f32 from vector<1x1x1xf32>
    %812 = tpu.iota {dimensions = array<i32: 0>} : vector<8x128xi32>
    %c0_i32 = arith.constant 0 : i32
    %813 = vector.broadcast %c0_i32 : i32 to vector<8x128xi32>
    %814 = arith.cmpi eq, %812, %813 : vector<8x128xi32>
    %c1_i32 = arith.constant 1 : i32
    %815 = vector.broadcast %c1_i32 : i32 to vector<8x128xi32>
    %816 = arith.cmpi eq, %812, %815 : vector<8x128xi32>
    %cst_484 = arith.constant 0.000000e+00 : f32
    %817 = vector.broadcast %811 : f32 to vector<8x128xf32>
    %818 = vector.broadcast %cst_484 : f32 to vector<8x128xf32>
    %819 = arith.select %816, %817, %818 : vector<8x128xi1>, vector<8x128xf32>
    %820 = vector.broadcast %317 : f32 to vector<8x128xf32>
    %821 = arith.select %814, %820, %819 : vector<8x128xi1>, vector<8x128xf32>
    %822 = vector.shape_cast %821 : vector<8x128xf32> to vector<1x8x128xf32>
    %c0_485 = arith.constant 0 : index
    %c0_486 = arith.constant 0 : index
    %c0_487 = arith.constant 0 : index
    %823 = vector.load %arg16[%c0_485, %c0_486, %c0_487] : memref<1x8x128xf32, #tpu.memory_space<vmem>>, vector<1x8x128xf32>
    tpu.vector_store %arg16[%c0_485, %c0_486, %c0_487], %822 {strides = array<i32>} : memref<1x8x128xf32, #tpu.memory_space<vmem>>, vector<1x8x128xf32>,
    return
  }
  func.func @transform_0(%arg0: i32) -> (i32, i32, i32) {
    %c0_i32 = arith.constant 0 : i32
    %c0_i32_0 = arith.constant 0 : i32
    %c0_i32_1 = arith.constant 0 : i32
    return %c0_i32, %arg0, %c0_i32_0 : i32, i32, i32
  }
  func.func @transform_1(%arg0: i32) -> (i32, i32) {
    %c0_i32 = arith.constant 0 : i32
    %c0_i32_0 = arith.constant 0 : i32
    return %arg0, %c0_i32 : i32, i32
  }
  func.func @transform_2(%arg0: i32) -> (i32, i32) {
    %c0_i32 = arith.constant 0 : i32
    %c0_i32_0 = arith.constant 0 : i32
    return %arg0, %c0_i32 : i32, i32
  }
  func.func @transform_3(%arg0: i32) -> (i32, i32) {
    %c0_i32 = arith.constant 0 : i32
    %c0_i32_0 = arith.constant 0 : i32
    %c0_i32_1 = arith.constant 0 : i32
    return %c0_i32, %c0_i32_0 : i32, i32
  }
  func.func @transform_4(%arg0: i32) -> (i32, i32) {
    %c0_i32 = arith.constant 0 : i32
    %c0_i32_0 = arith.constant 0 : i32
    %c0_i32_1 = arith.constant 0 : i32
    return %c0_i32, %c0_i32_0 : i32, i32
  }
  func.func @transform_5(%arg0: i32) -> (i32, i32, i32) {
    %c0_i32 = arith.constant 0 : i32
    %c0_i32_0 = arith.constant 0 : i32
    %c0_i32_1 = arith.constant 0 : i32
    %c0_i32_2 = arith.constant 0 : i32
    return %c0_i32, %c0_i32_0, %c0_i32_1 : i32, i32, i32
  }
  func.func @transform_6(%arg0: i32) -> (i32, i32, i32) {
    %c0_i32 = arith.constant 0 : i32
    %c0_i32_0 = arith.constant 0 : i32
    %c0_i32_1 = arith.constant 0 : i32
    %c0_i32_2 = arith.constant 0 : i32
    return %c0_i32, %c0_i32_0, %c0_i32_1 : i32, i32, i32
  }
  func.func @transform_7(%arg0: i32) -> (i32, i32) {
    %c0_i32 = arith.constant 0 : i32
    %c0_i32_0 = arith.constant 0 : i32
    %c0_i32_1 = arith.constant 0 : i32
    return %c0_i32, %c0_i32_0 : i32, i32
  }
  func.func @transform_8(%arg0: i32) -> (i32, i32) {
    %c0_i32 = arith.constant 0 : i32
    %c0_i32_0 = arith.constant 0 : i32
    %c0_i32_1 = arith.constant 0 : i32
    return %c0_i32, %c0_i32_0 : i32, i32
  }
  func.func @transform_9(%arg0: i32) -> (i32, i32, i32) {
    %c0_i32 = arith.constant 0 : i32
    %c0_i32_0 = arith.constant 0 : i32
    %c0_i32_1 = arith.constant 0 : i32
    %c0_i32_2 = arith.constant 0 : i32
    return %c0_i32, %c0_i32_0, %c0_i32_1 : i32, i32, i32
  }
  func.func @transform_10(%arg0: i32) -> (i32, i32, i32) {
    %c0_i32 = arith.constant 0 : i32
    %c0_i32_0 = arith.constant 0 : i32
    %c0_i32_1 = arith.constant 0 : i32
    %c0_i32_2 = arith.constant 0 : i32
    return %c0_i32, %c0_i32_0, %c0_i32_1 : i32, i32, i32
  }
  func.func @transform_11(%arg0: i32) -> (i32, i32) {
    %c0_i32 = arith.constant 0 : i32
    %c0_i32_0 = arith.constant 0 : i32
    %c0_i32_1 = arith.constant 0 : i32
    return %c0_i32, %c0_i32_0 : i32, i32
  }
  func.func @transform_12(%arg0: i32) -> (i32, i32) {
    %c0_i32 = arith.constant 0 : i32
    %c0_i32_0 = arith.constant 0 : i32
    %c0_i32_1 = arith.constant 0 : i32
    return %c0_i32, %c0_i32_0 : i32, i32
  }
  func.func @transform_13(%arg0: i32) -> (i32, i32) {
    %c0_i32 = arith.constant 0 : i32
    %c0_i32_0 = arith.constant 0 : i32
    %c0_i32_1 = arith.constant 0 : i32
    return %c0_i32, %c0_i32_0 : i32, i32
  }
  func.func @transform_14(%arg0: i32) -> (i32, i32) {
    %c0_i32 = arith.constant 0 : i32
    %c0_i32_0 = arith.constant 0 : i32
    %c0_i32_1 = arith.constant 0 : i32
    return %c0_i32, %c0_i32_0 : i32, i32
  }
  func.func @transform_15(%arg0: i32) -> (i32, i32, i32) {
    %c0_i32 = arith.constant 0 : i32
    %c0_i32_0 = arith.constant 0 : i32
    %c0_i32_1 = arith.constant 0 : i32
    return %arg0, %c0_i32, %c0_i32_0 : i32, i32, i32
  }
}

</mosaic_0001>

<bundles_post_ra>
// kernel: tpu_custom_call.1
= control target key start
LH: loop header
LB: loop body
LE: loop exit
PB: predicated region body
PF: predicated region fallthrough
CT: control target
= control target key end

     0   :  { %v6881_v1 = vmov 0.0   ;;  %vm6882_vm0 = vmmov 0   ;;  %vm94_vm1 = vcmask 523264   ;;  %s8239_s0 = inlined_call_operand.vmem [shape: f32[16,8,64], index: 0, kind: input, shape index: {}]   ;;  %s8240_s1 = inlined_call_operand.vmem [shape: f32[8,8], index: 1, kind: input, shape index: {}]   ;;  %s8241_s2 = inlined_call_operand.vmem [shape: f32[8,1], index: 2, kind: input, shape index: {}]   ;;  %s8242_s3 = inlined_call_operand.vmem [shape: bf16[64,32], index: 3, kind: input, shape index: {}]   ;;  %s8243_s4 = inlined_call_operand.vmem [shape: f32[1,32], index: 4, kind: input, shape index: {}]   ;;  %s8244_s5 = inlined_call_operand.vmem [shape: bf16[16,32,8], index: 5, kind: input, shape index: {}]   ;;  %s8245_s6 = inlined_call_operand.vmem [shape: bf16[16,32,8], index: 6, kind: input, shape index: {}]   ;;  %s8246_s7 = inlined_call_operand.vmem [shape: f32[1,8], index: 7, kind: input, shape index: {}]   ;;  %s8247_s8 = inlined_call_operand.vmem [shape: f32[1,8], index: 8, kind: input, shape index: {}]   ;;  %s8248_s9 = inlined_call_operand.vmem [shape: bf16[16,8,32], index: 9, kind: input, shape index: {}]   ;;  %s8249_s10 = inlined_call_operand.vmem [shape: f32[16,1,32], index: 10, kind: input, shape index: {}]   ;;  %s8250_s11 = inlined_call_operand.vmem [shape: bf16[32,64], index: 11, kind: input, shape index: {}]   ;;  %s8251_s12 = inlined_call_operand.vmem [shape: bf16[32,64], index: 12, kind: input, shape index: {}]   ;;  %s8252_s13 = inlined_call_operand.vmem [shape: f32[1,64], index: 13, kind: input, shape index: {}]   ;;  %s8253_s14 = inlined_call_operand.vmem [shape: f32[1,64], index: 14, kind: input, shape index: {}]   ;;  %s8254_s15 = inlined_call_operand.hbm [shape: f32[1,8,128], index: 15, kind: output, shape index: {}]  }
   0x1   :  { %v6968_v0 = vld [vmem:[%s8242_s3] sm:$0xff]   ;;  %5914 = vmatprep.subr.bf16.mxu0 %v6881_v1  ;;  %5926 = vmatprep.subr.bf16.mxu1 %v6881_v1  ;;  %v6976_v2 = vld [vmem:[%s8242_s3 + $0x8] sm:$0xff]   ;;  %v6988_v3 = vld [vmem:[%s8242_s3 + $0x10] sm:$0xff]  }
   0x2   :  { %5915 = vmatpush3.bf16.msra.mxu0 %v6968_v0  ;;  %5922 = vmatprep.mubr.msk.bf16.mxu0 %vm6882_vm0, %v6881_v1  ;;  %v6996_v4 = vld [vmem:[%s8242_s3 + $0x18] sm:$0xff]   ;;  %v62_v5 = vld [vmem:[%s8239_s0] sm:$0xff]  ;;  %v5271_v7 = vld [vmem:[%s8239_s0 + $0x10] sm:$0xff] }
   0x3   :  { %5916 = vmatprep.subr.bf16.mxu0 %v6881_v1  ;;  %5927 = vmatpush3.bf16.msra.mxu1 %v6968_v0  ;;  %v63_v6 = vpack.c.bf16 %v62_v5, %v62_v5  ;;  %v208_v8 = vpack.c.bf16 %v5271_v7, %v5271_v7  ;;  %v5291_v9 = vld [vmem:[%s8239_s0 + $0x20] sm:$0xff] }
   0x4   :  { %5928 = vmatprep.subr.bf16.mxu1 %v6881_v1  ;;  %5934 = vmatprep.mubr.msk.bf16.mxu1 %vm6882_vm0, %v6881_v1  ;;  %v324_v10 = vpack.c.bf16 %v5291_v9, %v5291_v9 }
   0x6   :  { %5917 = vmatpush3.bf16.msra.mxu0 %v6976_v2 }
   0x7   :  { %5918 = vmatprep.subr.bf16.mxu0 %v6881_v1  ;;  %5929 = vmatpush3.bf16.msra.mxu1 %v6976_v2 }
   0x8   :  { %5930 = vmatprep.subr.bf16.mxu1 %v6881_v1 }
   0xa   :  { %5919 = vmatpush3.bf16.msra.mxu0 %v6988_v3 }
   0xb   :  { %5920 = vmatprep.subr.bf16.mxu0 %v6881_v1  ;;  %5931 = vmatpush3.bf16.msra.mxu1 %v6988_v3 }
   0xc   :  { %5932 = vmatprep.subr.bf16.mxu1 %v6881_v1 }
   0xe   :  { %5921 = vmatpush3.bf16.msra.mxu0 %v6996_v4 }
   0xf   :  { %5938 = vmatprep.subr.bf16.mxu0 %v6881_v1  ;;  %5933 = vmatpush3.bf16.msra.mxu1 %v6996_v4 }
  0x10   :  { %5950 = vmatprep.subr.bf16.mxu1 %v6881_v1 }
  0x11   :  { %5923 = vmatmul.mubr.msk.bf16.vlgmr.msra.gmra.mrb[0].mxu0 %vm94_vm1, %v63_v6 }
  0x12   :  { %5939 = vmatpush3.bf16.msra.mxu0 %v6968_v0  ;;  %5946 = vmatprep.mubr.msk.bf16.mxu0 %vm6882_vm0, %v6881_v1 }
  0x13   :  { %5940 = vmatprep.subr.bf16.mxu0 %v6881_v1 }
  0x16   :  { %5941 = vmatpush3.bf16.msra.mxu0 %v6976_v2 }
  0x17   :  { %5942 = vmatprep.subr.bf16.mxu0 %v6881_v1 }
  0x1a   :  { %5943 = vmatpush3.bf16.msra.mxu0 %v6988_v3 }
  0x1b   :  { %5944 = vmatprep.subr.bf16.mxu0 %v6881_v1 }
  0x1e   :  { %5945 = vmatpush3.bf16.msra.mxu0 %v6996_v4 }
  0x1f   :  { %5962 = vmatprep.subr.bf16.mxu0 %v6881_v1 }
  0x21   :  { %5947 = vmatmul.mubr.msk.bf16.vlgmr.msra.gmra.mrb[4].mxu0 %vm94_vm1, %v208_v8 }
  0x22   :  { %5963 = vmatpush3.bf16.msra.mxu0 %v6968_v0  ;;  %5970 = vmatprep.mubr.msk.bf16.mxu0 %vm6882_vm0, %v6881_v1 }
  0x23   :  { %5964 = vmatprep.subr.bf16.mxu0 %v6881_v1 }
  0x26   :  { %5965 = vmatpush3.bf16.msra.mxu0 %v6976_v2 }
  0x27   :  { %5966 = vmatprep.subr.bf16.mxu0 %v6881_v1 }
  0x2a   :  { %5967 = vmatpush3.bf16.msra.mxu0 %v6988_v3 }
  0x2b   :  { %5968 = vmatprep.subr.bf16.mxu0 %v6881_v1 }
  0x2e   :  { %5969 = vmatpush3.bf16.msra.mxu0 %v6996_v4 }
  0x2f   :  { %5990 = vmatprep.subr.bf16.mxu0 %v6881_v1 }
  0x31   :  { %5971 = vmatmul.mubr.msk.bf16.vlgmr.msra.gmra.mrb[8].mxu0 %vm94_vm1, %v324_v10 }
  0x32   :  { %5994 = vmatprep.mubr.msk.bf16.mxu0 %vm6882_vm0, %v6881_v1 }
  0x33   :  { %20 = vsyncpa [#allocation3], 0  ;;  %v5261_v11 = vld [vmem:[%s8239_s0 + $0x8] sm:$0xff]  ;;  %v5281_v13 = vld [vmem:[%s8239_s0 + $0x18] sm:$0xff]  ;;  %vm387_vm2 = vcmask 261120   ;;  %vm2820_vm3 = vcmask 1043456  }
  0x34   :  { %v150_v12 = vpack.c.bf16 %v5261_v11, %v5261_v11  ;;  %v6727_v14 = vld [vmem:[%s8245_s6 + $0x40] sm:$0xff]   ;;  %v266_v15 = vpack.c.bf16 %v5281_v13, %v5281_v13  ;;  %v6729_v17 = vld [vmem:[%s8245_s6 + $0x48] sm:$0xff]   ;;  %v6735_v52 = vld [vmem:[%s8245_s6 + $0x50] sm:$0xff]   ;;  %vm2782_vm4 = vcmask 64512   ;;  %vm2787_vm5 = vcmask 7168   ;;  %s6884_s18 = smov [#allocation2]  }
  0x35   :  { %5991 = vmatpush3.bf16.msra.mxu0 %v6727_v14  ;;  %v6728_v16 = vld [vmem:[%s8244_s5 + $0x40] sm:$0xff]   ;;  %v6730_v18 = vld [vmem:[%s8244_s5 + $0x48] sm:$0xff]   ;;  %v6736_v53 = vld [vmem:[%s8244_s5 + $0x50] sm:$0xff]   ;;  %s5247_s19 = sshll.u32 %s6884_s18, 4  ;;  %s5248_s19 = int_to_ptr.vmem [resolvable:$true] %s5247_s19 }
  0x36   :  { %5935 = vmatmul.mubr.msk.bf16.vlgmr.msra.gmra.mrb[0].mxu1 %vm94_vm1, %v150_v12  ;;  %5992 = vmatprep.subr.bf16.mxu0 %v6881_v1  ;;  %v7082_v27 = vld [vmem:[%s8243_s4] ss:$0 sm:$0xff]  ;;  %v6732_v37 = vld [vmem:[%s8244_s5 + $0x8] sm:$0xff]   ;;  %v6737_v54 = vld [vmem:[%s8245_s6 + $0x58] sm:$0xff]   ;;  %p6862_p1 = scmp.lt.s32.totalorder %s5248_s19, %s5248_s19 }
  0x37   :  { %5951 = vmatpush3.bf16.msra.mxu1 %v6968_v0  ;;  %5958 = vmatprep.mubr.msk.bf16.mxu1 %vm6882_vm0, %v6881_v1  ;;  %v6731_v34 = vld [vmem:[%s8244_s5] sm:$0xff]   ;;  %v6734_v41 = vld [vmem:[%s8245_s6 + $0x8] sm:$0xff]   ;;  %v6738_v55 = vld [vmem:[%s8244_s5 + $0x58] sm:$0xff]  }
  0x38   :  { %5952 = vmatprep.subr.bf16.mxu1 %v6881_v1  ;;  %v6733_v39 = vld [vmem:[%s8245_s6] sm:$0xff]   ;;  %v5313_v42 = vld [vmem:[%s8239_s0 + $0x28] sm:$0xff] }
  0x39   :  { %5993 = vmatpush3.bf16.msra.mxu0 %v6729_v17  ;;  %v597_v43 = vpack.c.bf16 %v5313_v42, %v5313_v42 }
  0x3a   :  { %6006 = vmatprep.subr.bf16.mxu0 %v6881_v1 }
  0x3b   :  { %5953 = vmatpush3.bf16.msra.mxu1 %v6976_v2 }
  0x3c   :  { %5954 = vmatprep.subr.bf16.mxu1 %v6881_v1 }
  0x3f   :  { %5955 = vmatpush3.bf16.msra.mxu1 %v6988_v3 }
  0x40   :  { %5956 = vmatprep.subr.bf16.mxu1 %v6881_v1 }
  0x43   :  { %5957 = vmatpush3.bf16.msra.mxu1 %v6996_v4 }
  0x44   :  { %5974 = vmatprep.subr.bf16.mxu1 %v6881_v1 }
  0x46   :  { %5959 = vmatmul.mubr.msk.bf16.vlgmr.msra.gmra.mrb[4].mxu1 %vm94_vm1, %v266_v15 }
  0x47   :  { %5978 = vmatprep.mubr.msk.bf16.mxu1 %vm6882_vm0, %v6881_v1  ;;  %5975 = vmatpush3.bf16.msra.mxu1 %v6728_v16 }
  0x48   :  { %5976 = vmatprep.subr.bf16.mxu1 %v6881_v1 }
  0x4b   :  { %5977 = vmatpush3.bf16.msra.mxu1 %v6730_v18 }
  0x4c   :  { %5982 = vmatprep.subr.bf16.mxu1 %v6881_v1 }
  0xe4   :  { %v132_v19 = vpop.f32.mrb[0].mxu0 }
  0xe5   :  { %v5924_v20 = vpop.f32.mrb[1].mxu0  ;;  %v133_v35 = vadd.f32 %v7082_v27, %v132_v19 }
  0xe6   :  { %v135_v21 = vpop.f32.mrb[2].mxu0 }
  0xe7   :  { %v5925_v22 = vpop.f32.mrb[3].mxu0  ;;  %v138_v38 = vmax.f32 %v133_v35, 0.0  ;;  %v6745_v35 = vld [vmem:[%s8245_s6 + $0x68] sm:$0xff]  }
  0xe8   :  { %v6739_v22 = vld [vmem:[%s8244_s5 + $0x10] sm:$0xff]  }
  0xe9   :  { %v139_v40 = vpack.c.bf16 %v138_v38, %v138_v38 }
  0xf4   :  { %v7077_v23 = vpop.f32.mrb[4].mxu0 }
  0xf5   :  { %v5948_v24 = vpop.f32.mrb[5].mxu0 }
  0xf6   :  { %v249_v25 = vpop.f32.mrb[6].mxu0 }
  0xf7   :  { %v5949_v26 = vpop.f32.mrb[7].mxu0 }
  0xf8   :  { %v6740_v26 = vld [vmem:[%s8244_s5 + $0x18] sm:$0xff]  }
 0x104   :  { %v362_v28 = vpop.f32.mrb[8].mxu0 }
 0x105   :  { %v363_v29 = vadd.f32 %v7082_v27, %v362_v28  ;;  %v5972_v30 = vpop.f32.mrb[9].mxu0 }
 0x106   :  { %v365_v31 = vpop.f32.mrb[10].mxu0  ;;  %v6742_v30 = vld [vmem:[%s8245_s6 + $0x18] sm:$0xff]  }
 0x107   :  { %v368_v32 = vmax.f32 %v363_v29, 0.0  ;;  %v5973_v33 = vpop.f32.mrb[11].mxu0  ;;  %v6741_v29 = vld [vmem:[%s8245_s6 + $0x10] sm:$0xff]  }
 0x108   :  { %v5335_v31 = vld [vmem:[%s8239_s0 + $0x30] sm:$0xff]  ;;  %v6743_v33 = vld [vmem:[%s8245_s6 + $0x60] sm:$0xff]  }
 0x109   :  { %v369_v36 = vpack.c.bf16 %v368_v32, %v368_v32  ;;  %v188_v44 = vpop.f32.mrb[0].mxu1  ;;  %v869_v32 = vpack.c.bf16 %v5335_v31, %v5335_v31 }
 0x10a   :  { %v5936_v45 = vpop.f32.mrb[1].mxu1  ;;  %v189_v18 = vadd.f32 %v7082_v27, %v188_v44 }
 0x10b   :  { %5979 = vmatmul.mubr.msk.bf16.vlgmr.msra.gmra.mrb[8].mxu1 %vm387_vm2, %v369_v36  ;;  %5995 = vmatmul.mubr.msk.bf16.vlgmr.msra.gmra.mrb[12].mxu0 %vm387_vm2, %v369_v36  ;;  %v191_v46 = vpop.f32.mrb[2].mxu1  ;;  %v6746_v36 = vld [vmem:[%s8244_s5 + $0x68] sm:$0xff]  }
 0x10c   :  { %6007 = vmatpush3.bf16.msra.mxu0 %v6968_v0  ;;  %5983 = vmatpush3.bf16.msra.mxu1 %v6731_v34  ;;  %v5937_v47 = vpop.f32.mrb[3].mxu1  ;;  %v194_v25 = vmax.f32 %v189_v18, 0.0  ;;  %v6744_v34 = vld [vmem:[%s8244_s5 + $0x60] sm:$0xff]  }
 0x10d   :  { %6008 = vmatprep.subr.bf16.mxu0 %v6881_v1  ;;  %5984 = vmatprep.subr.bf16.mxu1 %v6881_v1 }
 0x10e   :  { %5986 = vmatprep.mubr.msk.bf16.mxu1 %vm6882_vm0, %v6881_v1  ;;  %6014 = vmatprep.mubr.msk.bf16.mxu0 %vm6882_vm0, %v6881_v1  ;;  %v195_v28 = vpack.c.bf16 %v194_v25, %v194_v25 }
 0x110   :  { %6009 = vmatpush3.bf16.msra.mxu0 %v6976_v2  ;;  %5985 = vmatpush3.bf16.msra.mxu1 %v6732_v37 }
 0x111   :  { %6010 = vmatprep.subr.bf16.mxu0 %v6881_v1  ;;  %5998 = vmatprep.subr.bf16.mxu1 %v6881_v1 }
 0x113   :  { %5987 = vmatmul.mubr.msk.bf16.vlgmr.msra.gmra.mrb[12].mxu1 %vm387_vm2, %v139_v40 }
 0x114   :  { %6011 = vmatpush3.bf16.msra.mxu0 %v6988_v3  ;;  %5999 = vmatpush3.bf16.msra.mxu1 %v6733_v39 }
 0x115   :  { %6012 = vmatprep.subr.bf16.mxu0 %v6881_v1  ;;  %6000 = vmatprep.subr.bf16.mxu1 %v6881_v1 }
 0x116   :  { %6002 = vmatprep.mubr.msk.bf16.mxu1 %vm6882_vm0, %v6881_v1 }
 0x118   :  { %6013 = vmatpush3.bf16.msra.mxu0 %v6996_v4  ;;  %6001 = vmatpush3.bf16.msra.mxu1 %v6734_v41 }
 0x119   :  { %6034 = vmatprep.subr.bf16.mxu0 %v6881_v1  ;;  %6018 = vmatprep.subr.bf16.mxu1 %v6881_v1  ;;  %v7128_v48 = vpop.f32.mrb[4].mxu1 }
 0x11a   :  { %v5960_v49 = vpop.f32.mrb[5].mxu1 }
 0x11b   :  { %6015 = vmatmul.mubr.msk.bf16.vlgmr.msra.gmra.mrb[16].mxu0 %vm94_vm1, %v597_v43  ;;  %6003 = vmatmul.mubr.msk.bf16.vlgmr.msra.gmra.mrb[16].mxu1 %vm387_vm2, %v139_v40  ;;  %v307_v50 = vpop.f32.mrb[6].mxu1 }
 0x11c   :  { %6022 = vmatprep.mubr.msk.bf16.mxu1 %vm6882_vm0, %v6881_v1  ;;  %6038 = vmatprep.mubr.msk.bf16.mxu0 %vm6882_vm0, %v6881_v1  ;;  %v5961_v51 = vpop.f32.mrb[7].mxu1 }
 0x11d   :  { %6035 = vmatpush3.bf16.msra.mxu0 %v6735_v52  ;;  %6019 = vmatpush3.bf16.msra.mxu1 %v6736_v53 }
 0x11e   :  { %6036 = vmatprep.subr.bf16.mxu0 %v6881_v1  ;;  %6020 = vmatprep.subr.bf16.mxu1 %v6881_v1 }
 0x121   :  { %6037 = vmatpush3.bf16.msra.mxu0 %v6737_v54  ;;  %6021 = vmatpush3.bf16.msra.mxu1 %v6738_v55 }
 0x122   :  { %6050 = vmatprep.subr.bf16.mxu0 %v6881_v1  ;;  %6026 = vmatprep.subr.bf16.mxu1 %v6881_v1 }
 0x1de   :  { %v425_v56 = vpop.f32.mrb[8].mxu1  ;;  %v537_v57 = vpop.f32.mrb[12].mxu0 }
 0x1df   :  { %v5980_v58 = vpop.f32.mrb[9].mxu1  ;;  %v5996_v59 = vpop.f32.mrb[13].mxu0 }
 0x1e0   :  { %v428_v60 = vpop.f32.mrb[10].mxu1  ;;  %v540_v61 = vpop.f32.mrb[14].mxu0 }
 0x1e1   :  { %v5981_v62 = vpop.f32.mrb[11].mxu1  ;;  %v5997_v63 = vpop.f32.mrb[15].mxu0 }
 0x1e2   :  { %v6747_v62 = vld [vmem:[%s8244_s5 + $0x20] sm:$0xff]   ;;  %v247_v63 = vadd.f32 %v7082_v27, %v7077_v23 }
 0x1e3   :  { %v6749_v23 = vld [vmem:[%s8245_s6 + $0x20] sm:$0xff]  }
 0x1e6   :  { %v480_v5 = vpop.f32.mrb[12].mxu1 }
 0x1e7   :  { %v7146_v6 = vadd.f32 %v480_v5, %v425_v56  ;;  %v5988_v7 = vpop.f32.mrb[13].mxu1 }
 0x1e8   :  { %v483_v8 = vpop.f32.mrb[14].mxu1  ;;  %v6748_v7 = vld [vmem:[%s8244_s5 + $0x28] sm:$0xff]  }
 0x1e9   :  { %v5989_v9 = vpop.f32.mrb[15].mxu1  ;;  %v252_v8 = vmax.f32 %v247_v63, 0.0  ;;  %v6832_v63 = vld [vmem:[%s8242_s3 + $0x18] sm:$0xff]  }
 0x1eb   :  { %v253_v9 = vpack.c.bf16 %v252_v8, %v252_v8  ;;  %v6759_v8 = vld [vmem:[%s8244_s5 + $0x80] sm:$0xff]  }
 0x1ee   :  { %v635_v10 = vpop.f32.mrb[16].mxu0  ;;  %v589_v11 = vpop.f32.mrb[16].mxu1 }
 0x1ef   :  { %v636_v12 = vadd.f32 %v7082_v27, %v635_v10  ;;  %v7149_v13 = vadd.f32 %v589_v11, %v537_v57  ;;  %v6016_v14 = vpop.f32.mrb[17].mxu0  ;;  %v6004_v15 = vpop.f32.mrb[17].mxu1  ;;  %v6750_v10 = vld [vmem:[%s8245_s6 + $0x28] sm:$0xff]   ;;  %v5357_v11 = vld [vmem:[%s8239_s0 + $0x38] sm:$0xff] }
 0x1f0   :  { %v638_v16 = vpop.f32.mrb[18].mxu0  ;;  %v592_v17 = vpop.f32.mrb[18].mxu1  ;;  %v6751_v14 = vld [vmem:[%s8245_s6 + $0x70] sm:$0xff]  }
 0x1f1   :  { %v641_v19 = vmax.f32 %v636_v12, 0.0  ;;  %v6017_v20 = vpop.f32.mrb[19].mxu0  ;;  %v6005_v21 = vpop.f32.mrb[19].mxu1  ;;  %v1141_v12 = vpack.c.bf16 %v5357_v11, %v5357_v11  ;;  %v6752_v15 = vld [vmem:[%s8244_s5 + $0x70] sm:$0xff]   ;;  %v6753_v16 = vld [vmem:[%s8245_s6 + $0x78] sm:$0xff]  }
 0x1f2   :  { %v6754_v17 = vld [vmem:[%s8244_s5 + $0x78] sm:$0xff]  }
 0x1f3   :  { %v642_v24 = vpack.c.bf16 %v641_v19, %v641_v19  ;;  %v5491_v11 = vld [vmem:[%s8239_s0 + $0x78] sm:$0xff] }
 0x1f5   :  { %6023 = vmatmul.mubr.msk.bf16.vlgmr.msra.gmra.mrb[20].mxu1 %vm387_vm2, %v642_v24  ;;  %6039 = vmatmul.mubr.msk.bf16.vlgmr.msra.gmra.mrb[20].mxu0 %vm387_vm2, %v642_v24 }
 0x1f6   :  { %6051 = vmatpush3.bf16.msra.mxu0 %v6968_v0  ;;  %6027 = vmatpush3.bf16.msra.mxu1 %v6739_v22 }
 0x1f7   :  { %6052 = vmatprep.subr.bf16.mxu0 %v6881_v1  ;;  %6028 = vmatprep.subr.bf16.mxu1 %v6881_v1 }
 0x1f8   :  { %6030 = vmatprep.mubr.msk.bf16.mxu1 %vm6882_vm0, %v6881_v1  ;;  %6058 = vmatprep.mubr.msk.bf16.mxu0 %vm6882_vm0, %v6881_v1 }
 0x1fa   :  { %6053 = vmatpush3.bf16.msra.mxu0 %v6976_v2  ;;  %6029 = vmatpush3.bf16.msra.mxu1 %v6740_v26 }
 0x1fb   :  { %6054 = vmatprep.subr.bf16.mxu0 %v6881_v1  ;;  %6042 = vmatprep.subr.bf16.mxu1 %v6881_v1 }
 0x1fd   :  { %6031 = vmatmul.mubr.msk.bf16.vlgmr.msra.gmra.mrb[24].mxu1 %vm387_vm2, %v195_v28 }
 0x1fe   :  { %6055 = vmatpush3.bf16.msra.mxu0 %v6988_v3  ;;  %6043 = vmatpush3.bf16.msra.mxu1 %v6741_v29 }
 0x1ff   :  { %6056 = vmatprep.subr.bf16.mxu0 %v6881_v1  ;;  %6044 = vmatprep.subr.bf16.mxu1 %v6881_v1 }
 0x200   :  { %6046 = vmatprep.mubr.msk.bf16.mxu1 %vm6882_vm0, %v6881_v1 }
 0x202   :  { %6057 = vmatpush3.bf16.msra.mxu0 %v6996_v4  ;;  %6045 = vmatpush3.bf16.msra.mxu1 %v6742_v30 }
 0x203   :  { %6078 = vmatprep.subr.bf16.mxu0 %v6881_v1  ;;  %6062 = vmatprep.subr.bf16.mxu1 %v6881_v1 }
 0x205   :  { %6059 = vmatmul.mubr.msk.bf16.vlgmr.msra.gmra.mrb[24].mxu0 %vm94_vm1, %v869_v32  ;;  %6047 = vmatmul.mubr.msk.bf16.vlgmr.msra.gmra.mrb[28].mxu1 %vm387_vm2, %v195_v28 }
 0x206   :  { %6066 = vmatprep.mubr.msk.bf16.mxu1 %vm6882_vm0, %v6881_v1  ;;  %6082 = vmatprep.mubr.msk.bf16.mxu0 %vm6882_vm0, %v6881_v1 }
 0x207   :  { %6079 = vmatpush3.bf16.msra.mxu0 %v6743_v33  ;;  %6063 = vmatpush3.bf16.msra.mxu1 %v6744_v34 }
 0x208   :  { %6080 = vmatprep.subr.bf16.mxu0 %v6881_v1  ;;  %6064 = vmatprep.subr.bf16.mxu1 %v6881_v1 }
 0x20b   :  { %6081 = vmatpush3.bf16.msra.mxu0 %v6745_v35  ;;  %6065 = vmatpush3.bf16.msra.mxu1 %v6746_v36 }
 0x20c   :  { %6094 = vmatprep.subr.bf16.mxu0 %v6881_v1  ;;  %6070 = vmatprep.subr.bf16.mxu1 %v6881_v1 }
 0x2c8   :  { %v697_v37 = vpop.f32.mrb[20].mxu1  ;;  %v809_v38 = vpop.f32.mrb[20].mxu0 }
 0x2c9   :  { %v6024_v39 = vpop.f32.mrb[21].mxu1  ;;  %v6040_v40 = vpop.f32.mrb[21].mxu0 }
 0x2ca   :  { %v700_v41 = vpop.f32.mrb[22].mxu1  ;;  %v812_v42 = vpop.f32.mrb[22].mxu0 }
 0x2cb   :  { %v6025_v43 = vpop.f32.mrb[23].mxu1  ;;  %v6041_v44 = vpop.f32.mrb[23].mxu0  ;;  %v305_v41 = vadd.f32 %v7082_v27, %v7128_v48  ;;  %v6756_v48 = vld [vmem:[%s8244_s5 + $0x38] sm:$0xff]  }
 0x2d0   :  { %v752_v45 = vpop.f32.mrb[24].mxu1 }
 0x2d1   :  { %v7210_v46 = vadd.f32 %v752_v45, %v697_v37  ;;  %v6032_v47 = vpop.f32.mrb[25].mxu1  ;;  %v6755_v45 = vld [vmem:[%s8244_s5 + $0x30] sm:$0xff]  }
 0x2d2   :  { %v755_v49 = vpop.f32.mrb[26].mxu1 }
 0x2d3   :  { %v6033_v50 = vpop.f32.mrb[27].mxu1  ;;  %v310_v49 = vmax.f32 %v305_v41, 0.0 }
 0x2d5   :  { %v311_v50 = vpack.c.bf16 %v310_v49, %v310_v49  ;;  %v6764_v49 = vld [vmem:[%s8244_s5 + $0x98] sm:$0xff]  }
 0x2d8   :  { %v907_v51 = vpop.f32.mrb[24].mxu0  ;;  %v861_v52 = vpop.f32.mrb[28].mxu1 }
 0x2d9   :  { %v908_v53 = vadd.f32 %v7082_v27, %v907_v51  ;;  %v7213_v54 = vadd.f32 %v861_v52, %v809_v38  ;;  %v6060_v55 = vpop.f32.mrb[25].mxu0  ;;  %v6048_v56 = vpop.f32.mrb[29].mxu1  ;;  %v6757_v51 = vld [vmem:[%s8245_s6 + $0x30] sm:$0xff]   ;;  %v6758_v52 = vld [vmem:[%s8245_s6 + $0x38] sm:$0xff]  }
 0x2da   :  { %v910_v57 = vpop.f32.mrb[26].mxu0  ;;  %v864_v58 = vpop.f32.mrb[30].mxu1  ;;  %v5395_v56 = vld [vmem:[%s8239_s0 + $0x48] sm:$0xff] }
 0x2db   :  { %v913_v59 = vmax.f32 %v908_v53, 0.0  ;;  %v6061_v60 = vpop.f32.mrb[27].mxu0  ;;  %v6049_v61 = vpop.f32.mrb[31].mxu1  ;;  %v5379_v53 = vld [vmem:[%s8239_s0 + $0x40] sm:$0xff]  ;;  %v5411_v58 = vld [vmem:[%s8239_s0 + $0x50] sm:$0xff] }
 0x2dc   :  { %v1413_v55 = vpack.c.bf16 %v5379_v53, %v5379_v53  ;;  %v7339_v57 = vld [vmem:[%s8242_s3] sm:$0xff]   ;;  %v5427_v60 = vld [vmem:[%s8239_s0 + $0x58] sm:$0xff] }
 0x2dd   :  { %v914_v5 = vpack.c.bf16 %v913_v59, %v913_v59  ;;  %v1747_v59 = vpack.c.bf16 %v5411_v58, %v5411_v58  ;;  %v1914_v61 = vpack.c.bf16 %v5427_v60, %v5427_v60 }
 0x2df   :  { %6067 = vmatmul.mubr.msk.bf16.vlgmr.msra.gmra.mrb[32].mxu1 %vm387_vm2, %v914_v5  ;;  %6083 = vmatmul.mubr.msk.bf16.vlgmr.msra.gmra.mrb[28].mxu0 %vm387_vm2, %v914_v5  ;;  %v5459_v5 = vld [vmem:[%s8239_s0 + $0x68] sm:$0xff] }
 0x2e0   :  { %6095 = vmatpush3.bf16.msra.mxu0 %v6968_v0  ;;  %6071 = vmatpush3.bf16.msra.mxu1 %v6747_v62  ;;  %v5443_v62 = vld [vmem:[%s8239_s0 + $0x60] sm:$0xff] }
 0x2e1   :  { %6096 = vmatprep.subr.bf16.mxu0 %v6881_v1  ;;  %6072 = vmatprep.subr.bf16.mxu1 %v6881_v1 }
 0x2e2   :  { %6074 = vmatprep.mubr.msk.bf16.mxu1 %vm6882_vm0, %v6881_v1  ;;  %6102 = vmatprep.mubr.msk.bf16.mxu0 %vm6882_vm0, %v6881_v1 }
 0x2e4   :  { %6097 = vmatpush3.bf16.msra.mxu0 %v6976_v2  ;;  %6073 = vmatpush3.bf16.msra.mxu1 %v6748_v7  ;;  %v2248_v7 = vpack.c.bf16 %v5459_v5, %v5459_v5  ;;  %v6770_v5 = vld [vmem:[%s8245_s6 + $0xa8] sm:$0xff]  }
 0x2e5   :  { %6098 = vmatprep.subr.bf16.mxu0 %v6881_v1  ;;  %6086 = vmatprep.subr.bf16.mxu1 %v6881_v1 }
 0x2e7   :  { %6075 = vmatmul.mubr.msk.bf16.vlgmr.msra.gmra.mrb[36].mxu1 %vm387_vm2, %v253_v9 }
 0x2e8   :  { %6099 = vmatpush3.bf16.msra.mxu0 %v6988_v3  ;;  %6087 = vmatpush3.bf16.msra.mxu1 %v6749_v23  ;;  %v6760_v23 = vld [vmem:[%s8244_s5 + $0x88] sm:$0xff]  }
 0x2e9   :  { %6100 = vmatprep.subr.bf16.mxu0 %v6881_v1  ;;  %6088 = vmatprep.subr.bf16.mxu1 %v6881_v1 }
 0x2ea   :  { %6090 = vmatprep.mubr.msk.bf16.mxu1 %vm6882_vm0, %v6881_v1 }
 0x2ec   :  { %6101 = vmatpush3.bf16.msra.mxu0 %v6996_v4  ;;  %6089 = vmatpush3.bf16.msra.mxu1 %v6750_v10 }
 0x2ed   :  { %6122 = vmatprep.subr.bf16.mxu0 %v6881_v1  ;;  %6106 = vmatprep.subr.bf16.mxu1 %v6881_v1 }
 0x2ef   :  { %6103 = vmatmul.mubr.msk.bf16.vlgmr.msra.gmra.mrb[32].mxu0 %vm94_vm1, %v1141_v12  ;;  %6091 = vmatmul.mubr.msk.bf16.vlgmr.msra.gmra.mrb[40].mxu1 %vm387_vm2, %v253_v9  ;;  %v5475_v9 = vld [vmem:[%s8239_s0 + $0x70] sm:$0xff]  ;;  %v2582_v12 = vpack.c.bf16 %v5491_v11, %v5491_v11 }
 0x2f0   :  { %6110 = vmatprep.mubr.msk.bf16.mxu1 %vm6882_vm0, %v6881_v1  ;;  %6126 = vmatprep.mubr.msk.bf16.mxu0 %vm6882_vm0, %v6881_v1  ;;  %v2415_v10 = vpack.c.bf16 %v5475_v9, %v5475_v9 }
 0x2f1   :  { %6123 = vmatpush3.bf16.msra.mxu0 %v6751_v14  ;;  %6107 = vmatpush3.bf16.msra.mxu1 %v6752_v15 }
 0x2f2   :  { %6124 = vmatprep.subr.bf16.mxu0 %v6881_v1  ;;  %6108 = vmatprep.subr.bf16.mxu1 %v6881_v1 }
 0x2f5   :  { %6125 = vmatpush3.bf16.msra.mxu0 %v6753_v16  ;;  %6109 = vmatpush3.bf16.msra.mxu1 %v6754_v17 }
 0x2f6   :  { %6138 = vmatprep.subr.bf16.mxu0 %v6881_v1  ;;  %6114 = vmatprep.subr.bf16.mxu1 %v6881_v1 }
 0x3b2   :  { %v969_v18 = vpop.f32.mrb[32].mxu1  ;;  %v1081_v19 = vpop.f32.mrb[28].mxu0 }
 0x3b3   :  { %v6068_v20 = vpop.f32.mrb[33].mxu1  ;;  %v6084_v21 = vpop.f32.mrb[29].mxu0 }
 0x3b4   :  { %v972_v22 = vpop.f32.mrb[34].mxu1  ;;  %v1084_v24 = vpop.f32.mrb[30].mxu0 }
 0x3b5   :  { %v6069_v25 = vpop.f32.mrb[35].mxu1  ;;  %v6085_v26 = vpop.f32.mrb[31].mxu0 }
 0x3ba   :  { %v1024_v28 = vpop.f32.mrb[36].mxu1 }
 0x3bb   :  { %v7275_v29 = vadd.f32 %v1024_v28, %v969_v18  ;;  %v6076_v30 = vpop.f32.mrb[37].mxu1 }
 0x3bc   :  { %v1027_v31 = vpop.f32.mrb[38].mxu1 }
 0x3bd   :  { %v6077_v32 = vpop.f32.mrb[39].mxu1 }
 0x3c2   :  { %v1179_v33 = vpop.f32.mrb[32].mxu0  ;;  %v1133_v34 = vpop.f32.mrb[40].mxu1 }
 0x3c3   :  { %v1180_v35 = vadd.f32 %v7082_v27, %v1179_v33  ;;  %v7278_v36 = vadd.f32 %v1133_v34, %v1081_v19  ;;  %v6104_v37 = vpop.f32.mrb[33].mxu0  ;;  %v6092_v38 = vpop.f32.mrb[41].mxu1 }
 0x3c4   :  { %v1182_v39 = vpop.f32.mrb[34].mxu0  ;;  %v1136_v40 = vpop.f32.mrb[42].mxu1 }
 0x3c5   :  { %v1185_v42 = vmax.f32 %v1180_v35, 0.0  ;;  %v6105_v43 = vpop.f32.mrb[35].mxu0  ;;  %v6093_v44 = vpop.f32.mrb[43].mxu1 }
 0x3c6   :  { %v6762_v44 = vld [vmem:[%s8245_s6 + $0x88] sm:$0xff]  }
 0x3c7   :  { %v1186_v47 = vpack.c.bf16 %v1185_v42, %v1185_v42  ;;  %v6761_v42 = vld [vmem:[%s8245_s6 + $0x80] sm:$0xff]  }
 0x3c9   :  { %6111 = vmatmul.mubr.msk.bf16.vlgmr.msra.gmra.mrb[44].mxu1 %vm387_vm2, %v1186_v47  ;;  %6127 = vmatmul.mubr.msk.bf16.vlgmr.msra.gmra.mrb[36].mxu0 %vm387_vm2, %v1186_v47 }
 0x3ca   :  { %6139 = vmatpush3.bf16.msra.mxu0 %v6968_v0  ;;  %6115 = vmatpush3.bf16.msra.mxu1 %v6755_v45  ;;  %v6763_v45 = vld [vmem:[%s8244_s5 + $0x90] sm:$0xff]  }
 0x3cb   :  { %6140 = vmatprep.subr.bf16.mxu0 %v6881_v1  ;;  %6116 = vmatprep.subr.bf16.mxu1 %v6881_v1 }
 0x3cc   :  { %6118 = vmatprep.mubr.msk.bf16.mxu1 %vm6882_vm0, %v6881_v1  ;;  %6146 = vmatprep.mubr.msk.bf16.mxu0 %vm6882_vm0, %v6881_v1 }
 0x3ce   :  { %6141 = vmatpush3.bf16.msra.mxu0 %v6976_v2  ;;  %6117 = vmatpush3.bf16.msra.mxu1 %v6756_v48 }
 0x3cf   :  { %6142 = vmatprep.subr.bf16.mxu0 %v6881_v1  ;;  %6130 = vmatprep.subr.bf16.mxu1 %v6881_v1 }
 0x3d1   :  { %6119 = vmatmul.mubr.msk.bf16.vlgmr.msra.gmra.mrb[48].mxu1 %vm387_vm2, %v311_v50 }
 0x3d2   :  { %6143 = vmatpush3.bf16.msra.mxu0 %v6988_v3  ;;  %6131 = vmatpush3.bf16.msra.mxu1 %v6757_v51 }
 0x3d3   :  { %6144 = vmatprep.subr.bf16.mxu0 %v6881_v1  ;;  %6132 = vmatprep.subr.bf16.mxu1 %v6881_v1 }
 0x3d4   :  { %6134 = vmatprep.mubr.msk.bf16.mxu1 %vm6882_vm0, %v6881_v1 }
 0x3d6   :  { %6145 = vmatpush3.bf16.msra.mxu0 %v6996_v4  ;;  %6133 = vmatpush3.bf16.msra.mxu1 %v6758_v52 }
 0x3d7   :  { %6166 = vmatprep.subr.bf16.mxu0 %v6881_v1  ;;  %6150 = vmatprep.subr.bf16.mxu1 %v6881_v1 }
 0x3d9   :  { %6147 = vmatmul.mubr.msk.bf16.vlgmr.msra.gmra.mrb[40].mxu0 %vm94_vm1, %v1413_v55  ;;  %6135 = vmatmul.mubr.msk.bf16.vlgmr.msra.gmra.mrb[52].mxu1 %vm387_vm2, %v311_v50  ;;  %v6765_v55 = vld [vmem:[%s8245_s6 + $0x90] sm:$0xff]  }
 0x3da   :  { %6167 = vmatpush3.bf16.msra.mxu0 %v6968_v0  ;;  %6174 = vmatprep.mubr.msk.bf16.mxu0 %vm6882_vm0, %v6881_v1  ;;  %v1580_v0 = vpack.c.bf16 %v5395_v56, %v5395_v56 }
 0x3db   :  { %6168 = vmatprep.subr.bf16.mxu0 %v6881_v1  ;;  %6154 = vmatprep.mubr.msk.bf16.mxu1 %vm6882_vm0, %v6881_v1 }
 0x3dc   :  { %6151 = vmatpush3.bf16.msra.mxu1 %v6759_v8 }
 0x3dd   :  { %6152 = vmatprep.subr.bf16.mxu1 %v6881_v1 }
 0x3de   :  { %6169 = vmatpush3.bf16.msra.mxu0 %v6976_v2 }
 0x3df   :  { %6170 = vmatprep.subr.bf16.mxu0 %v6881_v1 }
 0x3e0   :  { %6153 = vmatpush3.bf16.msra.mxu1 %v6760_v23  ;;  %v6772_v23 = vld [vmem:[%s8244_s5 + $0xb8] sm:$0xff]  }
 0x3e1   :  { %6158 = vmatprep.subr.bf16.mxu1 %v6881_v1 }
 0x3e2   :  { %6171 = vmatpush3.bf16.msra.mxu0 %v6988_v3 }
 0x3e3   :  { %6172 = vmatprep.subr.bf16.mxu0 %v6881_v1 }
 0x3e6   :  { %6173 = vmatpush3.bf16.msra.mxu0 %v6996_v4 }
 0x3e7   :  { %6194 = vmatprep.subr.bf16.mxu0 %v6881_v1 }
 0x3e9   :  { %6175 = vmatmul.mubr.msk.bf16.vlgmr.msra.gmra.mrb[44].mxu0 %vm94_vm1, %v1580_v0  ;;  %v6766_v0 = vld [vmem:[%s8245_s6 + $0x98] sm:$0xff]  }
 0x3ea   :  { %6195 = vmatpush3.bf16.msra.mxu0 %v7339_v57  ;;  %6202 = vmatprep.mubr.msk.bf16.mxu0 %vm6882_vm0, %v6881_v1 }
 0x3eb   :  { %6196 = vmatprep.subr.bf16.mxu0 %v6881_v1 }
 0x3ee   :  { %6197 = vmatpush3.bf16.msra.mxu0 %v6976_v2  ;;  %v6830_v2 = vld [vmem:[%s8242_s3 + $0x8] sm:$0xff]  }
 0x3ef   :  { %6198 = vmatprep.subr.bf16.mxu0 %v6881_v1 }
 0x3f2   :  { %6199 = vmatpush3.bf16.msra.mxu0 %v6988_v3  ;;  %v6831_v3 = vld [vmem:[%s8242_s3 + $0x10] sm:$0xff]  }
 0x3f3   :  { %6200 = vmatprep.subr.bf16.mxu0 %v6881_v1 }
 0x3f6   :  { %6201 = vmatpush3.bf16.msra.mxu0 %v6996_v4 }
 0x3f7   :  { %6222 = vmatprep.subr.bf16.mxu0 %v6881_v1 }
 0x3f9   :  { %6203 = vmatmul.mubr.msk.bf16.vlgmr.msra.gmra.mrb[48].mxu0 %vm94_vm1, %v1747_v59  ;;  %v6768_v59 = vld [vmem:[%s8244_s5 + $0xa8] sm:$0xff]  }
 0x3fa   :  { %6223 = vmatpush3.bf16.msra.mxu0 %v7339_v57  ;;  %6230 = vmatprep.mubr.msk.bf16.mxu0 %vm6882_vm0, %v6881_v1 }
 0x3fb   :  { %6224 = vmatprep.subr.bf16.mxu0 %v6881_v1 }
 0x3fe   :  { %6225 = vmatpush3.bf16.msra.mxu0 %v6830_v2 }
 0x3ff   :  { %6226 = vmatprep.subr.bf16.mxu0 %v6881_v1 }
 0x402   :  { %6227 = vmatpush3.bf16.msra.mxu0 %v6831_v3 }
 0x403   :  { %6228 = vmatprep.subr.bf16.mxu0 %v6881_v1 }
 0x406   :  { %6229 = vmatpush3.bf16.msra.mxu0 %v6996_v4  ;;  %v2081_v4 = vpack.c.bf16 %v5443_v62, %v5443_v62 }
 0x407   :  { %6250 = vmatprep.subr.bf16.mxu0 %v6881_v1 }
 0x409   :  { %6231 = vmatmul.mubr.msk.bf16.vlgmr.msra.gmra.mrb[52].mxu0 %vm94_vm1, %v1914_v61 }
 0x40a   :  { %6251 = vmatpush3.bf16.msra.mxu0 %v7339_v57  ;;  %6258 = vmatprep.mubr.msk.bf16.mxu0 %vm6882_vm0, %v6881_v1 }
 0x40b   :  { %6252 = vmatprep.subr.bf16.mxu0 %v6881_v1 }
 0x40e   :  { %6253 = vmatpush3.bf16.msra.mxu0 %v6830_v2 }
 0x40f   :  { %6254 = vmatprep.subr.bf16.mxu0 %v6881_v1 }
 0x412   :  { %6255 = vmatpush3.bf16.msra.mxu0 %v6831_v3 }
 0x413   :  { %6256 = vmatprep.subr.bf16.mxu0 %v6881_v1 }
 0x416   :  { %6257 = vmatpush3.bf16.msra.mxu0 %v6832_v63 }
 0x417   :  { %6278 = vmatprep.subr.bf16.mxu0 %v6881_v1 }
 0x419   :  { %6259 = vmatmul.mubr.msk.bf16.vlgmr.msra.gmra.mrb[56].mxu0 %vm94_vm1, %v2081_v4  ;;  %v6769_v4 = vld [vmem:[%s8245_s6 + $0xa0] sm:$0xff]  }
 0x41a   :  { %6279 = vmatpush3.bf16.msra.mxu0 %v7339_v57  ;;  %6286 = vmatprep.mubr.msk.bf16.mxu0 %vm6882_vm0, %v6881_v1 }
 0x41b   :  { %6280 = vmatprep.subr.bf16.mxu0 %v6881_v1 }
 0x41e   :  { %6281 = vmatpush3.bf16.msra.mxu0 %v6830_v2 }
 0x41f   :  { %6282 = vmatprep.subr.bf16.mxu0 %v6881_v1 }
 0x422   :  { %6283 = vmatpush3.bf16.msra.mxu0 %v6831_v3 }
 0x423   :  { %6284 = vmatprep.subr.bf16.mxu0 %v6881_v1 }
 0x426   :  { %6285 = vmatpush3.bf16.msra.mxu0 %v6832_v63 }
 0x427   :  { %6306 = vmatprep.subr.bf16.mxu0 %v6881_v1 }
 0x429   :  { %6287 = vmatmul.mubr.msk.bf16.vlgmr.msra.gmra.mrb[60].mxu0 %vm94_vm1, %v2248_v7  ;;  %v6771_v7 = vld [vmem:[%s8244_s5 + $0xb0] sm:$0xff]  }
 0x42a   :  { %6307 = vmatpush3.bf16.msra.mxu0 %v7339_v57  ;;  %6314 = vmatprep.mubr.msk.bf16.mxu0 %vm6882_vm0, %v6881_v1 }
 0x42b   :  { %6308 = vmatprep.subr.bf16.mxu0 %v6881_v1 }
 0x42e   :  { %6309 = vmatpush3.bf16.msra.mxu0 %v6830_v2 }
 0x42f   :  { %6310 = vmatprep.subr.bf16.mxu0 %v6881_v1 }
 0x432   :  { %6311 = vmatpush3.bf16.msra.mxu0 %v6831_v3 }
 0x433   :  { %6312 = vmatprep.subr.bf16.mxu0 %v6881_v1 }
 0x436   :  { %6313 = vmatpush3.bf16.msra.mxu0 %v6832_v63 }
 0x437   :  { %6334 = vmatprep.subr.bf16.mxu0 %v6881_v1 }
 0x439   :  { %6315 = vmatmul.mubr.msk.bf16.vlgmr.msra.gmra.mrb[64].mxu0 %vm94_vm1, %v2415_v10 }
 0x43a   :  { %6335 = vmatpush3.bf16.msra.mxu0 %v7339_v57  ;;  %6342 = vmatprep.mubr.msk.bf16.mxu0 %vm6882_vm0, %v6881_v1  ;;  %v6767_v57 = vld [vmem:[%s8244_s5 + $0xa0] sm:$0xff]  }
 0x43b   :  { %6336 = vmatprep.subr.bf16.mxu0 %v6881_v1 }
 0x43e   :  { %6337 = vmatpush3.bf16.msra.mxu0 %v6830_v2 }
 0x43f   :  { %6338 = vmatprep.subr.bf16.mxu0 %v6881_v1 }
 0x442   :  { %6339 = vmatpush3.bf16.msra.mxu0 %v6831_v3 }
 0x443   :  { %6340 = vmatprep.subr.bf16.mxu0 %v6881_v1 }
 0x446   :  { %6341 = vmatpush3.bf16.msra.mxu0 %v6832_v63 }
 0x447   :  { %6362 = vmatprep.subr.bf16.mxu0 %v6881_v1 }
 0x449   :  { %6343 = vmatmul.mubr.msk.bf16.vlgmr.msra.gmra.mrb[68].mxu0 %vm94_vm1, %v2582_v12 }
 0x44a   :  { %6364 = vmatprep.mubr.msk.bf16.mxu0 %vm6882_vm0, %v6881_v1 }
 0x49c   :  { %v1241_v14 = vpop.f32.mrb[44].mxu1  ;;  %v1353_v15 = vpop.f32.mrb[36].mxu0 }
 0x49d   :  { %v6112_v16 = vpop.f32.mrb[45].mxu1  ;;  %v6128_v17 = vpop.f32.mrb[37].mxu0 }
 0x49e   :  { %v1244_v18 = vpop.f32.mrb[46].mxu1  ;;  %v1356_v19 = vpop.f32.mrb[38].mxu0  ;;  %v6774_v17 = vld [vmem:[%s8245_s6 + $0xb8] sm:$0xff]  }
 0x49f   :  { %v6113_v20 = vpop.f32.mrb[47].mxu1  ;;  %v6129_v21 = vpop.f32.mrb[39].mxu0  ;;  %v6775_v18 = vld [vmem:[%s8244_s5 + $0xc0] sm:$0xff]  }
 0x4a0   :  { %v6776_v20 = vld [vmem:[%s8244_s5 + $0xc8] sm:$0xff]  }
 0x4a4   :  { %v1296_v22 = vpop.f32.mrb[48].mxu1 }
 0x4a5   :  { %v7430_v24 = vadd.f32 %v1296_v22, %v1241_v14  ;;  %v6120_v25 = vpop.f32.mrb[49].mxu1 }
 0x4a6   :  { %v1299_v26 = vpop.f32.mrb[50].mxu1 }
 0x4a7   :  { %v6121_v28 = vpop.f32.mrb[51].mxu1 }
 0x4ac   :  { %v1451_v30 = vpop.f32.mrb[40].mxu0  ;;  %v1405_v31 = vpop.f32.mrb[52].mxu1 }
 0x4ad   :  { %v1452_v32 = vadd.f32 %v7082_v27, %v1451_v30  ;;  %v7433_v33 = vadd.f32 %v1405_v31, %v1353_v15  ;;  %v6148_v34 = vpop.f32.mrb[41].mxu0  ;;  %v6136_v35 = vpop.f32.mrb[53].mxu1  ;;  %v6773_v15 = vld [vmem:[%s8245_s6 + $0xb0] sm:$0xff]   ;;  %v6777_v30 = vld [vmem:[%s8245_s6 + $0xc0] sm:$0xff]  }
 0x4ae   :  { %v1454_v37 = vpop.f32.mrb[42].mxu0  ;;  %v1408_v38 = vpop.f32.mrb[54].mxu1  ;;  %v6779_v34 = vld [vmem:[%s8244_s5 + $0xd0] sm:$0xff]  }
 0x4af   :  { %v1457_v39 = vmax.f32 %v1452_v32, 0.0  ;;  %v6149_v40 = vpop.f32.mrb[43].mxu0  ;;  %v6137_v41 = vpop.f32.mrb[55].mxu1  ;;  %v6778_v32 = vld [vmem:[%s8245_s6 + $0xc8] sm:$0xff]   ;;  %v6780_v37 = vld [vmem:[%s8244_s5 + $0xd8] sm:$0xff]  }
 0x4b1   :  { %v1458_v43 = vpack.c.bf16 %v1457_v39, %v1457_v39 }
 0x4b3   :  { %6155 = vmatmul.mubr.msk.bf16.vlgmr.msra.gmra.mrb[56].mxu1 %vm387_vm2, %v1458_v43 }
 0x4b4   :  { %6159 = vmatpush3.bf16.msra.mxu1 %v6761_v42  ;;  %6162 = vmatprep.mubr.msk.bf16.mxu1 %vm6882_vm0, %v6881_v1 }
 0x4b5   :  { %6160 = vmatprep.subr.bf16.mxu1 %v6881_v1 }
 0x4b8   :  { %6161 = vmatpush3.bf16.msra.mxu1 %v6762_v44 }
 0x4b9   :  { %6178 = vmatprep.subr.bf16.mxu1 %v6881_v1 }
 0x4bb   :  { %6163 = vmatmul.mubr.msk.bf16.vlgmr.msra.gmra.mrb[60].mxu1 %vm387_vm2, %v1458_v43  ;;  %v6781_v43 = vld [vmem:[%s8245_s6 + $0xd0] sm:$0xff]  }
 0x4bc   :  { %6179 = vmatpush3.bf16.msra.mxu1 %v6763_v45  ;;  %v1618_v47 = vpop.f32.mrb[44].mxu0  ;;  %6182 = vmatprep.mubr.msk.bf16.mxu1 %vm6882_vm0, %v6881_v1  ;;  %v6783_v45 = vld [vmem:[%s8244_s5 + $0xe0] sm:$0xff]  }
 0x4bd   :  { %v1619_v48 = vadd.f32 %v7082_v27, %v1618_v47  ;;  %v6176_v50 = vpop.f32.mrb[45].mxu0  ;;  %6180 = vmatprep.subr.bf16.mxu1 %v6881_v1 }
 0x4be   :  { %v1621_v51 = vpop.f32.mrb[46].mxu0 }
 0x4bf   :  { %v1624_v52 = vmax.f32 %v1619_v48, 0.0  ;;  %v6177_v53 = vpop.f32.mrb[47].mxu0  ;;  %v6833_v48 = vld [vmem:[%s8243_s4] ss:$0 sm:$0xff] }
 0x4c0   :  { %6181 = vmatpush3.bf16.msra.mxu1 %v6764_v49  ;;  %v6784_v49 = vld [vmem:[%s8244_s5 + $0xe8] sm:$0xff]  }
 0x4c1   :  { %v1625_v56 = vpack.c.bf16 %v1624_v52, %v1624_v52  ;;  %6186 = vmatprep.subr.bf16.mxu1 %v6881_v1 }
 0x4c3   :  { %6183 = vmatmul.mubr.msk.bf16.vlgmr.msra.gmra.mrb[64].mxu1 %vm387_vm2, %v1625_v56 }
 0x4c4   :  { %6187 = vmatpush3.bf16.msra.mxu1 %v6765_v55  ;;  %6190 = vmatprep.mubr.msk.bf16.mxu1 %vm6882_vm0, %v6881_v1 }
 0x4c5   :  { %6188 = vmatprep.subr.bf16.mxu1 %v6881_v1 }
 0x4c8   :  { %6189 = vmatpush3.bf16.msra.mxu1 %v6766_v0 }
 0x4c9   :  { %6206 = vmatprep.subr.bf16.mxu1 %v6881_v1 }
 0x4cb   :  { %6191 = vmatmul.mubr.msk.bf16.vlgmr.msra.gmra.mrb[68].mxu1 %vm387_vm2, %v1625_v56  ;;  %v6785_v56 = vld [vmem:[%s8245_s6 + $0xe0] sm:$0xff]  }
 0x4cc   :  { %6207 = vmatpush3.bf16.msra.mxu1 %v6767_v57  ;;  %v1785_v58 = vpop.f32.mrb[48].mxu0  ;;  %6210 = vmatprep.mubr.msk.bf16.mxu1 %vm6882_vm0, %v6881_v1  ;;  %v6786_v57 = vld [vmem:[%s8245_s6 + $0xe8] sm:$0xff]  }
 0x4cd   :  { %v1786_v2 = vadd.f32 %v7082_v27, %v1785_v58  ;;  %v6204_v3 = vpop.f32.mrb[49].mxu0  ;;  %6208 = vmatprep.subr.bf16.mxu1 %v6881_v1  ;;  %v6787_v58 = vld [vmem:[%s8244_s5 + $0xf0] sm:$0xff]  }
 0x4ce   :  { %v1788_v60 = vpop.f32.mrb[50].mxu0 }
 0x4cf   :  { %v1791_v61 = vmax.f32 %v1786_v2, 0.0  ;;  %v6205_v62 = vpop.f32.mrb[51].mxu0  ;;  %v6788_v2 = vld [vmem:[%s8244_s5 + $0xf8] sm:$0xff]  }
 0x4d0   :  { %6209 = vmatpush3.bf16.msra.mxu1 %v6768_v59 }
 0x4d1   :  { %v1792_v63 = vpack.c.bf16 %v1791_v61, %v1791_v61  ;;  %6214 = vmatprep.subr.bf16.mxu1 %v6881_v1 }
 0x4d3   :  { %6211 = vmatmul.mubr.msk.bf16.vlgmr.msra.gmra.mrb[72].mxu1 %vm387_vm2, %v1792_v63 }
 0x4d4   :  { %6215 = vmatpush3.bf16.msra.mxu1 %v6769_v4  ;;  %6218 = vmatprep.mubr.msk.bf16.mxu1 %vm6882_vm0, %v6881_v1 }
 0x4d5   :  { %6216 = vmatprep.subr.bf16.mxu1 %v6881_v1 }
 0x4d8   :  { %6217 = vmatpush3.bf16.msra.mxu1 %v6770_v5 }
 0x4d9   :  { %6234 = vmatprep.subr.bf16.mxu1 %v6881_v1 }
 0x4db   :  { %6219 = vmatmul.mubr.msk.bf16.vlgmr.msra.gmra.mrb[76].mxu1 %vm387_vm2, %v1792_v63  ;;  %v6789_v63 = vld [vmem:[%s8245_s6 + $0xf0] sm:$0xff]  }
 0x4dc   :  { %6235 = vmatpush3.bf16.msra.mxu1 %v6771_v7  ;;  %v1952_v8 = vpop.f32.mrb[52].mxu0  ;;  %6238 = vmatprep.mubr.msk.bf16.mxu1 %vm6882_vm0, %v6881_v1  ;;  %v6790_v7 = vld [vmem:[%s8245_s6 + $0xf8] sm:$0xff]  }
 0x4dd   :  { %v1953_v9 = vadd.f32 %v7082_v27, %v1952_v8  ;;  %v6232_v10 = vpop.f32.mrb[53].mxu0  ;;  %6236 = vmatprep.subr.bf16.mxu1 %v6881_v1 }
 0x4de   :  { %v1955_v11 = vpop.f32.mrb[54].mxu0 }
 0x4df   :  { %v1958_v12 = vmax.f32 %v1953_v9, 0.0  ;;  %v6233_v14 = vpop.f32.mrb[55].mxu0 }
 0x4e0   :  { %6237 = vmatpush3.bf16.msra.mxu1 %v6772_v23 }
 0x4e1   :  { %v1959_v16 = vpack.c.bf16 %v1958_v12, %v1958_v12  ;;  %6242 = vmatprep.subr.bf16.mxu1 %v6881_v1 }
 0x4e3   :  { %6239 = vmatmul.mubr.msk.bf16.vlgmr.msra.gmra.mrb[80].mxu1 %vm387_vm2, %v1959_v16 }
 0x4e4   :  { %6243 = vmatpush3.bf16.msra.mxu1 %v6773_v15  ;;  %6246 = vmatprep.mubr.msk.bf16.mxu1 %vm6882_vm0, %v6881_v1 }
 0x4e5   :  { %6244 = vmatprep.subr.bf16.mxu1 %v6881_v1 }
 0x4e8   :  { %6245 = vmatpush3.bf16.msra.mxu1 %v6774_v17 }
 0x4e9   :  { %6262 = vmatprep.subr.bf16.mxu1 %v6881_v1 }
 0x4eb   :  { %6247 = vmatmul.mubr.msk.bf16.vlgmr.msra.gmra.mrb[84].mxu1 %vm387_vm2, %v1959_v16 }
 0x4ec   :  { %6263 = vmatpush3.bf16.msra.mxu1 %v6775_v18  ;;  %v2119_v19 = vpop.f32.mrb[56].mxu0  ;;  %6266 = vmatprep.mubr.msk.bf16.mxu1 %vm6882_vm0, %v6881_v1  ;;  %v2809_v18 = vld [vmem:[%s8248_s9] sm:$0xf] }
 0x4ed   :  { %v2120_v21 = vadd.f32 %v7082_v27, %v2119_v19  ;;  %v6260_v22 = vpop.f32.mrb[57].mxu0  ;;  %6264 = vmatprep.subr.bf16.mxu1 %v6881_v1  ;;  %v2822_v19 = vsel %vm2820_vm3, %v2809_v18, 0 }
 0x4ee   :  { %v2122_v25 = vpop.f32.mrb[58].mxu0  ;;  %6363 = vmatpush3.bf16.msra.mxu0 %v2822_v19 }
 0x4ef   :  { %v2125_v26 = vmax.f32 %v2120_v21, 0.0  ;;  %v6261_v28 = vpop.f32.mrb[59].mxu0  ;;  %6376 = vmatprep.subr.bf16.mxu0 %v6881_v1 }
 0x4f0   :  { %6265 = vmatpush3.bf16.msra.mxu1 %v6776_v20 }
 0x4f1   :  { %v2126_v31 = vpack.c.bf16 %v2125_v26, %v2125_v26  ;;  %6270 = vmatprep.subr.bf16.mxu1 %v6881_v1 }
 0x4f3   :  { %6267 = vmatmul.mubr.msk.bf16.vlgmr.msra.gmra.mrb[88].mxu1 %vm387_vm2, %v2126_v31 }
 0x4f4   :  { %6271 = vmatpush3.bf16.msra.mxu1 %v6777_v30  ;;  %6274 = vmatprep.mubr.msk.bf16.mxu1 %vm6882_vm0, %v6881_v1 }
 0x4f5   :  { %6272 = vmatprep.subr.bf16.mxu1 %v6881_v1 }
 0x4f8   :  { %6273 = vmatpush3.bf16.msra.mxu1 %v6778_v32 }
 0x4f9   :  { %6290 = vmatprep.subr.bf16.mxu1 %v6881_v1 }
 0x4fb   :  { %6275 = vmatmul.mubr.msk.bf16.vlgmr.msra.gmra.mrb[92].mxu1 %vm387_vm2, %v2126_v31 }
 0x4fc   :  { %6291 = vmatpush3.bf16.msra.mxu1 %v6779_v34  ;;  %v2286_v35 = vpop.f32.mrb[60].mxu0  ;;  %6294 = vmatprep.mubr.msk.bf16.mxu1 %vm6882_vm0, %v6881_v1 }
 0x4fd   :  { %v2287_v38 = vadd.f32 %v7082_v27, %v2286_v35  ;;  %v6288_v39 = vpop.f32.mrb[61].mxu0  ;;  %6292 = vmatprep.subr.bf16.mxu1 %v6881_v1  ;;  %v6782_v27 = vld [vmem:[%s8245_s6 + $0xd8] sm:$0xff]  }
 0x4fe   :  { %v2289_v40 = vpop.f32.mrb[62].mxu0 }
 0x4ff   :  { %v2292_v41 = vmax.f32 %v2287_v38, 0.0  ;;  %v6289_v42 = vpop.f32.mrb[63].mxu0 }
 0x500   :  { %6293 = vmatpush3.bf16.msra.mxu1 %v6780_v37 }
 0x501   :  { %v2293_v44 = vpack.c.bf16 %v2292_v41, %v2292_v41  ;;  %6298 = vmatprep.subr.bf16.mxu1 %v6881_v1 }
 0x503   :  { %6295 = vmatmul.mubr.msk.bf16.vlgmr.msra.gmra.mrb[96].mxu1 %vm387_vm2, %v2293_v44 }
 0x504   :  { %6299 = vmatpush3.bf16.msra.mxu1 %v6781_v43  ;;  %6302 = vmatprep.mubr.msk.bf16.mxu1 %vm6882_vm0, %v6881_v1 }
 0x505   :  { %6300 = vmatprep.subr.bf16.mxu1 %v6881_v1 }
 0x508   :  { %6301 = vmatpush3.bf16.msra.mxu1 %v6782_v27 }
 0x509   :  { %6318 = vmatprep.subr.bf16.mxu1 %v6881_v1 }
 0x50b   :  { %6303 = vmatmul.mubr.msk.bf16.vlgmr.msra.gmra.mrb[100].mxu1 %vm387_vm2, %v2293_v44 }
 0x50c   :  { %6319 = vmatpush3.bf16.msra.mxu1 %v6783_v45  ;;  %v2453_v47 = vpop.f32.mrb[64].mxu0  ;;  %6322 = vmatprep.mubr.msk.bf16.mxu1 %vm6882_vm0, %v6881_v1 }
 0x50d   :  { %v2454_v50 = vadd.f32 %v6833_v48, %v2453_v47  ;;  %v6316_v51 = vpop.f32.mrb[65].mxu0  ;;  %6320 = vmatprep.subr.bf16.mxu1 %v6881_v1 }
 0x50e   :  { %v2456_v52 = vpop.f32.mrb[66].mxu0 }
 0x50f   :  { %v2459_v53 = vmax.f32 %v2454_v50, 0.0  ;;  %v6317_v55 = vpop.f32.mrb[67].mxu0 }
 0x510   :  { %6321 = vmatpush3.bf16.msra.mxu1 %v6784_v49 }
 0x511   :  { %v2460_v0 = vpack.c.bf16 %v2459_v53, %v2459_v53  ;;  %6326 = vmatprep.subr.bf16.mxu1 %v6881_v1 }
 0x513   :  { %6323 = vmatmul.mubr.msk.bf16.vlgmr.msra.gmra.mrb[104].mxu1 %vm387_vm2, %v2460_v0 }
 0x514   :  { %6327 = vmatpush3.bf16.msra.mxu1 %v6785_v56  ;;  %6330 = vmatprep.mubr.msk.bf16.mxu1 %vm6882_vm0, %v6881_v1 }
 0x515   :  { %6328 = vmatprep.subr.bf16.mxu1 %v6881_v1 }
 0x518   :  { %6329 = vmatpush3.bf16.msra.mxu1 %v6786_v57 }
 0x519   :  { %6346 = vmatprep.subr.bf16.mxu1 %v6881_v1 }
 0x51b   :  { %6331 = vmatmul.mubr.msk.bf16.vlgmr.msra.gmra.mrb[108].mxu1 %vm387_vm2, %v2460_v0 }
 0x51c   :  { %6347 = vmatpush3.bf16.msra.mxu1 %v6787_v58  ;;  %v2620_v59 = vpop.f32.mrb[68].mxu0  ;;  %6350 = vmatprep.mubr.msk.bf16.mxu1 %vm6882_vm0, %v6881_v1 }
 0x51d   :  { %v2621_v3 = vadd.f32 %v6833_v48, %v2620_v59  ;;  %v6344_v60 = vpop.f32.mrb[69].mxu0  ;;  %6348 = vmatprep.subr.bf16.mxu1 %v6881_v1 }
 0x51e   :  { %v2623_v61 = vpop.f32.mrb[70].mxu0 }
 0x51f   :  { %v2626_v62 = vmax.f32 %v2621_v3, 0.0  ;;  %v6345_v4 = vpop.f32.mrb[71].mxu0 }
 0x520   :  { %6349 = vmatpush3.bf16.msra.mxu1 %v6788_v2 }
 0x521   :  { %v2627_v5 = vpack.c.bf16 %v2626_v62, %v2626_v62  ;;  %6354 = vmatprep.subr.bf16.mxu1 %v6881_v1 }
 0x523   :  { %6351 = vmatmul.mubr.msk.bf16.vlgmr.msra.gmra.mrb[112].mxu1 %vm387_vm2, %v2627_v5 }
 0x524   :  { %6355 = vmatpush3.bf16.msra.mxu1 %v6789_v63  ;;  %6358 = vmatprep.mubr.msk.bf16.mxu1 %vm6882_vm0, %v6881_v1 }
 0x525   :  { %6356 = vmatprep.subr.bf16.mxu1 %v6881_v1 }
 0x528   :  { %6357 = vmatpush3.bf16.msra.mxu1 %v6790_v7 }
 0x529   :  { %6368 = vmatprep.subr.bf16.mxu1 %v6881_v1 }
 0x52b   :  { %6359 = vmatmul.mubr.msk.bf16.vlgmr.msra.gmra.mrb[116].mxu1 %vm387_vm2, %v2627_v5 }
 0x52c   :  { %6372 = vmatprep.mubr.msk.bf16.mxu1 %vm6882_vm0, %v6881_v1 }
 0x586   :  { %v1513_v8 = vpop.f32.mrb[56].mxu1 }
 0x587   :  { %v1519_v23 = vadd.f32 %v1513_v8, %v7146_v6  ;;  %v6156_v9 = vpop.f32.mrb[57].mxu1 }
 0x588   :  { %v1516_v10 = vpop.f32.mrb[58].mxu1 }
 0x589   :  { %v6157_v11 = vpop.f32.mrb[59].mxu1 }
 0x58e   :  { %v1571_v12 = vpop.f32.mrb[60].mxu1 }
 0x58f   :  { %v1577_v14 = vadd.f32 %v1571_v12, %v7149_v13  ;;  %v6164_v15 = vpop.f32.mrb[61].mxu1 }
 0x590   :  { %v1574_v16 = vpop.f32.mrb[62].mxu1 }
 0x591   :  { %v6165_v17 = vpop.f32.mrb[63].mxu1 }
 0x596   :  { %v1680_v20 = vpop.f32.mrb[64].mxu1 }
 0x597   :  { %v1686_v6 = vadd.f32 %v1680_v20, %v7210_v46  ;;  %v6184_v21 = vpop.f32.mrb[65].mxu1 }
 0x598   :  { %v1683_v22 = vpop.f32.mrb[66].mxu1 }
 0x599   :  { %v6185_v25 = vpop.f32.mrb[67].mxu1 }
 0x59e   :  { %v1738_v13 = vpop.f32.mrb[68].mxu1 }
 0x59f   :  { %v1744_v26 = vadd.f32 %v1738_v13, %v7213_v54  ;;  %v6192_v28 = vpop.f32.mrb[69].mxu1 }
 0x5a0   :  { %v1741_v30 = vpop.f32.mrb[70].mxu1 }
 0x5a1   :  { %v6193_v31 = vpop.f32.mrb[71].mxu1 }
 0x5a6   :  { %v1847_v32 = vpop.f32.mrb[72].mxu1 }
 0x5a7   :  { %v1853_v34 = vadd.f32 %v1847_v32, %v7275_v29  ;;  %v6212_v35 = vpop.f32.mrb[73].mxu1  ;;  %v5508_v32 = vld [vmem:[%s8247_s8] ss:$0 sm:$0xff] }
 0x5a8   :  { %v1850_v37 = vpop.f32.mrb[74].mxu1 }
 0x5a9   :  { %v6213_v38 = vpop.f32.mrb[75].mxu1 }
 0x5ae   :  { %v1905_v39 = vpop.f32.mrb[76].mxu1 }
 0x5af   :  { %v1911_v40 = vadd.f32 %v1905_v39, %v7278_v36  ;;  %v6220_v41 = vpop.f32.mrb[77].mxu1 }
 0x5b0   :  { %v1908_v46 = vpop.f32.mrb[78].mxu1 }
 0x5b1   :  { %v6221_v42 = vpop.f32.mrb[79].mxu1  ;;  %v2773_v46 = vld [vmem:[%s8240_s1] sm:$0xff] }
 0x5b6   :  { %v2014_v43 = vpop.f32.mrb[80].mxu1 }
 0x5b7   :  { %v2020_v44 = vadd.f32 %v2014_v43, %v7430_v24  ;;  %v6240_v27 = vpop.f32.mrb[81].mxu1 }
 0x5b8   :  { %v2017_v54 = vpop.f32.mrb[82].mxu1 }
 0x5b9   :  { %v6241_v45 = vpop.f32.mrb[83].mxu1 }
 0x5be   :  { %v2072_v47 = vpop.f32.mrb[84].mxu1 }
 0x5bf   :  { %v2078_v49 = vadd.f32 %v2072_v47, %v7433_v33  ;;  %v6248_v48 = vpop.f32.mrb[85].mxu1 }
 0x5c0   :  { %v2075_v29 = vpop.f32.mrb[86].mxu1 }
 0x5c1   :  { %v6249_v50 = vpop.f32.mrb[87].mxu1 }
 0x5c6   :  { %v2181_v51 = vpop.f32.mrb[88].mxu1 }
 0x5c7   :  { %v2187_v52 = vadd.f32 %v2181_v51, %v1519_v23  ;;  %v6268_v53 = vpop.f32.mrb[89].mxu1  ;;  %v7643_v51 = vld [vmem:[%s8250_s11] sm:$0xff]  }
 0x5c8   :  { %v2184_v55 = vpop.f32.mrb[90].mxu1  ;;  %6369 = vmatpush3.bf16.msra.mxu1 %v7643_v51  ;;  %v7657_v53 = vld [vmem:[%s8250_s11 + $0x8] sm:$0xff]  }
 0x5c9   :  { %v6269_v36 = vpop.f32.mrb[91].mxu1  ;;  %6370 = vmatprep.subr.bf16.mxu1 %v6881_v1  ;;  %v7662_v55 = vld [vmem:[%s8251_s12 + $0x8] sm:$0xff]  }
 0x5ca   :  { %v52_v36 = vld [vmem:[%s8241_s2] sm:$0xff] }
 0x5cc   :  { %6371 = vmatpush3.bf16.msra.mxu1 %v7657_v53 }
 0x5cd   :  { %6384 = vmatprep.subr.bf16.mxu1 %v6881_v1 }
 0x5ce   :  { %v2239_v56 = vpop.f32.mrb[92].mxu1 }
 0x5cf   :  { %v2245_v0 = vadd.f32 %v2239_v56, %v1577_v14  ;;  %v6276_v57 = vpop.f32.mrb[93].mxu1 }
 0x5d0   :  { %v2242_v58 = vpop.f32.mrb[94].mxu1 }
 0x5d1   :  { %v6277_v59 = vpop.f32.mrb[95].mxu1  ;;  %v5510_v58 = vld [vmem:[%s8249_s10] ss:$0 sm:$0xff] }
 0x5d6   :  { %v2348_v24 = vpop.f32.mrb[96].mxu1 }
 0x5d7   :  { %v2354_v2 = vadd.f32 %v2348_v24, %v1686_v6  ;;  %v6296_v3 = vpop.f32.mrb[97].mxu1 }
 0x5d8   :  { %v2351_v60 = vpop.f32.mrb[98].mxu1 }
 0x5d9   :  { %v2748_v61 = vadd.f32 %v2354_v2, %v2187_v52  ;;  %v6297_v62 = vpop.f32.mrb[99].mxu1  ;;  %v7650_v52 = vld [vmem:[%s8251_s12] sm:$0xff]  }
 0x5da   :  { %v5520_v60 = vld [vmem:[%s8248_s9 + $0x4] sm:$0xf] }
 0x5de   :  { %v2406_v33 = vpop.f32.mrb[100].mxu1 }
 0x5df   :  { %v2412_v4 = vadd.f32 %v2406_v33, %v1744_v26  ;;  %v6304_v63 = vpop.f32.mrb[101].mxu1 }
 0x5e0   :  { %v2409_v5 = vpop.f32.mrb[102].mxu1 }
 0x5e1   :  { %v2760_v7 = vadd.f32 %v2412_v4, %v2245_v0  ;;  %v6305_v8 = vpop.f32.mrb[103].mxu1  ;;  %v3006_v4 = vsel %vm2820_vm3, %v5520_v60, 0 }
 0x5e6   :  { %v2515_v23 = vpop.f32.mrb[104].mxu1 }
 0x5e7   :  { %v2521_v9 = vadd.f32 %v2515_v23, %v1853_v34  ;;  %v6324_v10 = vpop.f32.mrb[105].mxu1 }
 0x5e8   :  { %v2518_v11 = vpop.f32.mrb[106].mxu1 }
 0x5e9   :  { %v2749_v12 = vadd.f32 %v2748_v61, %v2521_v9  ;;  %v6325_v14 = vpop.f32.mrb[107].mxu1  ;;  %v7700_v11 = vld [vmem:[%s8253_s14] ss:$0 sm:$0xff] }
 0x5ee   :  { %v2573_v15 = vpop.f32.mrb[108].mxu1 }
 0x5ef   :  { %v2579_v16 = vadd.f32 %v2573_v15, %v1911_v40  ;;  %v6332_v17 = vpop.f32.mrb[109].mxu1  ;;  %v5507_v40 = vld [vmem:[%s8246_s7] ss:$0 sm:$0xff] }
 0x5f0   :  { %v2576_v18 = vpop.f32.mrb[110].mxu1 }
 0x5f1   :  { %v2761_v19 = vadd.f32 %v2760_v7, %v2579_v16  ;;  %v6333_v20 = vpop.f32.mrb[111].mxu1 }
 0x5f6   :  { %v2682_v6 = vpop.f32.mrb[112].mxu1 }
 0x5f7   :  { %v2688_v21 = vadd.f32 %v2682_v6, %v2020_v44  ;;  %v6352_v22 = vpop.f32.mrb[113].mxu1 }
 0x5f8   :  { %v2685_v25 = vpop.f32.mrb[114].mxu1 }
 0x5f9   :  { %v2750_v13 = vadd.f32 %v2749_v12, %v2688_v21  ;;  %v6353_v26 = vpop.f32.mrb[115].mxu1  ;;  %v5522_v25 = vld [vmem:[%s8249_s10 + $0x1] ss:$0 sm:$0xff] }
 0x5fa   :  { %v7709_v26 = vld [vmem:[%s8252_s13] ss:$0 sm:$0xff] }
 0x5fb   :  { %v2758_v41 = vadd.f32 %v5507_v40, %v2750_v13  ;;  %v6834_v40 = vld [vmem:[%s8239_s0] sm:$0xff] }
 0x5fd   :  { %v2776_v43 = vmul.f32 %v2758_v41, %v2758_v41 }
 0x5fe   :  { %v2740_v28 = vpop.f32.mrb[116].mxu1 }
 0x5ff   :  { %v2746_v30 = vadd.f32 %v2740_v28, %v2078_v49  ;;  %v6360_v31 = vpop.f32.mrb[117].mxu1 }
 0x600   :  { %v2743_v34 = vpop.f32.mrb[118].mxu1 }
 0x601   :  { %v2762_v35 = vadd.f32 %v2761_v19, %v2746_v30  ;;  %v6361_v37 = vpop.f32.mrb[119].mxu1 }
 0x603   :  { %v2770_v38 = vadd.f32 %v5508_v32, %v2762_v35  ;;  %v5526_v32 = vld [vmem:[%s8248_s9 + $0x8] sm:$0xf] }
 0x605   :  { %v2771_v39 = vmul.f32 1.442695, %v2770_v38 }
 0x607   :  { %6795 = vpow2.f32 %v2771_v39  ;;  %v3154_v39 = vsel %vm2820_vm3, %v5526_v32, 0 }
 0x611   :  { %v6796_v42 = vpop.eup %6795 }
 0x612   :  { %v2774_v44 = vmul.f32 %v6796_v42, %v2773_v46  ;;  %v2777_v27 = vmul.f32 %v6796_v42, %v6796_v42 }
 0x614   :  { %v2775_v54 = vadd.f32 %v2774_v44, %v2758_v41  ;;  %v2778_v45 = vadd.f32 %v2777_v27, %v2776_v43 }
 0x616   :  { %v7633_v47 = vpack.c.bf16 %v2775_v54, %v2775_v54  ;;  %v2779_v49 = vmul.f32 0.5, %v2778_v45 }
 0x618   :  { %6365 = vmatmul.mubr.msk.bf16.vlgmr.msra.gmra.mrb[72].mxu0 %vm2782_vm4, %v7633_v47  ;;  %v2780_v48 = vsub.f32 %v2779_v49, %v2770_v38 }
 0x619   :  { %6380 = vmatprep.mubr.msk.bf16.mxu0 %vm6882_vm0, %v6881_v1  ;;  %6377 = vmatpush3.bf16.msra.mxu0 %v7650_v52 }
 0x61a   :  { %v5509_v29 = vadd.f32 -0.5, %v2780_v48  ;;  %6378 = vmatprep.subr.bf16.mxu0 %v6881_v1 }
 0x61c   :  { %v2783_v50 = vsel %vm2782_vm4, %v5509_v29, 0.0 }
 0x61d   :  { %2784 = vadd.xlane.f32.xlu0 %v2783_v50  ;;  %6379 = vmatpush3.bf16.msra.mxu0 %v7662_v55 }
 0x61e   :  { %6390 = vmatprep.subr.bf16.mxu0 %v6881_v1 }
 0x6aa   :  { %v2785_v56 = vpop.xlane.xlu0 %2784 }
 0x6ab   :  { %v2786_v0 = vmul.f32 %v2785_v56, %v52_v36 }
 0x6ad   :  { %v2788_v57 = vsel %vm2787_vm5, %v2786_v0, 0.0 }
 0x6ae   :  { %2789 = vadd.xlane.f32.xlu1 %v2788_v57 }
 0x6eb   :  { %v2858_v59 = vpop.f32.mrb[72].mxu0 }
 0x6ec   :  { %v2859_v24 = vadd.f32 %v5510_v58, %v2858_v59  ;;  %v6366_v2 = vpop.f32.mrb[73].mxu0  ;;  %v5528_v59 = vld [vmem:[%s8249_s10 + $0x2] ss:$0 sm:$0xff] }
 0x6ed   :  { %v2861_v3 = vpop.f32.mrb[74].mxu0 }
 0x6ee   :  { %v2864_v61 = vmax.f32 %v2859_v24, 0.0  ;;  %v6367_v62 = vpop.f32.mrb[75].mxu0 }
 0x6f0   :  { %v2865_v33 = vpack.c.bf16 %v2864_v61, %v2864_v61  ;;  %v5532_v61 = vld [vmem:[%s8248_s9 + $0xc] sm:$0xf] }
 0x6f2   :  { %6373 = vmatmul.mubr.msk.bf16.vlgmr.msra.gmra.mrb[120].mxu1 %vm387_vm2, %v2865_v33  ;;  %6381 = vmatmul.mubr.msk.bf16.vlgmr.msra.gmra.mrb[76].mxu0 %vm387_vm2, %v2865_v33 }
 0x6f3   :  { %6385 = vmatpush3.bf16.msra.mxu1 %v3006_v4  ;;  %6386 = vmatprep.mubr.msk.bf16.mxu1 %vm6882_vm0, %v6881_v1 }
 0x6f4   :  { %6391 = vmatpush3.bf16.msra.mxu0 %v7643_v51  ;;  %6398 = vmatprep.subr.bf16.mxu1 %v6881_v1 }
 0x6f5   :  { %6392 = vmatprep.subr.bf16.mxu0 %v6881_v1  ;;  %6394 = vmatprep.mubr.msk.bf16.mxu0 %vm6882_vm0, %v6881_v1 }
 0x6f8   :  { %6393 = vmatpush3.bf16.msra.mxu0 %v7657_v53 }
 0x6f9   :  { %6406 = vmatprep.subr.bf16.mxu0 %v6881_v1 }
 0x6fa   :  { %6387 = vmatmul.mubr.msk.bf16.vlgmr.msra.gmra.mrb[124].mxu1 %vm2782_vm4, %v7633_v47 }
 0x6fb   :  { %6399 = vmatpush3.bf16.msra.mxu1 %v7650_v52  ;;  %6402 = vmatprep.mubr.msk.bf16.mxu1 %vm6882_vm0, %v6881_v1 }
 0x6fc   :  { %6400 = vmatprep.subr.bf16.mxu1 %v6881_v1 }
 0x6ff   :  { %6401 = vmatpush3.bf16.msra.mxu1 %v7662_v55 }
 0x700   :  { %6412 = vmatprep.subr.bf16.mxu1 %v6881_v1 }
 0x73b   :  { %v2790_v63 = vpop.xlane.xlu1 %2789 }
 0x73c   :  { %v2791_v5 = vrot.slane %v2790_v63, 4 }
 0x73e   :  { %v2792_v7 = vadd.f32 %v2791_v5, %v2790_v63  ;;  %v3302_v5 = vsel %vm2820_vm3, %v5532_v61, 0 }
 0x740   :  { %v2793_v8 = vrot.slane %v2792_v7, 2 }
 0x742   :  { %v2794_v23 = vadd.f32 %v2793_v8, %v2792_v7  ;;  %v6835_v7 = vld [vmem:[%s8239_s0 + $0x8] sm:$0xff] }
 0x744   :  { %v2795_v9 = vrot.slane %v2794_v23, 1 }
 0x746   :  { %v2796_v10 = vadd.f32 %v2795_v9, %v2794_v23 }
 0x748   :  { %6714 = vpush %v2796_v10 }
 0x7c5   :  { %v2921_v12 = vpop.f32.mrb[120].mxu1  ;;  %v2979_v14 = vpop.f32.mrb[76].mxu0 }
 0x7c6   :  { %v2980_v15 = vadd.f32 %v7700_v11, %v2979_v14  ;;  %v6374_v16 = vpop.f32.mrb[121].mxu1  ;;  %v6382_v17 = vpop.f32.mrb[77].mxu0  ;;  %v2922_v37 = vadd.f32 %v7709_v26, %v2921_v12 }
 0x7c7   :  { %v2924_v18 = vpop.f32.mrb[122].mxu1  ;;  %v2982_v19 = vpop.f32.mrb[78].mxu0 }
 0x7c8   :  { %v2986_v20 = vsub.f32 0.0, %v2980_v15  ;;  %v6375_v6 = vpop.f32.mrb[123].mxu1  ;;  %v6383_v21 = vpop.f32.mrb[79].mxu0  ;;  %v2985_v41 = vsub.f32 %v6834_v40, %v2922_v37 }
 0x7ca   :  { %v2987_v22 = vmul.f32 1.442695, %v2986_v20 }
 0x7cc   :  { %6797 = vpow2.f32 %v2987_v22 }
 0x7cd   :  { %v3042_v13 = vpop.f32.mrb[124].mxu1 }
 0x7ce   :  { %v3043_v28 = vadd.f32 %v5522_v25, %v3042_v13  ;;  %v6388_v30 = vpop.f32.mrb[125].mxu1 }
 0x7cf   :  { %v3045_v31 = vpop.f32.mrb[126].mxu1 }
 0x7d0   :  { %v3048_v34 = vmax.f32 %v3043_v28, 0.0  ;;  %v6389_v35 = vpop.f32.mrb[127].mxu1  ;;  %v5534_v28 = vld [vmem:[%s8249_s10 + $0x3] ss:$0 sm:$0xff] }
 0x7d1   :  { %v5538_v35 = vld [vmem:[%s8248_s9 + $0x10] sm:$0xf] }
 0x7d2   :  { %v3049_v38 = vpack.c.bf16 %v3048_v34, %v3048_v34 }
 0x7d4   :  { %6395 = vmatmul.mubr.msk.bf16.vlgmr.msra.gmra.mrb[80].mxu0 %vm387_vm2, %v3049_v38  ;;  %6403 = vmatmul.mubr.msk.bf16.vlgmr.msra.gmra.mrb[128].mxu1 %vm387_vm2, %v3049_v38 }
 0x7d5   :  { %6407 = vmatpush3.bf16.msra.mxu0 %v3154_v39  ;;  %6408 = vmatprep.mubr.msk.bf16.mxu0 %vm6882_vm0, %v6881_v1 }
 0x7d6   :  { %v6798_v46 = vpop.eup %6797  ;;  %6413 = vmatpush3.bf16.msra.mxu1 %v7643_v51  ;;  %6420 = vmatprep.subr.bf16.mxu0 %v6881_v1 }
 0x7d7   :  { %v2989_v42 = vmul.f32 %v6798_v46, %v2985_v41  ;;  %6414 = vmatprep.subr.bf16.mxu1 %v6881_v1  ;;  %6416 = vmatprep.mubr.msk.bf16.mxu1 %vm6882_vm0, %v6881_v1  ;;  %v3450_v41 = vsel %vm2820_vm3, %v5538_v35, 0  ;;  %v6836_v46 = vld [vmem:[%s8239_s0 + $0x10] sm:$0xff] }
 0x7d9   :  { %v2990_v43 = vmul.f32 0.5, %v2989_v42 }
 0x7da   :  { %6415 = vmatpush3.bf16.msra.mxu1 %v7657_v53 }
 0x7db   :  { %v2991_v44 = vmul.f32 %v2990_v43, %v2989_v42  ;;  %6428 = vmatprep.subr.bf16.mxu1 %v6881_v1 }
 0x7dc   :  { %6409 = vmatmul.mubr.msk.bf16.vlgmr.msra.gmra.mrb[84].mxu0 %vm2782_vm4, %v7633_v47 }
 0x7dd   :  { %v7732_v27 = vadd.f32 %v2991_v44, %v2980_v15  ;;  %6421 = vmatpush3.bf16.msra.mxu0 %v7650_v52  ;;  %6424 = vmatprep.mubr.msk.bf16.mxu0 %vm6882_vm0, %v6881_v1 }
 0x7de   :  { %6422 = vmatprep.subr.bf16.mxu0 %v6881_v1 }
 0x7e1   :  { %6423 = vmatpush3.bf16.msra.mxu0 %v7662_v55 }
 0x7e2   :  { %6434 = vmatprep.subr.bf16.mxu0 %v6881_v1 }
 0x8a7   :  { %v3087_v54 = vpop.f32.mrb[80].mxu0  ;;  %v3127_v45 = vpop.f32.mrb[128].mxu1 }
 0x8a8   :  { %v3128_v49 = vadd.f32 %v7700_v11, %v3127_v45  ;;  %v6396_v48 = vpop.f32.mrb[81].mxu0  ;;  %v6404_v29 = vpop.f32.mrb[129].mxu1  ;;  %v3088_v4 = vadd.f32 %v7709_v26, %v3087_v54 }
 0x8a9   :  { %v3090_v50 = vpop.f32.mrb[82].mxu0  ;;  %v3130_v36 = vpop.f32.mrb[130].mxu1  ;;  %v2993_v48 = vadd.f32 0.9189385, %v7732_v27  ;;  %v5540_v27 = vld [vmem:[%s8249_s10 + $0x4] ss:$0 sm:$0xff] }
 0x8aa   :  { %v3134_v56 = vsub.f32 0.0, %v3128_v49  ;;  %v6397_v0 = vpop.f32.mrb[83].mxu0  ;;  %v6405_v57 = vpop.f32.mrb[131].mxu1  ;;  %v3133_v8 = vsub.f32 %v6835_v7, %v3088_v4 }
 0x8ac   :  { %v3135_v58 = vmul.f32 1.442695, %v3134_v56 }
 0x8ae   :  { %6799 = vpow2.f32 %v3135_v58 }
 0x8af   :  { %v3190_v24 = vpop.f32.mrb[84].mxu0 }
 0x8b0   :  { %v3191_v2 = vadd.f32 %v5528_v59, %v3190_v24  ;;  %v6410_v3 = vpop.f32.mrb[85].mxu0 }
 0x8b1   :  { %v3193_v60 = vpop.f32.mrb[86].mxu0 }
 0x8b2   :  { %v3196_v62 = vmax.f32 %v3191_v2, 0.0  ;;  %v6411_v33 = vpop.f32.mrb[87].mxu0 }
 0x8b4   :  { %v3197_v63 = vpack.c.bf16 %v3196_v62, %v3196_v62 }
 0x8b6   :  { %6417 = vmatmul.mubr.msk.bf16.vlgmr.msra.gmra.mrb[132].mxu1 %vm387_vm2, %v3197_v63  ;;  %6425 = vmatmul.mubr.msk.bf16.vlgmr.msra.gmra.mrb[88].mxu0 %vm387_vm2, %v3197_v63 }
 0x8b7   :  { %6429 = vmatpush3.bf16.msra.mxu1 %v3302_v5  ;;  %6430 = vmatprep.mubr.msk.bf16.mxu1 %vm6882_vm0, %v6881_v1  ;;  %v5544_v5 = vld [vmem:[%s8248_s9 + $0x14] sm:$0xf] }
 0x8b8   :  { %v6800_v23 = vpop.eup %6799  ;;  %6435 = vmatpush3.bf16.msra.mxu0 %v7643_v51  ;;  %6442 = vmatprep.subr.bf16.mxu1 %v6881_v1 }
 0x8b9   :  { %v3137_v9 = vmul.f32 %v6800_v23, %v3133_v8  ;;  %6436 = vmatprep.subr.bf16.mxu0 %v6881_v1  ;;  %6438 = vmatprep.mubr.msk.bf16.mxu0 %vm6882_vm0, %v6881_v1 }
 0x8bb   :  { %v3138_v10 = vmul.f32 0.5, %v3137_v9 }
 0x8bc   :  { %6437 = vmatpush3.bf16.msra.mxu0 %v7657_v53 }
 0x8bd   :  { %v3139_v12 = vmul.f32 %v3138_v10, %v3137_v9  ;;  %6450 = vmatprep.subr.bf16.mxu0 %v6881_v1  ;;  %v3598_v10 = vsel %vm2820_vm3, %v5544_v5, 0 }
 0x8be   :  { %6431 = vmatmul.mubr.msk.bf16.vlgmr.msra.gmra.mrb[136].mxu1 %vm2782_vm4, %v7633_v47 }
 0x8bf   :  { %v7765_v14 = vadd.f32 %v3139_v12, %v3128_v49  ;;  %6443 = vmatpush3.bf16.msra.mxu1 %v7650_v52  ;;  %6446 = vmatprep.mubr.msk.bf16.mxu1 %vm6882_vm0, %v6881_v1  ;;  %v6837_v12 = vld [vmem:[%s8239_s0 + $0x18] sm:$0xff] }
 0x8c0   :  { %6444 = vmatprep.subr.bf16.mxu1 %v6881_v1 }
 0x8c3   :  { %6445 = vmatpush3.bf16.msra.mxu1 %v7662_v55 }
 0x8c4   :  { %6456 = vmatprep.subr.bf16.mxu1 %v6881_v1 }
 0x989   :  { %v3235_v15 = vpop.f32.mrb[132].mxu1  ;;  %v3275_v16 = vpop.f32.mrb[88].mxu0 }
 0x98a   :  { %v3276_v17 = vadd.f32 %v7700_v11, %v3275_v16  ;;  %v6418_v18 = vpop.f32.mrb[133].mxu1  ;;  %v6426_v19 = vpop.f32.mrb[89].mxu0  ;;  %v3236_v39 = vadd.f32 %v7709_v26, %v3235_v15 }
 0x98b   :  { %v3238_v20 = vpop.f32.mrb[134].mxu1  ;;  %v3278_v6 = vpop.f32.mrb[90].mxu0 }
 0x98c   :  { %v3282_v21 = vsub.f32 0.0, %v3276_v17  ;;  %v6419_v22 = vpop.f32.mrb[135].mxu1  ;;  %v6427_v25 = vpop.f32.mrb[91].mxu0  ;;  %v3281_v42 = vsub.f32 %v6836_v46, %v3236_v39  ;;  %v3141_v6 = vadd.f32 0.9189385, %v7765_v14 }
 0x98d   :  { %v5546_v14 = vld [vmem:[%s8249_s10 + $0x5] ss:$0 sm:$0xff] }
 0x98e   :  { %v3283_v13 = vmul.f32 1.442695, %v3282_v21 }
 0x990   :  { %6801 = vpow2.f32 %v3283_v13 }
 0x991   :  { %v3338_v30 = vpop.f32.mrb[136].mxu1 }
 0x992   :  { %v3339_v31 = vadd.f32 %v5534_v28, %v3338_v30  ;;  %v6432_v32 = vpop.f32.mrb[137].mxu1 }
 0x993   :  { %v3341_v34 = vpop.f32.mrb[138].mxu1 }
 0x994   :  { %v3344_v37 = vmax.f32 %v3339_v31, 0.0  ;;  %v6433_v38 = vpop.f32.mrb[139].mxu1 }
 0x996   :  { %v3345_v40 = vpack.c.bf16 %v3344_v37, %v3344_v37 }
 0x998   :  { %6439 = vmatmul.mubr.msk.bf16.vlgmr.msra.gmra.mrb[92].mxu0 %vm387_vm2, %v3345_v40  ;;  %6447 = vmatmul.mubr.msk.bf16.vlgmr.msra.gmra.mrb[140].mxu1 %vm387_vm2, %v3345_v40 }
 0x999   :  { %6451 = vmatpush3.bf16.msra.mxu0 %v3450_v41  ;;  %6452 = vmatprep.mubr.msk.bf16.mxu0 %vm6882_vm0, %v6881_v1 }
 0x99a   :  { %v6802_v43 = vpop.eup %6801  ;;  %6457 = vmatpush3.bf16.msra.mxu1 %v7643_v51  ;;  %6464 = vmatprep.subr.bf16.mxu0 %v6881_v1 }
 0x99b   :  { %v3285_v44 = vmul.f32 %v6802_v43, %v3281_v42  ;;  %6458 = vmatprep.subr.bf16.mxu1 %v6881_v1  ;;  %6460 = vmatprep.mubr.msk.bf16.mxu1 %vm6882_vm0, %v6881_v1  ;;  %v5550_v43 = vld [vmem:[%s8248_s9 + $0x18] sm:$0xf] }
 0x99d   :  { %v3286_v54 = vmul.f32 0.5, %v3285_v44 }
 0x99e   :  { %6459 = vmatpush3.bf16.msra.mxu1 %v7657_v53 }
 0x99f   :  { %v3287_v45 = vmul.f32 %v3286_v54, %v3285_v44  ;;  %6472 = vmatprep.subr.bf16.mxu1 %v6881_v1 }
 0x9a0   :  { %6453 = vmatmul.mubr.msk.bf16.vlgmr.msra.gmra.mrb[96].mxu0 %vm2782_vm4, %v7633_v47 }
 0x9a1   :  { %v3288_v49 = vadd.f32 %v3287_v45, %v3276_v17  ;;  %6465 = vmatpush3.bf16.msra.mxu0 %v7650_v52  ;;  %6468 = vmatprep.mubr.msk.bf16.mxu0 %vm6882_vm0, %v6881_v1 }
 0x9a2   :  { %6466 = vmatprep.subr.bf16.mxu0 %v6881_v1 }
 0x9a3   :  { %v3289_v29 = vadd.f32 0.9189385, %v3288_v49 }
 0x9a5   :  { %v7803_v50 = vadd.f32 %v3289_v29, %v2993_v48  ;;  %6467 = vmatpush3.bf16.msra.mxu0 %v7662_v55  ;;  %v3746_v48 = vsel %vm2820_vm3, %v5550_v43, 0  ;;  %v6838_v29 = vld [vmem:[%s8239_s0 + $0x20] sm:$0xff] }
 0x9a6   :  { %6478 = vmatprep.subr.bf16.mxu0 %v6881_v1 }
 0xa6b   :  { %v3383_v36 = vpop.f32.mrb[92].mxu0  ;;  %v3423_v56 = vpop.f32.mrb[140].mxu1 }
 0xa6c   :  { %v3424_v0 = vadd.f32 %v7700_v11, %v3423_v56  ;;  %v6440_v57 = vpop.f32.mrb[93].mxu0  ;;  %v6448_v58 = vpop.f32.mrb[141].mxu1  ;;  %v3384_v23 = vadd.f32 %v7709_v26, %v3383_v36 }
 0xa6d   :  { %v3386_v59 = vpop.f32.mrb[94].mxu0  ;;  %v3426_v24 = vpop.f32.mrb[142].mxu1 }
 0xa6e   :  { %v3430_v2 = vsub.f32 0.0, %v3424_v0  ;;  %v6441_v3 = vpop.f32.mrb[95].mxu0  ;;  %v6449_v60 = vpop.f32.mrb[143].mxu1  ;;  %v3429_v15 = vsub.f32 %v6837_v12, %v3384_v23 }
 0xa70   :  { %v3431_v61 = vmul.f32 1.442695, %v3430_v2 }
 0xa72   :  { %6803 = vpow2.f32 %v3431_v61 }
 0xa73   :  { %v3486_v62 = vpop.f32.mrb[96].mxu0 }
 0xa74   :  { %v3487_v33 = vadd.f32 %v5540_v27, %v3486_v62  ;;  %v6454_v4 = vpop.f32.mrb[97].mxu0 }
 0xa75   :  { %v3489_v63 = vpop.f32.mrb[98].mxu0 }
 0xa76   :  { %v3492_v7 = vmax.f32 %v3487_v33, 0.0  ;;  %v6455_v8 = vpop.f32.mrb[99].mxu0 }
 0xa78   :  { %v3493_v9 = vpack.c.bf16 %v3492_v7, %v3492_v7 }
 0xa7a   :  { %6461 = vmatmul.mubr.msk.bf16.vlgmr.msra.gmra.mrb[144].mxu1 %vm387_vm2, %v3493_v9  ;;  %6469 = vmatmul.mubr.msk.bf16.vlgmr.msra.gmra.mrb[100].mxu0 %vm387_vm2, %v3493_v9 }
 0xa7b   :  { %6473 = vmatpush3.bf16.msra.mxu1 %v3598_v10  ;;  %6474 = vmatprep.mubr.msk.bf16.mxu1 %vm6882_vm0, %v6881_v1 }
 0xa7c   :  { %v6804_v16 = vpop.eup %6803  ;;  %6479 = vmatpush3.bf16.msra.mxu0 %v7643_v51  ;;  %6486 = vmatprep.subr.bf16.mxu1 %v6881_v1 }
 0xa7d   :  { %v3433_v17 = vmul.f32 %v6804_v16, %v3429_v15  ;;  %6480 = vmatprep.subr.bf16.mxu0 %v6881_v1  ;;  %6482 = vmatprep.mubr.msk.bf16.mxu0 %vm6882_vm0, %v6881_v1  ;;  %v5556_v15 = vld [vmem:[%s8248_s9 + $0x1c] sm:$0xf] }
 0xa7f   :  { %v3434_v18 = vmul.f32 0.5, %v3433_v17 }
 0xa80   :  { %6481 = vmatpush3.bf16.msra.mxu0 %v7657_v53 }
 0xa81   :  { %v3435_v19 = vmul.f32 %v3434_v18, %v3433_v17  ;;  %6494 = vmatprep.subr.bf16.mxu0 %v6881_v1 }
 0xa82   :  { %6475 = vmatmul.mubr.msk.bf16.vlgmr.msra.gmra.mrb[148].mxu1 %vm2782_vm4, %v7633_v47 }
 0xa83   :  { %v3436_v20 = vadd.f32 %v3435_v19, %v3424_v0  ;;  %6487 = vmatpush3.bf16.msra.mxu1 %v7650_v52  ;;  %6490 = vmatprep.mubr.msk.bf16.mxu1 %vm6882_vm0, %v6881_v1 }
 0xa84   :  { %6488 = vmatprep.subr.bf16.mxu1 %v6881_v1 }
 0xa85   :  { %v3437_v21 = vadd.f32 0.9189385, %v3436_v20  ;;  %v3894_v20 = vsel %vm2820_vm3, %v5556_v15, 0 }
 0xa87   :  { %v7837_v22 = vadd.f32 %v3437_v21, %v3141_v6  ;;  %6489 = vmatpush3.bf16.msra.mxu1 %v7662_v55  ;;  %v6839_v6 = vld [vmem:[%s8239_s0 + $0x28] sm:$0xff] }
 0xa88   :  { %6500 = vmatprep.subr.bf16.mxu1 %v6881_v1 }
 0xb4d   :  { %v3531_v25 = vpop.f32.mrb[144].mxu1  ;;  %v3571_v13 = vpop.f32.mrb[100].mxu0 }
 0xb4e   :  { %v3572_v28 = vadd.f32 %v7700_v11, %v3571_v13  ;;  %v6462_v30 = vpop.f32.mrb[145].mxu1  ;;  %v6470_v31 = vpop.f32.mrb[101].mxu0  ;;  %v3532_v45 = vadd.f32 %v7709_v26, %v3531_v25 }
 0xb4f   :  { %v3534_v32 = vpop.f32.mrb[146].mxu1  ;;  %v3574_v34 = vpop.f32.mrb[102].mxu0 }
 0xb50   :  { %v3578_v35 = vsub.f32 0.0, %v3572_v28  ;;  %v6463_v37 = vpop.f32.mrb[147].mxu1  ;;  %v6471_v38 = vpop.f32.mrb[103].mxu0  ;;  %v3577_v36 = vsub.f32 %v6838_v29, %v3532_v45  ;;  %v5562_v29 = vld [vmem:[%s8248_s9 + $0x20] sm:$0xf] }
 0xb52   :  { %v3579_v39 = vmul.f32 1.442695, %v3578_v35 }
 0xb54   :  { %6805 = vpow2.f32 %v3579_v39 }
 0xb55   :  { %v3634_v40 = vpop.f32.mrb[148].mxu1 }
 0xb56   :  { %v3635_v41 = vadd.f32 %v5546_v14, %v3634_v40  ;;  %v6476_v46 = vpop.f32.mrb[149].mxu1 }
 0xb57   :  { %v3637_v42 = vpop.f32.mrb[150].mxu1 }
 0xb58   :  { %v3640_v44 = vmax.f32 %v3635_v41, 0.0  ;;  %v6477_v54 = vpop.f32.mrb[151].mxu1 }
 0xb5a   :  { %v3641_v49 = vpack.c.bf16 %v3640_v44, %v3640_v44 }
 0xb5c   :  { %6483 = vmatmul.mubr.msk.bf16.vlgmr.msra.gmra.mrb[104].mxu0 %vm387_vm2, %v3641_v49  ;;  %6491 = vmatmul.mubr.msk.bf16.vlgmr.msra.gmra.mrb[152].mxu1 %vm387_vm2, %v3641_v49 }
 0xb5d   :  { %6495 = vmatpush3.bf16.msra.mxu0 %v3746_v48  ;;  %6496 = vmatprep.mubr.msk.bf16.mxu0 %vm6882_vm0, %v6881_v1 }
 0xb5e   :  { %v6806_v56 = vpop.eup %6805  ;;  %6501 = vmatpush3.bf16.msra.mxu1 %v7643_v51  ;;  %6508 = vmatprep.subr.bf16.mxu0 %v6881_v1 }
 0xb5f   :  { %v3581_v0 = vmul.f32 %v6806_v56, %v3577_v36  ;;  %6502 = vmatprep.subr.bf16.mxu1 %v6881_v1  ;;  %6504 = vmatprep.mubr.msk.bf16.mxu1 %vm6882_vm0, %v6881_v1 }
 0xb61   :  { %v3582_v57 = vmul.f32 0.5, %v3581_v0 }
 0xb62   :  { %6503 = vmatpush3.bf16.msra.mxu1 %v7657_v53 }
 0xb63   :  { %v3583_v58 = vmul.f32 %v3582_v57, %v3581_v0  ;;  %6516 = vmatprep.subr.bf16.mxu1 %v6881_v1 }
 0xb64   :  { %6497 = vmatmul.mubr.msk.bf16.vlgmr.msra.gmra.mrb[108].mxu0 %vm2782_vm4, %v7633_v47 }
 0xb65   :  { %v3584_v59 = vadd.f32 %v3583_v58, %v3572_v28  ;;  %6509 = vmatpush3.bf16.msra.mxu0 %v7650_v52  ;;  %6512 = vmatprep.mubr.msk.bf16.mxu0 %vm6882_vm0, %v6881_v1  ;;  %v4042_v58 = vsel %vm2820_vm3, %v5562_v29, 0 }
 0xb66   :  { %6510 = vmatprep.subr.bf16.mxu0 %v6881_v1 }
 0xb67   :  { %v3585_v24 = vadd.f32 0.9189385, %v3584_v59  ;;  %v6840_v59 = vld [vmem:[%s8239_s0 + $0x30] sm:$0xff] }
 0xb69   :  { %v7871_v2 = vadd.f32 %v3585_v24, %v7803_v50  ;;  %6511 = vmatpush3.bf16.msra.mxu0 %v7662_v55  ;;  %v5552_v50 = vld [vmem:[%s8249_s10 + $0x6] ss:$0 sm:$0xff] }
 0xb6a   :  { %6522 = vmatprep.subr.bf16.mxu0 %v6881_v1 }
 0xc2f   :  { %v3679_v3 = vpop.f32.mrb[104].mxu0  ;;  %v3719_v60 = vpop.f32.mrb[152].mxu1 }
 0xc30   :  { %v3720_v61 = vadd.f32 %v7700_v11, %v3719_v60  ;;  %v6484_v27 = vpop.f32.mrb[105].mxu0  ;;  %v6492_v62 = vpop.f32.mrb[153].mxu1  ;;  %v3680_v18 = vadd.f32 %v7709_v26, %v3679_v3 }
 0xc31   :  { %v3682_v33 = vpop.f32.mrb[106].mxu0  ;;  %v3722_v4 = vpop.f32.mrb[154].mxu1 }
 0xc32   :  { %v3726_v63 = vsub.f32 0.0, %v3720_v61  ;;  %v6485_v5 = vpop.f32.mrb[107].mxu0  ;;  %v6493_v7 = vpop.f32.mrb[155].mxu1  ;;  %v3725_v21 = vsub.f32 %v6839_v6, %v3680_v18  ;;  %v5568_v6 = vld [vmem:[%s8248_s9 + $0x24] sm:$0xf] }
 0xc34   :  { %v3727_v8 = vmul.f32 1.442695, %v3726_v63 }
 0xc36   :  { %6807 = vpow2.f32 %v3727_v8 }
 0xc37   :  { %v3782_v23 = vpop.f32.mrb[108].mxu0 }
 0xc38   :  { %v3783_v9 = vadd.f32 %v5552_v50, %v3782_v23  ;;  %v6498_v10 = vpop.f32.mrb[109].mxu0 }
 0xc39   :  { %v3785_v12 = vpop.f32.mrb[110].mxu0 }
 0xc3a   :  { %v3788_v16 = vmax.f32 %v3783_v9, 0.0  ;;  %v6499_v17 = vpop.f32.mrb[111].mxu0 }
 0xc3c   :  { %v3789_v19 = vpack.c.bf16 %v3788_v16, %v3788_v16 }
 0xc3e   :  { %6505 = vmatmul.mubr.msk.bf16.vlgmr.msra.gmra.mrb[156].mxu1 %vm387_vm2, %v3789_v19  ;;  %6513 = vmatmul.mubr.msk.bf16.vlgmr.msra.gmra.mrb[112].mxu0 %vm387_vm2, %v3789_v19 }
 0xc3f   :  { %6517 = vmatpush3.bf16.msra.mxu1 %v3894_v20  ;;  %6518 = vmatprep.mubr.msk.bf16.mxu1 %vm6882_vm0, %v6881_v1 }
 0xc40   :  { %v6808_v25 = vpop.eup %6807  ;;  %6523 = vmatpush3.bf16.msra.mxu0 %v7643_v51  ;;  %6530 = vmatprep.subr.bf16.mxu1 %v6881_v1 }
 0xc41   :  { %v3729_v13 = vmul.f32 %v6808_v25, %v3725_v21  ;;  %6524 = vmatprep.subr.bf16.mxu0 %v6881_v1  ;;  %6526 = vmatprep.mubr.msk.bf16.mxu0 %vm6882_vm0, %v6881_v1 }
 0xc43   :  { %v3730_v28 = vmul.f32 0.5, %v3729_v13 }
 0xc44   :  { %6525 = vmatpush3.bf16.msra.mxu0 %v7657_v53 }
 0xc45   :  { %v3731_v30 = vmul.f32 %v3730_v28, %v3729_v13  ;;  %6538 = vmatprep.subr.bf16.mxu0 %v6881_v1 }
 0xc46   :  { %6519 = vmatmul.mubr.msk.bf16.vlgmr.msra.gmra.mrb[160].mxu1 %vm2782_vm4, %v7633_v47 }
 0xc47   :  { %v3732_v31 = vadd.f32 %v3731_v30, %v3720_v61  ;;  %6531 = vmatpush3.bf16.msra.mxu1 %v7650_v52  ;;  %6534 = vmatprep.mubr.msk.bf16.mxu1 %vm6882_vm0, %v6881_v1  ;;  %v4190_v30 = vsel %vm2820_vm3, %v5568_v6, 0 }
 0xc48   :  { %6532 = vmatprep.subr.bf16.mxu1 %v6881_v1 }
 0xc49   :  { %v3733_v32 = vadd.f32 0.9189385, %v3732_v31  ;;  %v6841_v31 = vld [vmem:[%s8239_s0 + $0x38] sm:$0xff] }
 0xc4b   :  { %v7905_v34 = vadd.f32 %v3733_v32, %v7837_v22  ;;  %6533 = vmatpush3.bf16.msra.mxu1 %v7662_v55  ;;  %v5558_v22 = vld [vmem:[%s8249_s10 + $0x7] ss:$0 sm:$0xff] }
 0xc4c   :  { %6544 = vmatprep.subr.bf16.mxu1 %v6881_v1 }
 0xd11   :  { %v3827_v35 = vpop.f32.mrb[156].mxu1  ;;  %v3867_v37 = vpop.f32.mrb[112].mxu0 }
 0xd12   :  { %v3868_v38 = vadd.f32 %v7700_v11, %v3867_v37  ;;  %v6506_v39 = vpop.f32.mrb[157].mxu1  ;;  %v6514_v14 = vpop.f32.mrb[113].mxu0  ;;  %v3828_v0 = vadd.f32 %v7709_v26, %v3827_v35 }
 0xd13   :  { %v3830_v40 = vpop.f32.mrb[158].mxu1  ;;  %v3870_v41 = vpop.f32.mrb[114].mxu0 }
 0xd14   :  { %v3874_v46 = vsub.f32 0.0, %v3868_v38  ;;  %v6507_v42 = vpop.f32.mrb[159].mxu1  ;;  %v6515_v43 = vpop.f32.mrb[115].mxu0  ;;  %v3873_v24 = vsub.f32 %v6840_v59, %v3828_v0  ;;  %v5574_v59 = vld [vmem:[%s8248_s9 + $0x28] sm:$0xf] }
 0xd16   :  { %v3875_v44 = vmul.f32 1.442695, %v3874_v46 }
 0xd18   :  { %6809 = vpow2.f32 %v3875_v44 }
 0xd19   :  { %v3930_v54 = vpop.f32.mrb[160].mxu1 }
 0xd1a   :  { %v3931_v45 = vadd.f32 %v5558_v22, %v3930_v54  ;;  %v6520_v49 = vpop.f32.mrb[161].mxu1 }
 0xd1b   :  { %v3933_v48 = vpop.f32.mrb[162].mxu1 }
 0xd1c   :  { %v3936_v36 = vmax.f32 %v3931_v45, 0.0  ;;  %v6521_v56 = vpop.f32.mrb[163].mxu1 }
 0xd1e   :  { %v3937_v57 = vpack.c.bf16 %v3936_v36, %v3936_v36 }
 0xd20   :  { %6527 = vmatmul.mubr.msk.bf16.vlgmr.msra.gmra.mrb[116].mxu0 %vm387_vm2, %v3937_v57  ;;  %6535 = vmatmul.mubr.msk.bf16.vlgmr.msra.gmra.mrb[164].mxu1 %vm387_vm2, %v3937_v57 }
 0xd21   :  { %6539 = vmatpush3.bf16.msra.mxu0 %v4042_v58  ;;  %6540 = vmatprep.mubr.msk.bf16.mxu0 %vm6882_vm0, %v6881_v1 }
 0xd22   :  { %v6810_v3 = vpop.eup %6809  ;;  %6545 = vmatpush3.bf16.msra.mxu1 %v7643_v51  ;;  %6552 = vmatprep.subr.bf16.mxu0 %v6881_v1 }
 0xd23   :  { %v3877_v60 = vmul.f32 %v6810_v3, %v3873_v24  ;;  %6546 = vmatprep.subr.bf16.mxu1 %v6881_v1  ;;  %6548 = vmatprep.mubr.msk.bf16.mxu1 %vm6882_vm0, %v6881_v1 }
 0xd25   :  { %v3878_v61 = vmul.f32 0.5, %v3877_v60 }
 0xd26   :  { %6547 = vmatpush3.bf16.msra.mxu1 %v7657_v53 }
 0xd27   :  { %v3879_v27 = vmul.f32 %v3878_v61, %v3877_v60  ;;  %6560 = vmatprep.subr.bf16.mxu1 %v6881_v1 }
 0xd28   :  { %6541 = vmatmul.mubr.msk.bf16.vlgmr.msra.gmra.mrb[120].mxu0 %vm2782_vm4, %v7633_v47 }
 0xd29   :  { %v3880_v62 = vadd.f32 %v3879_v27, %v3868_v38  ;;  %6553 = vmatpush3.bf16.msra.mxu0 %v7650_v52  ;;  %6556 = vmatprep.mubr.msk.bf16.mxu0 %vm6882_vm0, %v6881_v1  ;;  %v4338_v27 = vsel %vm2820_vm3, %v5574_v59, 0 }
 0xd2a   :  { %6554 = vmatprep.subr.bf16.mxu0 %v6881_v1 }
 0xd2b   :  { %v3881_v33 = vadd.f32 0.9189385, %v3880_v62  ;;  %v6842_v62 = vld [vmem:[%s8239_s0 + $0x40] sm:$0xff] }
 0xd2d   :  { %v7939_v4 = vadd.f32 %v3881_v33, %v7871_v2  ;;  %6555 = vmatpush3.bf16.msra.mxu0 %v7662_v55  ;;  %v5564_v2 = vld [vmem:[%s8249_s10 + $0x8] ss:$0 sm:$0xff] }
 0xd2e   :  { %6566 = vmatprep.subr.bf16.mxu0 %v6881_v1 }
 0xdf3   :  { %v3975_v63 = vpop.f32.mrb[116].mxu0  ;;  %v4015_v5 = vpop.f32.mrb[164].mxu1 }
 0xdf4   :  { %v4016_v7 = vadd.f32 %v7700_v11, %v4015_v5  ;;  %v6528_v8 = vpop.f32.mrb[117].mxu0  ;;  %v6536_v50 = vpop.f32.mrb[165].mxu1  ;;  %v3976_v13 = vadd.f32 %v7709_v26, %v3975_v63 }
 0xdf5   :  { %v3978_v23 = vpop.f32.mrb[118].mxu0  ;;  %v4018_v9 = vpop.f32.mrb[166].mxu1 }
 0xdf6   :  { %v4022_v10 = vsub.f32 0.0, %v4016_v7  ;;  %v6529_v12 = vpop.f32.mrb[119].mxu0  ;;  %v6537_v15 = vpop.f32.mrb[167].mxu1  ;;  %v4021_v32 = vsub.f32 %v6841_v31, %v3976_v13 }
 0xdf8   :  { %v4023_v16 = vmul.f32 1.442695, %v4022_v10 }
 0xdfa   :  { %6811 = vpow2.f32 %v4023_v16 }
 0xdfb   :  { %v4078_v17 = vpop.f32.mrb[120].mxu0 }
 0xdfc   :  { %v4079_v18 = vadd.f32 %v5564_v2, %v4078_v17  ;;  %v6542_v19 = vpop.f32.mrb[121].mxu0 }
 0xdfd   :  { %v4081_v20 = vpop.f32.mrb[122].mxu0 }
 0xdfe   :  { %v4084_v21 = vmax.f32 %v4079_v18, 0.0  ;;  %v6543_v25 = vpop.f32.mrb[123].mxu0 }
 0xe00   :  { %v4085_v28 = vpack.c.bf16 %v4084_v21, %v4084_v21 }
 0xe02   :  { %6549 = vmatmul.mubr.msk.bf16.vlgmr.msra.gmra.mrb[168].mxu1 %vm387_vm2, %v4085_v28  ;;  %6557 = vmatmul.mubr.msk.bf16.vlgmr.msra.gmra.mrb[124].mxu0 %vm387_vm2, %v4085_v28  ;;  %v5580_v28 = vld [vmem:[%s8248_s9 + $0x2c] sm:$0xf] }
 0xe03   :  { %6561 = vmatpush3.bf16.msra.mxu1 %v4190_v30  ;;  %6562 = vmatprep.mubr.msk.bf16.mxu1 %vm6882_vm0, %v6881_v1 }
 0xe04   :  { %v6812_v35 = vpop.eup %6811  ;;  %6567 = vmatpush3.bf16.msra.mxu0 %v7643_v51  ;;  %6574 = vmatprep.subr.bf16.mxu1 %v6881_v1 }
 0xe05   :  { %v4025_v37 = vmul.f32 %v6812_v35, %v4021_v32  ;;  %6568 = vmatprep.subr.bf16.mxu0 %v6881_v1  ;;  %6570 = vmatprep.mubr.msk.bf16.mxu0 %vm6882_vm0, %v6881_v1 }
 0xe07   :  { %v4026_v38 = vmul.f32 0.5, %v4025_v37 }
 0xe08   :  { %6569 = vmatpush3.bf16.msra.mxu0 %v7657_v53 }
 0xe09   :  { %v4027_v39 = vmul.f32 %v4026_v38, %v4025_v37  ;;  %6582 = vmatprep.subr.bf16.mxu0 %v6881_v1  ;;  %v4486_v37 = vsel %vm2820_vm3, %v5580_v28, 0  ;;  %v6843_v38 = vld [vmem:[%s8239_s0 + $0x48] sm:$0xff] }
 0xe0a   :  { %6563 = vmatmul.mubr.msk.bf16.vlgmr.msra.gmra.mrb[172].mxu1 %vm2782_vm4, %v7633_v47  ;;  %v5588_v28 = vld [vmem:[%s8249_s10 + $0xc] ss:$0 sm:$0xff] }
 0xe0b   :  { %v4028_v14 = vadd.f32 %v4027_v39, %v4016_v7  ;;  %6575 = vmatpush3.bf16.msra.mxu1 %v7650_v52  ;;  %6578 = vmatprep.mubr.msk.bf16.mxu1 %vm6882_vm0, %v6881_v1 }
 0xe0c   :  { %6576 = vmatprep.subr.bf16.mxu1 %v6881_v1 }
 0xe0d   :  { %v4029_v40 = vadd.f32 0.9189385, %v4028_v14 }
 0xe0f   :  { %v7973_v41 = vadd.f32 %v4029_v40, %v7905_v34  ;;  %6577 = vmatpush3.bf16.msra.mxu1 %v7662_v55  ;;  %v5570_v34 = vld [vmem:[%s8249_s10 + $0x9] ss:$0 sm:$0xff] }
 0xe10   :  { %6588 = vmatprep.subr.bf16.mxu1 %v6881_v1 }
 0xed5   :  { %v4123_v46 = vpop.f32.mrb[168].mxu1  ;;  %v4163_v42 = vpop.f32.mrb[124].mxu0 }
 0xed6   :  { %v4164_v43 = vadd.f32 %v7700_v11, %v4163_v42  ;;  %v6550_v44 = vpop.f32.mrb[169].mxu1  ;;  %v6558_v22 = vpop.f32.mrb[125].mxu0  ;;  %v4124_v60 = vadd.f32 %v7709_v26, %v4123_v46 }
 0xed7   :  { %v4126_v54 = vpop.f32.mrb[170].mxu1  ;;  %v4166_v45 = vpop.f32.mrb[126].mxu0  ;;  %v8051_v22 = vld [vmem:[%s8251_s12 + $0x8] sm:$0xff]  }
 0xed8   :  { %v4170_v49 = vsub.f32 0.0, %v4164_v43  ;;  %v6551_v48 = vpop.f32.mrb[171].mxu1  ;;  %v6559_v29 = vpop.f32.mrb[127].mxu0  ;;  %v4169_v33 = vsub.f32 %v6842_v62, %v4124_v60 }
 0xeda   :  { %v4171_v36 = vmul.f32 1.442695, %v4170_v49 }
 0xedc   :  { %6813 = vpow2.f32 %v4171_v36 }
 0xedd   :  { %v4226_v56 = vpop.f32.mrb[172].mxu1 }
 0xede   :  { %v4227_v0 = vadd.f32 %v5570_v34, %v4226_v56  ;;  %v6564_v57 = vpop.f32.mrb[173].mxu1 }
 0xedf   :  { %v4229_v58 = vpop.f32.mrb[174].mxu1 }
 0xee0   :  { %v4232_v24 = vmax.f32 %v4227_v0, 0.0  ;;  %v6565_v3 = vpop.f32.mrb[175].mxu1  ;;  %v5582_v58 = vld [vmem:[%s8249_s10 + $0xb] ss:$0 sm:$0xff] }
 0xee2   :  { %v4233_v61 = vpack.c.bf16 %v4232_v24, %v4232_v24 }
 0xee4   :  { %6571 = vmatmul.mubr.msk.bf16.vlgmr.msra.gmra.mrb[128].mxu0 %vm387_vm2, %v4233_v61  ;;  %6579 = vmatmul.mubr.msk.bf16.vlgmr.msra.gmra.mrb[176].mxu1 %vm387_vm2, %v4233_v61 }
 0xee5   :  { %6583 = vmatpush3.bf16.msra.mxu0 %v4338_v27  ;;  %6584 = vmatprep.mubr.msk.bf16.mxu0 %vm6882_vm0, %v6881_v1 }
 0xee6   :  { %v6814_v63 = vpop.eup %6813  ;;  %6589 = vmatpush3.bf16.msra.mxu1 %v7643_v51  ;;  %6596 = vmatprep.subr.bf16.mxu0 %v6881_v1 }
 0xee7   :  { %v4173_v5 = vmul.f32 %v6814_v63, %v4169_v33  ;;  %6590 = vmatprep.subr.bf16.mxu1 %v6881_v1  ;;  %6592 = vmatprep.mubr.msk.bf16.mxu1 %vm6882_vm0, %v6881_v1 }
 0xee9   :  { %v4174_v7 = vmul.f32 0.5, %v4173_v5 }
 0xeea   :  { %6591 = vmatpush3.bf16.msra.mxu1 %v7657_v53 }
 0xeeb   :  { %v4175_v8 = vmul.f32 %v4174_v7, %v4173_v5  ;;  %6604 = vmatprep.subr.bf16.mxu1 %v6881_v1  ;;  %v6846_v5 = vld [vmem:[%s8239_s0 + $0x50] sm:$0xff] }
 0xeec   :  { %6585 = vmatmul.mubr.msk.bf16.vlgmr.msra.gmra.mrb[132].mxu0 %vm2782_vm4, %v7633_v47 }
 0xeed   :  { %v4176_v50 = vadd.f32 %v4175_v8, %v4164_v43  ;;  %6597 = vmatpush3.bf16.msra.mxu0 %v7650_v52  ;;  %6600 = vmatprep.mubr.msk.bf16.mxu0 %vm6882_vm0, %v6881_v1 }
 0xeee   :  { %6598 = vmatprep.subr.bf16.mxu0 %v6881_v1 }
 0xeef   :  { %v4177_v23 = vadd.f32 0.9189385, %v4176_v50 }
 0xef1   :  { %v8007_v9 = vadd.f32 %v4177_v23, %v7939_v4  ;;  %6599 = vmatpush3.bf16.msra.mxu0 %v7662_v55  ;;  %v5576_v4 = vld [vmem:[%s8249_s10 + $0xa] ss:$0 sm:$0xff] }
 0xef2   :  { %6610 = vmatprep.subr.bf16.mxu0 %v6881_v1 }
 0xfb7   :  { %v4271_v10 = vpop.f32.mrb[128].mxu0  ;;  %v4311_v12 = vpop.f32.mrb[176].mxu1 }
 0xfb8   :  { %v4312_v15 = vadd.f32 %v7700_v11, %v4311_v12  ;;  %v6572_v16 = vpop.f32.mrb[129].mxu0  ;;  %v6580_v2 = vpop.f32.mrb[177].mxu1  ;;  %v4272_v32 = vadd.f32 %v7709_v26, %v4271_v10  ;;  %v8084_v10 = vld [vmem:[%s8250_s11 + $0x8] sm:$0xff]  }
 0xfb9   :  { %v4274_v52 = vpop.f32.mrb[130].mxu0  ;;  %v4314_v17 = vpop.f32.mrb[178].mxu1 }
 0xfba   :  { %v4318_v18 = vsub.f32 0.0, %v4312_v15  ;;  %v6573_v19 = vpop.f32.mrb[131].mxu0  ;;  %v6581_v20 = vpop.f32.mrb[179].mxu1  ;;  %v4317_v39 = vsub.f32 %v6843_v38, %v4272_v32 }
 0xfbc   :  { %v4319_v6 = vmul.f32 1.442695, %v4318_v18  ;;  %v8102_v18 = vld [vmem:[%s8253_s14] ss:$0 sm:$0xff]  ;;  %s6857_s14 = scalar_lea.vmem %s5248_s19, 128 }
 0xfbd   :  { %p6858_p0 = scmp.ne.s32.totalorder %s5248_s19, %s6857_s14  ;;  %p6863_p2 = scmp.lt.s32.totalorder %s6857_s14, %s6857_s14 }
 0xfbe   :  { %6815 = vpow2.f32 %v4319_v6 }
 0xfbf   :  { %v4374_v55 = vpop.f32.mrb[132].mxu0  ;;  %p6864_p3 = por %p6863_p2, %p6862_p1 }
 0xfc0   :  { %v4375_v21 = vadd.f32 %v5576_v4, %v4374_v55  ;;  %v6586_v25 = vpop.f32.mrb[133].mxu0 }
 0xfc1   :  { %v4377_v13 = vpop.f32.mrb[134].mxu0  ;;  %p6865_p4 = pnand %p6864_p3, %p6858_p0 }
 0xfc2   :  { %v4380_v30 = vmax.f32 %v4375_v21, 0.0  ;;  %v6587_v31 = vpop.f32.mrb[135].mxu0 }
 0xfc4   :  { %v4381_v35 = vpack.c.bf16 %v4380_v30, %v4380_v30 }
 0xfc6   :  { %6593 = vmatmul.mubr.msk.bf16.vlgmr.msra.gmra.mrb[180].mxu1 %vm387_vm2, %v4381_v35  ;;  %6601 = vmatmul.mubr.msk.bf16.vlgmr.msra.gmra.mrb[136].mxu0 %vm387_vm2, %v4381_v35 }
 0xfc7   :  { %6605 = vmatpush3.bf16.msra.mxu1 %v4486_v37  ;;  %6606 = vmatprep.mubr.msk.bf16.mxu1 %vm6882_vm0, %v6881_v1  ;;  %v5592_v37 = vld [vmem:[%s8248_s9 + $0x34] sm:$0xf] }
 0xfc8   :  { %v6816_v14 = vpop.eup %6815  ;;  %6611 = vmatpush3.bf16.msra.mxu0 %v7643_v51  ;;  %6618 = vmatprep.subr.bf16.mxu1 %v6881_v1  ;;  %v8039_v51 = vld [vmem:[%s8251_s12] sm:$0xff]  }
 0xfc9   :  { %v4321_v40 = vmul.f32 %v6816_v14, %v4317_v39  ;;  %6612 = vmatprep.subr.bf16.mxu0 %v6881_v1  ;;  %6614 = vmatprep.mubr.msk.bf16.mxu0 %vm6882_vm0, %v6881_v1  ;;  %v8114_v14 = vld [vmem:[%s8252_s13] ss:$0 sm:$0xff] }
 0xfcb   :  { %v4322_v46 = vmul.f32 0.5, %v4321_v40 }
 0xfcc   :  { %6613 = vmatpush3.bf16.msra.mxu0 %v7657_v53 }
 0xfcd   :  { %v4323_v42 = vmul.f32 %v4322_v46, %v4321_v40  ;;  %6626 = vmatprep.subr.bf16.mxu0 %v6881_v1 }
 0xfce   :  { %6607 = vmatmul.mubr.msk.bf16.vlgmr.msra.gmra.mrb[184].mxu1 %vm2782_vm4, %v7633_v47 }
 0xfcf   :  { %v4324_v43 = vadd.f32 %v4323_v42, %v4312_v15  ;;  %6619 = vmatpush3.bf16.msra.mxu1 %v8039_v51  ;;  %6622 = vmatprep.mubr.msk.bf16.mxu1 %vm6882_vm0, %v6881_v1  ;;  %v4782_v42 = vsel %vm2820_vm3, %v5592_v37, 0 }
 0xfd0   :  { %6620 = vmatprep.subr.bf16.mxu1 %v6881_v1 }
 0xfd1   :  { %v4325_v53 = vadd.f32 0.9189385, %v4324_v43  ;;  %v6851_v43 = vld [vmem:[%s8239_s0 + $0x58] sm:$0xff] }
 0xfd3   :  { %v8046_v44 = vadd.f32 %v4325_v53, %v7973_v41  ;;  %6621 = vmatpush3.bf16.msra.mxu1 %v8051_v22 }
 0xfd4   :  { %6632 = vmatprep.subr.bf16.mxu1 %v6881_v1 }
0x1099   :  { %v4419_v54 = vpop.f32.mrb[180].mxu1  ;;  %v4459_v45 = vpop.f32.mrb[136].mxu0 }
0x109a   :  { %v4460_v49 = vadd.f32 %v7700_v11, %v4459_v45  ;;  %v6594_v48 = vpop.f32.mrb[181].mxu1  ;;  %v6602_v29 = vpop.f32.mrb[137].mxu0  ;;  %v5586_v11 = vld [vmem:[%s8248_s9 + $0x30] sm:$0xf]  ;;  %v4420_v62 = vadd.f32 %v7709_v26, %v4419_v54  ;;  %v8074_v26 = vld [vmem:[%s8250_s11] sm:$0xff]  }
0x109b   :  { %v4422_v36 = vpop.f32.mrb[182].mxu1  ;;  %v4462_v34 = vpop.f32.mrb[138].mxu0  ;;  %v4634_v63 = vsel %vm2820_vm3, %v5586_v11, 0 }
0x109c   :  { %v4466_v56 = vsub.f32 0.0, %v4460_v49  ;;  %v6595_v41 = vpop.f32.mrb[183].mxu1  ;;  %v6603_v0 = vpop.f32.mrb[139].mxu0  ;;  %v4465_v7 = vsub.f32 %v6846_v5, %v4420_v62  ;;  %v5598_v5 = vld [vmem:[%s8248_s9 + $0x38] sm:$0xf] }
0x109e   :  { %v4467_v57 = vmul.f32 1.442695, %v4466_v56 }
0x10a0   :  { %6817 = vpow2.f32 %v4467_v57 }
0x10a1   :  { %v4522_v59 = vpop.f32.mrb[184].mxu1 }
0x10a2   :  { %v4523_v24 = vadd.f32 %v5582_v58, %v4522_v59  ;;  %v6608_v3 = vpop.f32.mrb[185].mxu1 }
0x10a3   :  { %v4525_v60 = vpop.f32.mrb[186].mxu1 }
0x10a4   :  { %v4528_v61 = vmax.f32 %v4523_v24, 0.0  ;;  %v6609_v27 = vpop.f32.mrb[187].mxu1 }
0x10a6   :  { %v4529_v33 = vpack.c.bf16 %v4528_v61, %v4528_v61 }
0x10a8   :  { %6615 = vmatmul.mubr.msk.bf16.vlgmr.msra.gmra.mrb[140].mxu0 %vm387_vm2, %v4529_v33  ;;  %6623 = vmatmul.mubr.msk.bf16.vlgmr.msra.gmra.mrb[188].mxu1 %vm387_vm2, %v4529_v33 }
0x10a9   :  { %6627 = vmatpush3.bf16.msra.mxu0 %v4634_v63  ;;  %6628 = vmatprep.mubr.msk.bf16.mxu0 %vm6882_vm0, %v6881_v1 }
0x10aa   :  { %v6818_v8 = vpop.eup %6817  ;;  %6633 = vmatpush3.bf16.msra.mxu1 %v8074_v26  ;;  %6640 = vmatprep.subr.bf16.mxu0 %v6881_v1 }
0x10ab   :  { %v4469_v50 = vmul.f32 %v6818_v8, %v4465_v7  ;;  %6634 = vmatprep.subr.bf16.mxu1 %v6881_v1  ;;  %6636 = vmatprep.mubr.msk.bf16.mxu1 %vm6882_vm0, %v6881_v1 }
0x10ad   :  { %v4470_v23 = vmul.f32 0.5, %v4469_v50 }
0x10ae   :  { %6635 = vmatpush3.bf16.msra.mxu1 %v8084_v10 }
0x10af   :  { %v4471_v12 = vmul.f32 %v4470_v23, %v4469_v50  ;;  %6648 = vmatprep.subr.bf16.mxu1 %v6881_v1 }
0x10b0   :  { %6629 = vmatmul.mubr.msk.bf16.vlgmr.msra.gmra.mrb[144].mxu0 %vm2782_vm4, %v7633_v47 }
0x10b1   :  { %v4472_v15 = vadd.f32 %v4471_v12, %v4460_v49  ;;  %6641 = vmatpush3.bf16.msra.mxu0 %v8039_v51  ;;  %6644 = vmatprep.mubr.msk.bf16.mxu0 %vm6882_vm0, %v6881_v1  ;;  %v4930_v12 = vsel %vm2820_vm3, %v5598_v5, 0 }
0x10b2   :  { %6642 = vmatprep.subr.bf16.mxu0 %v6881_v1 }
0x10b3   :  { %v4473_v16 = vadd.f32 0.9189385, %v4472_v15  ;;  %v6852_v15 = vld [vmem:[%s8239_s0 + $0x60] sm:$0xff] }
0x10b5   :  { %v8095_v2 = vadd.f32 %v4473_v16, %v8007_v9  ;;  %6643 = vmatpush3.bf16.msra.mxu0 %v8051_v22 }
0x10b6   :  { %6654 = vmatprep.subr.bf16.mxu0 %v6881_v1 }
0x117b   :  { %v4567_v52 = vpop.f32.mrb[140].mxu0  ;;  %v4607_v17 = vpop.f32.mrb[188].mxu1 }
0x117c   :  { %v4608_v19 = vadd.f32 %v8102_v18, %v4607_v17  ;;  %v6616_v20 = vpop.f32.mrb[141].mxu0  ;;  %v6624_v6 = vpop.f32.mrb[189].mxu1  ;;  %v4568_v40 = vadd.f32 %v8114_v14, %v4567_v52 }
0x117d   :  { %v4570_v4 = vpop.f32.mrb[142].mxu0  ;;  %v4610_v55 = vpop.f32.mrb[190].mxu1 }
0x117e   :  { %v4614_v21 = vsub.f32 0.0, %v4608_v19  ;;  %v6617_v9 = vpop.f32.mrb[143].mxu0  ;;  %v6625_v25 = vpop.f32.mrb[191].mxu1  ;;  %v4613_v53 = vsub.f32 %v6851_v43, %v4568_v40  ;;  %v5604_v43 = vld [vmem:[%s8248_s9 + $0x3c] sm:$0xf] }
0x1180   :  { %v4615_v13 = vmul.f32 1.442695, %v4614_v21 }
0x1182   :  { %6819 = vpow2.f32 %v4615_v13 }
0x1183   :  { %v4670_v30 = vpop.f32.mrb[144].mxu0 }
0x1184   :  { %v4671_v31 = vadd.f32 %v5588_v28, %v4670_v30  ;;  %v6630_v32 = vpop.f32.mrb[145].mxu0 }
0x1185   :  { %v4673_v35 = vpop.f32.mrb[146].mxu0 }
0x1186   :  { %v4676_v38 = vmax.f32 %v4671_v31, 0.0  ;;  %v6631_v39 = vpop.f32.mrb[147].mxu0 }
0x1188   :  { %v4677_v46 = vpack.c.bf16 %v4676_v38, %v4676_v38 }
0x118a   :  { %6637 = vmatmul.mubr.msk.bf16.vlgmr.msra.gmra.mrb[192].mxu1 %vm387_vm2, %v4677_v46  ;;  %6645 = vmatmul.mubr.msk.bf16.vlgmr.msra.gmra.mrb[148].mxu0 %vm387_vm2, %v4677_v46 }
0x118b   :  { %6649 = vmatpush3.bf16.msra.mxu1 %v4782_v42  ;;  %6650 = vmatprep.mubr.msk.bf16.mxu1 %vm6882_vm0, %v6881_v1 }
0x118c   :  { %v6820_v54 = vpop.eup %6819  ;;  %6655 = vmatpush3.bf16.msra.mxu0 %v8074_v26  ;;  %6662 = vmatprep.subr.bf16.mxu1 %v6881_v1 }
0x118d   :  { %v4617_v45 = vmul.f32 %v6820_v54, %v4613_v53  ;;  %6656 = vmatprep.subr.bf16.mxu0 %v6881_v1  ;;  %6658 = vmatprep.mubr.msk.bf16.mxu0 %vm6882_vm0, %v6881_v1 }
0x118f   :  { %v4618_v49 = vmul.f32 0.5, %v4617_v45 }
0x1190   :  { %6657 = vmatpush3.bf16.msra.mxu0 %v8084_v10 }
0x1191   :  { %v4619_v48 = vmul.f32 %v4618_v49, %v4617_v45  ;;  %6670 = vmatprep.subr.bf16.mxu0 %v6881_v1 }
0x1192   :  { %6651 = vmatmul.mubr.msk.bf16.vlgmr.msra.gmra.mrb[196].mxu1 %vm2782_vm4, %v7633_v47 }
0x1193   :  { %v4620_v29 = vadd.f32 %v4619_v48, %v4608_v19  ;;  %6663 = vmatpush3.bf16.msra.mxu1 %v8039_v51  ;;  %6666 = vmatprep.mubr.msk.bf16.mxu1 %vm6882_vm0, %v6881_v1  ;;  %v5078_v48 = vsel %vm2820_vm3, %v5604_v43, 0 }
0x1194   :  { %6664 = vmatprep.subr.bf16.mxu1 %v6881_v1 }
0x1195   :  { %v4621_v36 = vadd.f32 0.9189385, %v4620_v29  ;;  %v6853_v29 = vld [vmem:[%s8239_s0 + $0x68] sm:$0xff] }
0x1197   :  { %v8139_v34 = vadd.f32 %v4621_v36, %v8046_v44  ;;  %6665 = vmatpush3.bf16.msra.mxu1 %v8051_v22  ;;  %v5594_v44 = vld [vmem:[%s8249_s10 + $0xd] ss:$0 sm:$0xff] }
0x1198   :  { %6676 = vmatprep.subr.bf16.mxu1 %v6881_v1 }
0x125d   :  { %v4715_v56 = vpop.f32.mrb[192].mxu1  ;;  %v4755_v41 = vpop.f32.mrb[148].mxu0 }
0x125e   :  { %v4756_v0 = vadd.f32 %v8102_v18, %v4755_v41  ;;  %v6638_v57 = vpop.f32.mrb[193].mxu1  ;;  %v6646_v58 = vpop.f32.mrb[149].mxu0  ;;  %v4716_v50 = vadd.f32 %v8114_v14, %v4715_v56 }
0x125f   :  { %v4718_v59 = vpop.f32.mrb[194].mxu1  ;;  %v4758_v24 = vpop.f32.mrb[150].mxu0 }
0x1260   :  { %v4762_v3 = vsub.f32 0.0, %v4756_v0  ;;  %v6639_v60 = vpop.f32.mrb[195].mxu1  ;;  %v6647_v11 = vpop.f32.mrb[151].mxu0  ;;  %v4761_v16 = vsub.f32 %v6852_v15, %v4716_v50  ;;  %v6883_v24 = vmov 0   ;;  %v6855_v15 = vld [vmem:[%s8239_s0 + $0x70] sm:$0xff] }
0x1261   :  { %6722 = vset.pattern.permute.xlu0 %v6883_v24  ;;  %v5232_v24 = vlaneseq }
0x1262   :  { %v4763_v61 = vmul.f32 1.442695, %v4762_v3 }
0x1264   :  { %6821 = vpow2.f32 %v4763_v61 }
0x1265   :  { %v4818_v27 = vpop.f32.mrb[196].mxu1 }
0x1266   :  { %v4819_v62 = vadd.f32 %v5594_v44, %v4818_v27  ;;  %v6652_v33 = vpop.f32.mrb[197].mxu1 }
0x1267   :  { %v4821_v63 = vpop.f32.mrb[198].mxu1 }
0x1268   :  { %v4824_v7 = vmax.f32 %v4819_v62, 0.0  ;;  %v6653_v8 = vpop.f32.mrb[199].mxu1 }
0x126a   :  { %v4825_v23 = vpack.c.bf16 %v4824_v7, %v4824_v7 }
0x126c   :  { %6659 = vmatmul.mubr.msk.bf16.vlgmr.msra.gmra.mrb[152].mxu0 %vm387_vm2, %v4825_v23  ;;  %6667 = vmatmul.mubr.msk.bf16.vlgmr.msra.gmra.mrb[200].mxu1 %vm387_vm2, %v4825_v23 }
0x126d   :  { %6671 = vmatpush3.bf16.msra.mxu0 %v4930_v12  ;;  %6672 = vmatprep.mubr.msk.bf16.mxu0 %vm6882_vm0, %v6881_v1 }
0x126e   :  { %v6822_v52 = vpop.eup %6821  ;;  %6677 = vmatpush3.bf16.msra.mxu1 %v8074_v26  ;;  %6684 = vmatprep.subr.bf16.mxu0 %v6881_v1 }
0x126f   :  { %v4765_v17 = vmul.f32 %v6822_v52, %v4761_v16  ;;  %6678 = vmatprep.subr.bf16.mxu1 %v6881_v1  ;;  %6680 = vmatprep.mubr.msk.bf16.mxu1 %vm6882_vm0, %v6881_v1 }
0x1271   :  { %v4766_v19 = vmul.f32 0.5, %v4765_v17 }
0x1272   :  { %6679 = vmatpush3.bf16.msra.mxu1 %v8084_v10 }
0x1273   :  { %v4767_v20 = vmul.f32 %v4766_v19, %v4765_v17  ;;  %6692 = vmatprep.subr.bf16.mxu1 %v6881_v1 }
0x1274   :  { %6673 = vmatmul.mubr.msk.bf16.vlgmr.msra.gmra.mrb[156].mxu0 %vm2782_vm4, %v7633_v47 }
0x1275   :  { %v4768_v6 = vadd.f32 %v4767_v20, %v4756_v0  ;;  %6685 = vmatpush3.bf16.msra.mxu0 %v8039_v51  ;;  %6688 = vmatprep.mubr.msk.bf16.mxu0 %vm6882_vm0, %v6881_v1 }
0x1276   :  { %6686 = vmatprep.subr.bf16.mxu0 %v6881_v1 }
0x1277   :  { %v4769_v4 = vadd.f32 0.9189385, %v4768_v6 }
0x1279   :  { %v8173_v55 = vadd.f32 %v4769_v4, %v8095_v2  ;;  %6687 = vmatpush3.bf16.msra.mxu0 %v8051_v22  ;;  %v5600_v2 = vld [vmem:[%s8249_s10 + $0xe] ss:$0 sm:$0xff] }
0x127a   :  { %6698 = vmatprep.subr.bf16.mxu0 %v6881_v1 }
0x133f   :  { %v4863_v21 = vpop.f32.mrb[152].mxu0  ;;  %v4903_v9 = vpop.f32.mrb[200].mxu1 }
0x1340   :  { %v4904_v25 = vadd.f32 %v8102_v18, %v4903_v9  ;;  %v6660_v13 = vpop.f32.mrb[153].mxu0  ;;  %v6668_v28 = vpop.f32.mrb[201].mxu1  ;;  %v4864_v45 = vadd.f32 %v8114_v14, %v4863_v21 }
0x1341   :  { %v4866_v30 = vpop.f32.mrb[154].mxu0  ;;  %v4906_v31 = vpop.f32.mrb[202].mxu1 }
0x1342   :  { %v4910_v32 = vsub.f32 0.0, %v4904_v25  ;;  %v6661_v35 = vpop.f32.mrb[155].mxu0  ;;  %v6669_v37 = vpop.f32.mrb[203].mxu1  ;;  %v4909_v36 = vsub.f32 %v6853_v29, %v4864_v45 }
0x1344   :  { %v4911_v38 = vmul.f32 1.442695, %v4910_v32 }
0x1346   :  { %6823 = vpow2.f32 %v4911_v38 }
0x1347   :  { %v4966_v39 = vpop.f32.mrb[156].mxu0 }
0x1348   :  { %v4967_v40 = vadd.f32 %v5600_v2, %v4966_v39  ;;  %v6674_v46 = vpop.f32.mrb[157].mxu0 }
0x1349   :  { %v4969_v42 = vpop.f32.mrb[158].mxu0 }
0x134a   :  { %v4972_v53 = vmax.f32 %v4967_v40, 0.0  ;;  %v6675_v54 = vpop.f32.mrb[159].mxu0  ;;  %v6856_v40 = vld [vmem:[%s8239_s0 + $0x78] sm:$0xff]  ;;  %s6715_s0 = spop %6714 }
0x134c   :  { %v4973_v49 = vpack.c.bf16 %v4972_v53, %v4972_v53 }
0x134e   :  { %6681 = vmatmul.mubr.msk.bf16.vlgmr.msra.gmra.mrb[204].mxu1 %vm387_vm2, %v4973_v49  ;;  %6689 = vmatmul.mubr.msk.bf16.vlgmr.msra.gmra.mrb[160].mxu0 %vm387_vm2, %v4973_v49 }
0x134f   :  { %6693 = vmatpush3.bf16.msra.mxu1 %v5078_v48  ;;  %6694 = vmatprep.mubr.msk.bf16.mxu1 %vm6882_vm0, %v6881_v1 }
0x1350   :  { %v6824_v56 = vpop.eup %6823  ;;  %6706 = vmatprep.subr.bf16.mxu1 %v6881_v1  ;;  %6699 = vmatpush3.bf16.msra.mxu0 %v8074_v26 }
0x1351   :  { %v4913_v41 = vmul.f32 %v6824_v56, %v4909_v36  ;;  %6700 = vmatprep.subr.bf16.mxu0 %v6881_v1  ;;  %6702 = vmatprep.mubr.msk.bf16.mxu0 %vm6882_vm0, %v6881_v1 }
0x1353   :  { %v4914_v0 = vmul.f32 0.5, %v4913_v41 }
0x1354   :  { %6701 = vmatpush3.bf16.msra.mxu0 %v8084_v10  ;;  %v6854_v10 = vld [vmem:[%s8241_s2] sm:$0xff] }
0x1355   :  { %v4915_v57 = vmul.f32 %v4914_v0, %v4913_v41  ;;  %5218 = vperm.xlu0 %6722, %v6854_v10   ;;  %v5233_v10 = vshrl.u32 %v5232_v24, 7 }
0x1356   :  { %6695 = vmatmul.mubr.msk.bf16.vlgmr.msra.gmra.mrb[208].mxu1 %vm2782_vm4, %v7633_v47 }
0x1357   :  { %v4916_v58 = vadd.f32 %v4915_v57, %v4904_v25  ;;  %6707 = vmatpush3.bf16.msra.mxu1 %v8039_v51  ;;  %6710 = vmatprep.mubr.msk.bf16.mxu1 %vm6882_vm0, %v6881_v1  ;;  %vm5235_vm6 = vcmp.eq.s32.totalorder %v5233_v10, 1  ;;  %vm5234_vm7 = vcmp.eq.s32.totalorder %v5233_v10, 0 }
0x1358   :  { %6708 = vmatprep.subr.bf16.mxu1 %v6881_v1 }
0x1359   :  { %v4917_v26 = vadd.f32 0.9189385, %v4916_v58 }
0x135b   :  { %v4918_v59 = vadd.f32 %v4917_v26, %v8139_v34  ;;  %6709 = vmatpush3.bf16.msra.mxu1 %v8051_v22  ;;  %v5606_v22 = vld [vmem:[%s8249_s10 + $0xf] ss:$0 sm:$0xff] }
0x13d4   :  { %v5219_v49 = vpop.permute.xlu0 %5218 }
0x1421   :  { %v5011_v47 = vpop.f32.mrb[204].mxu1  ;;  %v5051_v3 = vpop.f32.mrb[160].mxu0 }
0x1422   :  { %v5052_v51 = vadd.f32 %v8102_v18, %v5051_v3  ;;  %v6682_v60 = vpop.f32.mrb[205].mxu1  ;;  %v6690_v11 = vpop.f32.mrb[161].mxu0  ;;  %v5012_v23 = vadd.f32 %v8114_v14, %v5011_v47  ;;  %v5238_v47 = vstv %s6715_s0 }
0x1423   :  { %v5014_v61 = vpop.f32.mrb[206].mxu1  ;;  %v5054_v1 = vpop.f32.mrb[162].mxu0 }
0x1424   :  { %v5058_v44 = vsub.f32 0.0, %v5052_v51  ;;  %v6683_v27 = vpop.f32.mrb[207].mxu1  ;;  %v6691_v34 = vpop.f32.mrb[163].mxu0  ;;  %v5057_v16 = vsub.f32 %v6855_v15, %v5012_v23 }
0x1426   :  { %v5059_v62 = vmul.f32 1.442695, %v5058_v44 }
0x1428   :  { %6825 = vpow2.f32 %v5059_v62 }
0x1429   :  { %v5114_v33 = vpop.f32.mrb[208].mxu1 }
0x142a   :  { %v5115_v63 = vadd.f32 %v5606_v22, %v5114_v33  ;;  %v6696_v5 = vpop.f32.mrb[209].mxu1 }
0x142b   :  { %v5117_v7 = vpop.f32.mrb[210].mxu1 }
0x142c   :  { %v5120_v8 = vmax.f32 %v5115_v63, 0.0  ;;  %v6697_v50 = vpop.f32.mrb[211].mxu1 }
0x142e   :  { %v5121_v12 = vpack.c.bf16 %v5120_v8, %v5120_v8 }
0x1430   :  { %6703 = vmatmul.mubr.msk.bf16.vlgmr.msra.gmra.mrb[164].mxu0 %vm387_vm2, %v5121_v12  ;;  %6711 = vmatmul.mubr.msk.bf16.vlgmr.msra.gmra.mrb[212].mxu1 %vm387_vm2, %v5121_v12 }
0x1432   :  { %v6826_v52 = vpop.eup %6825 }
0x1433   :  { %v5061_v17 = vmul.f32 %v6826_v52, %v5057_v16 }
0x1435   :  { %v5062_v19 = vmul.f32 0.5, %v5061_v17 }
0x1437   :  { %v5063_v20 = vmul.f32 %v5062_v19, %v5061_v17 }
0x1439   :  { %v5064_v6 = vadd.f32 %v5063_v20, %v5052_v51 }
0x143b   :  { %v5065_v4 = vadd.f32 0.9189385, %v5064_v6 }
0x143d   :  { %v5066_v21 = vadd.f32 %v5065_v4, %v8173_v55 }
0x1503   :  { %v5159_v9 = vpop.f32.mrb[164].mxu0  ;;  %v5199_v25 = vpop.f32.mrb[212].mxu1 }
0x1504   :  { %v5200_v13 = vadd.f32 %v8102_v18, %v5199_v25  ;;  %v6704_v28 = vpop.f32.mrb[165].mxu0  ;;  %v6712_v30 = vpop.f32.mrb[213].mxu1  ;;  %v5160_v39 = vadd.f32 %v8114_v14, %v5159_v9 }
0x1505   :  { %v5162_v31 = vpop.f32.mrb[166].mxu0  ;;  %v5202_v32 = vpop.f32.mrb[214].mxu1 }
0x1506   :  { %v5206_v35 = vsub.f32 0.0, %v5200_v13  ;;  %v6705_v37 = vpop.f32.mrb[167].mxu0  ;;  %v6713_v38 = vpop.f32.mrb[215].mxu1  ;;  %v5205_v55 = vsub.f32 %v6856_v40, %v5160_v39 }
0x1508   :  { %v5207_v2 = vmul.f32 1.442695, %v5206_v35 }
0x150a   :  { %6827 = vpow2.f32 %v5207_v2 }
0x1514   :  { %v6828_v46 = vpop.eup %6827 }
0x1515   :  { %v5209_v42 = vmul.f32 %v6828_v46, %v5205_v55 }
0x1517   :  { %v5210_v43 = vmul.f32 0.5, %v5209_v42 }
0x1519   :  { %v5211_v18 = vmul.f32 %v5210_v43, %v5209_v42 }
0x151b   :  { %v5212_v53 = vadd.f32 %v5211_v18, %v5200_v13 }
0x151d   :  { %v5213_v54 = vadd.f32 0.9189385, %v5212_v53 }
0x151f   :  { %v5214_v45 = vadd.f32 %v5213_v54, %v4918_v59 }
0x1521   :  { %v5215_v48 = vadd.f32 %v5214_v45, %v5066_v21 }
0x1523   :  { %v5221_v29 = vmul.f32 %v5219_v49, %v5215_v48 }
0x1525   :  { %v5222_v36 = vsel %vm94_vm1, %v5221_v29, 0.0 }
0x1526   :  { %5223 = vadd.xlane.f32.xlu1 %v5222_v36 }
0x15b3   :  { %v5224_v56 = vpop.xlane.xlu1 %5223 }
0x15b4   :  { %v5225_v14 = vrot.slane %v5224_v56, 4 }
0x15b6   :  { %v5226_v41 = vadd.f32 %v5225_v14, %v5224_v56 }
0x15b8   :  { %v5227_v0 = vrot.slane %v5226_v41, 2 }
0x15ba   :  { %v5228_v57 = vadd.f32 %v5227_v0, %v5226_v41 }
0x15bc   :  { %v5229_v58 = vrot.slane %v5228_v57, 1 }
0x15be   :  { %v5230_v26 = vadd.f32 %v5229_v58, %v5228_v57 }
0x15c0   :  { %6716 = vpush %v5230_v26 }
0x15f1   :  { %s6717_s4 = spop %6716 }
0x15f2   :  { %v5236_v59 = vstv %s6717_s4 }
0x15f3   :  { %v5237_v3 = vsel %vm5235_vm6, %v5236_v59, 0.0 }
0x15f4   :  { %v5239_v51 = vsel %vm5234_vm7, %v5238_v47, %v5237_v3 }
0x15f5   :  { %5240 = vst [vmem:[#allocation2] sm:$0xff] %v5239_v51 }
0x15f6   :  { %6868 = shalt.err (!%p6865_p4)
}
0x15f7   :  { %s6869_s22 = scalar_lea.hbm %s8254_s15, 128 }
0x15f8   :  { %p6870_p5 = scmp.ne.s32.totalorder %s8254_s15, %s6869_s22  ;;  %p6873_p6 = scmp.lt.u32.totalorder %s6869_s22, %s8254_s15 }
0x15fa   :  { %p6875_p7 = pnand %p6873_p6, %p6870_p5 }
0x15fc   :  { %6878 = shalt.err (!%p6875_p7)
}
0x15fd   :  { %5250 = dma.vmem_to_hbm [thread:$0]  %s5248_s19, 128, %s8254_s15, [#allocation3]  }
0x15fe   :  { %6879 = dma.done.wait [#allocation3], 128  }
0x15ff   :  { %6880 = vsyncadd [#allocation3], 4294967168 }
0x1600   :  { %5254 = vsyncpa [#allocation3], 1 }

</bundles_post_ra>
